<compile_context>
chip_gen: v6e
topology: v6e:2x2x1
jax: 0.10.0
libtpu: 0.0.40
codegen_flags: <defaults>
</compile_context>

<pallas_src>
import jax
import jax.numpy as jnp
from jax.experimental import pallas as pl
from jax.experimental.pallas import tpu as pltpu

N_NODES = 16
N_EDGES = 64
IN_CHANNELS = 32
OUT_CHANNELS = 32
PSEUDO_DIM = 2          # SplineConv dim=2
KERNEL_SIZE = 5         # per pseudo-dimension
DEGREE = 1              # linear open B-splines (SplineConv default)
K_TOTAL = KERNEL_SIZE ** PSEUDO_DIM   # 25 kernel weight matrices
NUM_LAYERS = 2
CAT = True
LIN = True
DROPOUT = 0.0           # F.dropout with p=0 is the identity
ACT = "relu"


# ------------------------------ Pallas kernel -------------------------------

def fused_splinecnn_kernel(x_ref, src_oh_ref, coeffT_ref, tgt_ref,
                           w1s_ref, w1r_ref, b1_ref,
                           w2s_ref, w2r_ref, b2_ref,
                           wf0_ref, wf1_ref, wf2_ref, bf_ref,
                           out_ref):
    """Fused 2-layer SplineCNN forward (conv+relu, conv+relu, cat, linear).

    x_ref:        [N, C_in]        f32  node features
    src_oh_ref:   [E, N]           f32  one-hot of edge_index[0] (gather matrix)
    coeffT_ref:   [K, E]           f32  B-spline coefficient of kernel k for edge e
    tgt_ref:      [1, E]           i32  edge_index[1]
    w{1,2}s_ref:  [C_out, K*C_in]  bf16 spline weights, (k,c)-flattened, transposed
    w{1,2}r_ref:  [C_in, C_out]    bf16 root weights
    b{1,2}_ref:   [1, C_out]       f32
    wf{0,1,2}_ref:[C, C_out]       bf16 final Linear weight rows for [x | h1 | h2]
    bf_ref:       [1, C_out]       f32
    out_ref:      [N, C_out]       f32
    """
    n = x_ref.shape[0]
    e = src_oh_ref.shape[0]
    k_total = coeffT_ref.shape[0]

    x0 = x_ref[...]
    src_oh = src_oh_ref[...]
    coeffT = coeffT_ref[...]

    # Target-node membership mask, shared by both layers.
    node_ids = jax.lax.broadcasted_iota(jnp.int32, (n, e), 0)
    mask = node_ids == tgt_ref[...]                                   # [N, E]
    has_edge = jnp.sum(mask.astype(jnp.float32), axis=1, keepdims=True) > 0.0

    def spline_conv(x, ws_ref, wr_ref, b_ref):
        c_in = x.shape[1]
        # Gather x[src] directly in transposed layout: x_srcT[c, e] = x[src[e], c]
        # (one MXU matmul, kept f32 so the one-hot selection is exact).
        x_srcT = jax.lax.dot_general(
            x, src_oh, (((0,), (1,)), ((), ())),
            preferred_element_type=jnp.float32)                       # [C_in, E]
        # Khatri-Rao operand: krT[k*C_in + c, e] = coeff[k, e] * x_src[e, c].
        # [K, C_in, E] -> [K*C_in, E] collapses leading dims only (layout-trivial).
        krT = (coeffT[:, None, :] * x_srcT[None, :, :]).reshape(k_total * c_in, e)
        # All K kernel matmuls as ONE MXU matmul: [C_out, K*C_in] @ [K*C_in, E].
        msgT = jnp.dot(ws_ref[...], krT.astype(jnp.bfloat16),
                       preferred_element_type=jnp.float32)            # [C_out, E]
        # Scatter-max over edges onto target nodes (dense masked lane reduce).
        # TODO(synk): for large N/E tile this over edge/node blocks (O(N*E*C) f32
        # would not fit v7x's 64 MiB VMEM) or pre-sort edges by tgt (scalar prefetch)
        # and do a segmented max.
        masked = jnp.where(mask[:, None, :], msgT[None, :, :], -jnp.inf)  # [N, C_out, E]
        agg = jnp.max(masked, axis=-1)                                # [N, C_out]
        agg = jnp.where(has_edge, agg, 0.0)   # torch_scatter 'max': isolated nodes -> 0
        root = jnp.dot(x.astype(jnp.bfloat16), wr_ref[...],
                       preferred_element_type=jnp.float32)            # [N, C_out]
        return jnp.maximum(agg + root + b_ref[...], 0.0)              # act='relu'

    h1 = spline_conv(x0, w1s_ref, w1r_ref, b1_ref)
    h2 = spline_conv(h1, w2s_ref, w2r_ref, b2_ref)

    # cat([x, h1, h2], -1) + F.dropout(p=0) + final Linear, with the concat folded
    # into three block matmuls against the row-split final weight (no lane concat).
    out_ref[...] = (
        jnp.dot(x0.astype(jnp.bfloat16), wf0_ref[...], preferred_element_type=jnp.float32)
        + jnp.dot(h1.astype(jnp.bfloat16), wf1_ref[...], preferred_element_type=jnp.float32)
        + jnp.dot(h2.astype(jnp.bfloat16), wf2_ref[...], preferred_element_type=jnp.float32)
        + bf_ref[...])


def _vmem_spec():
    return pl.BlockSpec(memory_space=pltpu.MemorySpace.VMEM)


def splinecnn_fused_call(x, src_onehot, coeffT, tgt, params):
    args = (x, src_onehot, coeffT, tgt,
            params["w1s"], params["w1r"], params["b1"],
            params["w2s"], params["w2r"], params["b2"],
            params["wf0"], params["wf1"], params["wf2"], params["bf"])
    # TODO(synk): when batching many graphs / large N, add a 'parallel' grid axis
    # (per-graph or per-node-block) with (8,128)-aligned BlockSpecs so the second
    # v7x TensorCore and BlockSpec double-buffering are used.
    return pl.pallas_call(
        fused_splinecnn_kernel,
        out_shape=jax.ShapeDtypeStruct((x.shape[0], OUT_CHANNELS), jnp.float32),
        in_specs=[_vmem_spec() for _ in args],
        out_specs=_vmem_spec(),
    )(*args)


# ------------------------------- glue (JAX) ---------------------------------

def spline_basis_coeff(edge_attr):
    """Degree-1 open B-spline basis summed into a dense [E, K] coefficient.

    Matches torch_spline_conv's spline_basis: for each of S=(deg+1)^dim products,
    weight_index = sum_d ((floor(v_d) + k_mod_d) % K_d) * offset_d and
    basis = prod_d (frac_d or 1 - frac_d).
    """
    e, dim = edge_attr.shape
    v = edge_attr * (KERNEL_SIZE - DEGREE)      # open spline scaling
    fi = jnp.floor(v).astype(jnp.int32)         # [E, dim]
    frac = v - jnp.floor(v)                     # [E, dim]
    s_total = (DEGREE + 1) ** dim
    coeff = jnp.zeros((e, K_TOTAL), jnp.float32)
    for s in range(s_total):
        b = jnp.ones((e,), jnp.float32)
        wi = jnp.zeros((e,), jnp.int32)
        wi_offset = 1
        for d in range(dim):
            k_mod = (s // ((DEGREE + 1) ** d)) % (DEGREE + 1)
            wi = wi + ((fi[:, d] + k_mod) % KERNEL_SIZE) * wi_offset
            wi_offset *= KERNEL_SIZE
            b = b * (frac[:, d] if k_mod == 1 else (1.0 - frac[:, d]))
        coeff = coeff + b[:, None] * jax.nn.one_hot(wi, K_TOTAL, dtype=jnp.float32)
    return coeff                                # [E, K]


def init_params(key):
    """Deterministic synthetic init, pre-laid-out for the fused kernel."""
    c_in = IN_CHANNELS
    convs = []
    for _ in range(NUM_LAYERS):
        key, k1, k2, k3 = jax.random.split(key, 4)
        scale = 1.0 / jnp.sqrt(jnp.float32(c_in * K_TOTAL))
        w_spline = scale * jax.random.normal(
            k1, (K_TOTAL, c_in, OUT_CHANNELS), jnp.float32)
        w_root = (1.0 / jnp.sqrt(jnp.float32(c_in))) * jax.random.normal(
            k2, (c_in, OUT_CHANNELS), jnp.float32)
        bias = 0.01 * jax.random.normal(k3, (1, OUT_CHANNELS), jnp.float32)
        convs.append((w_spline, w_root, bias))
        c_in = OUT_CHANNELS

    cat_dim = IN_CHANNELS + NUM_LAYERS * OUT_CHANNELS if CAT else OUT_CHANNELS
    key, k1, k2 = jax.random.split(key, 3)
    final_w = (1.0 / jnp.sqrt(jnp.float32(cat_dim))) * jax.random.normal(
        k1, (cat_dim, OUT_CHANNELS), jnp.float32)
    final_b = 0.01 * jax.random.normal(k2, (1, OUT_CHANNELS), jnp.float32)

    def spline_2dT(w):   # [K, C_in, C_out] -> [C_out, K*C_in], (k,c)-flattened
        k, ci, co = w.shape
        return jnp.transpose(w.reshape(k * ci, co)).astype(jnp.bfloat16)

    (w1s, w1r, b1), (w2s, w2r, b2) = convs
    return {
        "w1s": spline_2dT(w1s), "w1r": w1r.astype(jnp.bfloat16), "b1": b1,
        "w2s": spline_2dT(w2s), "w2r": w2r.astype(jnp.bfloat16), "b2": b2,
        "wf0": final_w[:IN_CHANNELS].astype(jnp.bfloat16),
        "wf1": final_w[IN_CHANNELS:IN_CHANNELS + OUT_CHANNELS].astype(jnp.bfloat16),
        "wf2": final_w[IN_CHANNELS + OUT_CHANNELS:].astype(jnp.bfloat16),
        "bf": final_b,
    }


@jax.jit
def spline_cnn_forward(params, x, edge_index, edge_attr):
    src = edge_index[0]
    tgt = edge_index[1][None, :].astype(jnp.int32)                    # [1, E]
    coeffT = jnp.transpose(spline_basis_coeff(edge_attr))             # [K, E] lane-dense
    src_onehot = jax.nn.one_hot(src, x.shape[0], dtype=jnp.float32)   # [E, N]
    return splinecnn_fused_call(x, src_onehot, coeffT, tgt, params)


if __name__ == "__main__":
    key = jax.random.PRNGKey(0)
    key, kx, ks, kt, ka = jax.random.split(key, 5)

    x = jax.random.normal(kx, (N_NODES, IN_CHANNELS), jnp.float32)
    src = jax.random.randint(ks, (N_EDGES,), 0, N_NODES, dtype=jnp.int32)
    # guarantee every node receives at least one message (torch_scatter 'max'
    # would otherwise fill untouched rows with zero; we replicate that anyway)
    tgt = jnp.concatenate([
        jnp.arange(N_NODES, dtype=jnp.int32),
        jax.random.randint(kt, (N_EDGES - N_NODES,), 0, N_NODES, dtype=jnp.int32),
    ])
    edge_index = jnp.stack([src, tgt], axis=0)                        # [2, E]
    edge_attr = jax.random.uniform(ka, (N_EDGES, PSEUDO_DIM), jnp.float32)

    params = init_params(key)
    out = spline_cnn_forward(params, x, edge_index, edge_attr)
    out = jax.block_until_ready(out)
    assert out.shape == (N_NODES, OUT_CHANNELS)
    assert bool(jnp.all(jnp.isfinite(out)))
    print("KERNEL_OK")
</pallas_src>

<mosaic_0001>
module attributes {stable_mosaic.version = 11 : i64} {
  func.func @fused_splinecnn_kernel(%arg0: memref<16x32xf32, #tpu.memory_space<vmem>>, %arg1: memref<64x16xf32, #tpu.memory_space<vmem>>, %arg2: memref<25x64xf32, #tpu.memory_space<vmem>>, %arg3: memref<1x64xi32, #tpu.memory_space<vmem>>, %arg4: memref<32x800xbf16, #tpu.memory_space<vmem>>, %arg5: memref<32x32xbf16, #tpu.memory_space<vmem>>, %arg6: memref<1x32xf32, #tpu.memory_space<vmem>>, %arg7: memref<32x800xbf16, #tpu.memory_space<vmem>>, %arg8: memref<32x32xbf16, #tpu.memory_space<vmem>>, %arg9: memref<1x32xf32, #tpu.memory_space<vmem>>, %arg10: memref<32x32xbf16, #tpu.memory_space<vmem>>, %arg11: memref<32x32xbf16, #tpu.memory_space<vmem>>, %arg12: memref<32x32xbf16, #tpu.memory_space<vmem>>, %arg13: memref<1x32xf32, #tpu.memory_space<vmem>>, %arg14: memref<16x32xf32, #tpu.memory_space<vmem>>) attributes {dimension_semantics = [], scalar_prefetch = 0 : i64, scratch_operands = 0 : i64, tpu.core_type = #tpu.core_type<tc>} {
    %c0 = arith.constant 0 : index
    %c0_0 = arith.constant 0 : index
    %0 = vector.load %arg0[%c0, %c0_0] : memref<16x32xf32, #tpu.memory_space<vmem>>, vector<16x32xf32>
    %c0_1 = arith.constant 0 : index
    %c0_2 = arith.constant 0 : index
    %1 = vector.load %arg1[%c0_1, %c0_2] : memref<64x16xf32, #tpu.memory_space<vmem>>, vector<64x16xf32>
    %c0_3 = arith.constant 0 : index
    %c0_4 = arith.constant 0 : index
    %2 = vector.load %arg2[%c0_3, %c0_4] : memref<25x64xf32, #tpu.memory_space<vmem>>, vector<25x64xf32>
    %3 = tpu.iota {dimensions = array<i32: 0>} : vector<16x64xi32>
    %c0_5 = arith.constant 0 : index
    %c0_6 = arith.constant 0 : index
    %4 = vector.load %arg3[%c0_5, %c0_6] : memref<1x64xi32, #tpu.memory_space<vmem>>, vector<1x64xi32>
    %5 = vector.broadcast %4 : vector<1x64xi32> to vector<16x64xi32>
    %6 = arith.cmpi eq, %3, %5 : vector<16x64xi32>
    %7 = arith.extui %6 : vector<16x64xi1> to vector<16x64xi32>
    %8 = arith.sitofp %7 : vector<16x64xi32> to vector<16x64xf32>
    %cst = arith.constant dense<0.000000e+00> : vector<16xf32>
    %9 = vector.multi_reduction <add>, %8, %cst [1] : vector<16x64xf32> to vector<16xf32>
    %10 = vector.shape_cast %9 : vector<16xf32> to vector<16x1xf32>
    %cst_7 = arith.constant 0.000000e+00 : f32
    %11 = vector.broadcast %cst_7 : f32 to vector<16x1xf32>
    %12 = arith.cmpf ogt, %10, %11 : vector<16x1xf32>
    %cst_8 = arith.constant dense<0.000000e+00> : vector<32x64xf32>
    %13 = tpu.matmul %0, %1, %cst_8 {dimension_numbers = #tpu.dot_dimension_numbers<[0], [1], [1], [0], [0, 1, 1, 0], [], []>} : vector<16x32xf32>, vector<64x16xf32>, vector<32x64xf32> -> vector<32x64xf32>
    %14 = vector.shape_cast %2 : vector<25x64xf32> to vector<25x1x64xf32>
    %15 = vector.shape_cast %13 : vector<32x64xf32> to vector<1x32x64xf32>
    %16 = vector.broadcast %14 : vector<25x1x64xf32> to vector<25x32x64xf32>
    %17 = vector.broadcast %15 : vector<1x32x64xf32> to vector<25x32x64xf32>
    %18 = arith.mulf %16, %17 : vector<25x32x64xf32>
    %19 = vector.shape_cast %18 : vector<25x32x64xf32> to vector<800x64xf32>
    %c0_9 = arith.constant 0 : index
    %c0_10 = arith.constant 0 : index
    %20 = vector.load %arg4[%c0_9, %c0_10] : memref<32x800xbf16, #tpu.memory_space<vmem>>, vector<32x800xbf16>
    %21 = arith.truncf %19 : vector<800x64xf32> to vector<800x64xbf16>
    %cst_11 = arith.constant dense<0.000000e+00> : vector<32x64xf32>
    %22 = tpu.matmul %20, %21, %cst_11 {dimension_numbers = #tpu.dot_dimension_numbers<[1], [0], [0], [1], [0, 0, 1, 1], [], []>} : vector<32x800xbf16>, vector<800x64xbf16>, vector<32x64xf32> -> vector<32x64xf32>
    %23 = vector.shape_cast %6 : vector<16x64xi1> to vector<16x1x64xi1>
    %24 = vector.shape_cast %22 : vector<32x64xf32> to vector<1x32x64xf32>
    %cst_12 = arith.constant 0xFF800000 : f32
    %25 = vector.shape_cast %23 : vector<16x1x64xi1> to vector<16x1x64xi1>
    %26 = vector.broadcast %25 : vector<16x1x64xi1> to vector<16x32x64xi1>
    %27 = vector.shape_cast %24 : vector<1x32x64xf32> to vector<1x32x64xf32>
    %28 = vector.broadcast %27 : vector<1x32x64xf32> to vector<16x32x64xf32>
    %29 = vector.broadcast %cst_12 : f32 to vector<16x32x64xf32>
    %30 = arith.select %26, %28, %29 : vector<16x32x64xi1>, vector<16x32x64xf32>
    %cst_13 = arith.constant dense<0xFF800000> : vector<16x32xf32>
    %31 = vector.multi_reduction <maximumf>, %30, %cst_13 [2] : vector<16x32x64xf32> to vector<16x32xf32>
    %cst_14 = arith.constant 0.000000e+00 : f32
    %32 = vector.shape_cast %12 : vector<16x1xi1> to vector<16x1xi1>
    %33 = vector.broadcast %32 : vector<16x1xi1> to vector<16x32xi1>
    %34 = vector.broadcast %cst_14 : f32 to vector<16x32xf32>
    %35 = arith.select %33, %31, %34 : vector<16x32xi1>, vector<16x32xf32>
    %36 = arith.truncf %0 : vector<16x32xf32> to vector<16x32xbf16>
    %c0_15 = arith.constant 0 : index
    %c0_16 = arith.constant 0 : index
    %37 = vector.load %arg5[%c0_15, %c0_16] : memref<32x32xbf16, #tpu.memory_space<vmem>>, vector<32x32xbf16>
    %cst_17 = arith.constant dense<0.000000e+00> : vector<16x32xf32>
    %38 = tpu.matmul %36, %37, %cst_17 {dimension_numbers = #tpu.dot_dimension_numbers<[1], [0], [0], [1], [0, 0, 1, 1], [], []>} : vector<16x32xbf16>, vector<32x32xbf16>, vector<16x32xf32> -> vector<16x32xf32>
    %39 = arith.addf %35, %38 : vector<16x32xf32>
    %c0_18 = arith.constant 0 : index
    %c0_19 = arith.constant 0 : index
    %40 = vector.load %arg6[%c0_18, %c0_19] : memref<1x32xf32, #tpu.memory_space<vmem>>, vector<1x32xf32>
    %41 = vector.broadcast %40 : vector<1x32xf32> to vector<16x32xf32>
    %42 = arith.addf %39, %41 : vector<16x32xf32>
    %cst_20 = arith.constant 0.000000e+00 : f32
    %43 = vector.broadcast %cst_20 : f32 to vector<16x32xf32>
    %44 = arith.maximumf %42, %43 : vector<16x32xf32>
    %cst_21 = arith.constant dense<0.000000e+00> : vector<32x64xf32>
    %45 = tpu.matmul %44, %1, %cst_21 {dimension_numbers = #tpu.dot_dimension_numbers<[0], [1], [1], [0], [0, 1, 1, 0], [], []>} : vector<16x32xf32>, vector<64x16xf32>, vector<32x64xf32> -> vector<32x64xf32>
    %46 = vector.shape_cast %2 : vector<25x64xf32> to vector<25x1x64xf32>
    %47 = vector.shape_cast %45 : vector<32x64xf32> to vector<1x32x64xf32>
    %48 = vector.broadcast %46 : vector<25x1x64xf32> to vector<25x32x64xf32>
    %49 = vector.broadcast %47 : vector<1x32x64xf32> to vector<25x32x64xf32>
    %50 = arith.mulf %48, %49 : vector<25x32x64xf32>
    %51 = vector.shape_cast %50 : vector<25x32x64xf32> to vector<800x64xf32>
    %c0_22 = arith.constant 0 : index
    %c0_23 = arith.constant 0 : index
    %52 = vector.load %arg7[%c0_22, %c0_23] : memref<32x800xbf16, #tpu.memory_space<vmem>>, vector<32x800xbf16>
    %53 = arith.truncf %51 : vector<800x64xf32> to vector<800x64xbf16>
    %cst_24 = arith.constant dense<0.000000e+00> : vector<32x64xf32>
    %54 = tpu.matmul %52, %53, %cst_24 {dimension_numbers = #tpu.dot_dimension_numbers<[1], [0], [0], [1], [0, 0, 1, 1], [], []>} : vector<32x800xbf16>, vector<800x64xbf16>, vector<32x64xf32> -> vector<32x64xf32>
    %55 = vector.shape_cast %6 : vector<16x64xi1> to vector<16x1x64xi1>
    %56 = vector.shape_cast %54 : vector<32x64xf32> to vector<1x32x64xf32>
    %cst_25 = arith.constant 0xFF800000 : f32
    %57 = vector.shape_cast %55 : vector<16x1x64xi1> to vector<16x1x64xi1>
    %58 = vector.broadcast %57 : vector<16x1x64xi1> to vector<16x32x64xi1>
    %59 = vector.shape_cast %56 : vector<1x32x64xf32> to vector<1x32x64xf32>
    %60 = vector.broadcast %59 : vector<1x32x64xf32> to vector<16x32x64xf32>
    %61 = vector.broadcast %cst_25 : f32 to vector<16x32x64xf32>
    %62 = arith.select %58, %60, %61 : vector<16x32x64xi1>, vector<16x32x64xf32>
    %cst_26 = arith.constant dense<0xFF800000> : vector<16x32xf32>
    %63 = vector.multi_reduction <maximumf>, %62, %cst_26 [2] : vector<16x32x64xf32> to vector<16x32xf32>
    %cst_27 = arith.constant 0.000000e+00 : f32
    %64 = vector.shape_cast %12 : vector<16x1xi1> to vector<16x1xi1>
    %65 = vector.broadcast %64 : vector<16x1xi1> to vector<16x32xi1>
    %66 = vector.broadcast %cst_27 : f32 to vector<16x32xf32>
    %67 = arith.select %65, %63, %66 : vector<16x32xi1>, vector<16x32xf32>
    %68 = arith.truncf %44 : vector<16x32xf32> to vector<16x32xbf16>
    %c0_28 = arith.constant 0 : index
    %c0_29 = arith.constant 0 : index
    %69 = vector.load %arg8[%c0_28, %c0_29] : memref<32x32xbf16, #tpu.memory_space<vmem>>, vector<32x32xbf16>
    %cst_30 = arith.constant dense<0.000000e+00> : vector<16x32xf32>
    %70 = tpu.matmul %68, %69, %cst_30 {dimension_numbers = #tpu.dot_dimension_numbers<[1], [0], [0], [1], [0, 0, 1, 1], [], []>} : vector<16x32xbf16>, vector<32x32xbf16>, vector<16x32xf32> -> vector<16x32xf32>
    %71 = arith.addf %67, %70 : vector<16x32xf32>
    %c0_31 = arith.constant 0 : index
    %c0_32 = arith.constant 0 : index
    %72 = vector.load %arg9[%c0_31, %c0_32] : memref<1x32xf32, #tpu.memory_space<vmem>>, vector<1x32xf32>
    %73 = vector.broadcast %72 : vector<1x32xf32> to vector<16x32xf32>
    %74 = arith.addf %71, %73 : vector<16x32xf32>
    %cst_33 = arith.constant 0.000000e+00 : f32
    %75 = vector.broadcast %cst_33 : f32 to vector<16x32xf32>
    %76 = arith.maximumf %74, %75 : vector<16x32xf32>
    %77 = arith.truncf %0 : vector<16x32xf32> to vector<16x32xbf16>
    %c0_34 = arith.constant 0 : index
    %c0_35 = arith.constant 0 : index
    %78 = vector.load %arg10[%c0_34, %c0_35] : memref<32x32xbf16, #tpu.memory_space<vmem>>, vector<32x32xbf16>
    %cst_36 = arith.constant dense<0.000000e+00> : vector<16x32xf32>
    %79 = tpu.matmul %77, %78, %cst_36 {dimension_numbers = #tpu.dot_dimension_numbers<[1], [0], [0], [1], [0, 0, 1, 1], [], []>} : vector<16x32xbf16>, vector<32x32xbf16>, vector<16x32xf32> -> vector<16x32xf32>
    %80 = arith.truncf %44 : vector<16x32xf32> to vector<16x32xbf16>
    %c0_37 = arith.constant 0 : index
    %c0_38 = arith.constant 0 : index
    %81 = vector.load %arg11[%c0_37, %c0_38] : memref<32x32xbf16, #tpu.memory_space<vmem>>, vector<32x32xbf16>
    %cst_39 = arith.constant dense<0.000000e+00> : vector<16x32xf32>
    %82 = tpu.matmul %80, %81, %cst_39 {dimension_numbers = #tpu.dot_dimension_numbers<[1], [0], [0], [1], [0, 0, 1, 1], [], []>} : vector<16x32xbf16>, vector<32x32xbf16>, vector<16x32xf32> -> vector<16x32xf32>
    %83 = arith.addf %79, %82 : vector<16x32xf32>
    %84 = arith.truncf %76 : vector<16x32xf32> to vector<16x32xbf16>
    %c0_40 = arith.constant 0 : index
    %c0_41 = arith.constant 0 : index
    %85 = vector.load %arg12[%c0_40, %c0_41] : memref<32x32xbf16, #tpu.memory_space<vmem>>, vector<32x32xbf16>
    %cst_42 = arith.constant dense<0.000000e+00> : vector<16x32xf32>
    %86 = tpu.matmul %84, %85, %cst_42 {dimension_numbers = #tpu.dot_dimension_numbers<[1], [0], [0], [1], [0, 0, 1, 1], [], []>} : vector<16x32xbf16>, vector<32x32xbf16>, vector<16x32xf32> -> vector<16x32xf32>
    %87 = arith.addf %83, %86 : vector<16x32xf32>
    %c0_43 = arith.constant 0 : index
    %c0_44 = arith.constant 0 : index
    %88 = vector.load %arg13[%c0_43, %c0_44] : memref<1x32xf32, #tpu.memory_space<vmem>>, vector<1x32xf32>
    %89 = vector.broadcast %88 : vector<1x32xf32> to vector<16x32xf32>
    %90 = arith.addf %87, %89 : vector<16x32xf32>
    %c0_45 = arith.constant 0 : index
    %c0_46 = arith.constant 0 : index
    %91 = vector.load %arg14[%c0_45, %c0_46] : memref<16x32xf32, #tpu.memory_space<vmem>>, vector<16x32xf32>
    tpu.vector_store %arg14[%c0_45, %c0_46], %90 {strides = array<i32>} : memref<16x32xf32, #tpu.memory_space<vmem>>, vector<16x32xf32>,
    return
  }
}

</mosaic_0001>

<bundles_post_ra>
// kernel: spline_cnn_forward.1
= control target key start
LH: loop header
LB: loop body
LE: loop exit
PB: predicated region body
PF: predicated region fallthrough
CT: control target
= control target key end

     0   :  { %19 = vsyncpa [#allocation3], 0  ;;  %s6238_s0 = inlined_call_operand.vmem [shape: f32[16,32], index: 0, kind: input, shape index: {}]   ;;  %s6239_s1 = inlined_call_operand.vmem [shape: f32[64,16], index: 1, kind: input, shape index: {}]   ;;  %s6240_s2 = inlined_call_operand.vmem [shape: f32[25,64], index: 2, kind: input, shape index: {}]   ;;  %s6241_s3 = inlined_call_operand.vmem [shape: s32[1,64], index: 3, kind: input, shape index: {}]   ;;  %s6242_s4 = inlined_call_operand.vmem [shape: bf16[32,800], index: 4, kind: input, shape index: {}]   ;;  %s6243_s5 = inlined_call_operand.vmem [shape: bf16[32,32], index: 5, kind: input, shape index: {}]   ;;  %s6244_s6 = inlined_call_operand.vmem [shape: f32[1,32], index: 6, kind: input, shape index: {}]   ;;  %s6245_s7 = inlined_call_operand.hbm [shape: bf16[32,800], index: 7, kind: input, shape index: {}]   ;;  %s6246_s8 = inlined_call_operand.hbm [shape: bf16[32,32], index: 8, kind: input, shape index: {}]   ;;  %s6247_s9 = inlined_call_operand.hbm [shape: f32[1,32], index: 9, kind: input, shape index: {}]   ;;  %s6248_s10 = inlined_call_operand.vmem [shape: bf16[32,32], index: 10, kind: input, shape index: {}]   ;;  %s6249_s11 = inlined_call_operand.hbm [shape: bf16[32,32], index: 11, kind: input, shape index: {}]   ;;  %s6250_s12 = inlined_call_operand.hbm [shape: bf16[32,32], index: 12, kind: input, shape index: {}]   ;;  %s6251_s13 = inlined_call_operand.hbm [shape: f32[1,32], index: 13, kind: input, shape index: {}]   ;;  %s6252_s14 = inlined_call_operand.hbm [shape: f32[16,32], index: 14, kind: output, shape index: {}]  }
   0x1   :  { %20 = vsyncpa [#allocation6], 0 }
   0x2   :  { %21 = vsyncpa [#allocation9], 0 }
   0x3   :  { %22 = vsyncpa [#allocation12], 0 }
   0x4   :  { %23 = vsyncpa [#allocation4], 0  ;;  %s4096_s29 = smov [#allocation5]  }
   0x5   :  { %s55_s30 = sshll.u32 %s4096_s29, 4  ;;  %s56_s30 = int_to_ptr.vmem [resolvable:$true] %s55_s30 }
   0x6   :  { %s3954_s15 = scalar_lea.vmem %s56_s30, 256  ;;  %p3959_p1 = scmp.lt.s32.totalorder %s56_s30, %s56_s30 }
   0x7   :  { %p3955_p0 = scmp.ne.s32.totalorder %s56_s30, %s3954_s15  ;;  %p3960_p2 = scmp.lt.s32.totalorder %s3954_s15, %s3954_s15 }
   0x9   :  { %p3961_p3 = por %p3960_p2, %p3959_p1 }
   0xb   :  { %p3962_p4 = pnand %p3961_p3, %p3955_p0 }
   0xd   :  { %3965 = shalt.err (!%p3962_p4)
}
   0xe   :  { %s4097_s16 = smov 64   ;;  %s4098_s17 = smov 4  }
   0xf   :  { %61 = dma.hbm_to_vmem [thread:$0]  %s6246_s8, 256, %s56_s30, [#allocation6], %s4097_s16, %s4097_s16, %s4098_s17  }
  0x10   :  { %s4099_s20 = smov [#allocation8]   ;;  %s4100_s22 = smov [#allocation2]  }
  0x11   :  { %s79_s21 = sshll.u32 %s4099_s20, 4  ;;  %s43_s23 = sshll.u32 %s4100_s22, 4  ;;  %s80_s21 = int_to_ptr.vmem [resolvable:$true] %s79_s21  ;;  %s44_s23 = int_to_ptr.vmem [resolvable:$true] %s43_s23 }
  0x12   :  { %s3974_s24 = scalar_lea.vmem %s80_s21, 256  ;;  %p3979_p6 = scmp.lt.s32.totalorder %s80_s21, %s80_s21 }
  0x13   :  { %p3975_p5 = scmp.ne.s32.totalorder %s80_s21, %s3974_s24  ;;  %p3980_p7 = scmp.lt.s32.totalorder %s3974_s24, %s3974_s24 }
  0x15   :  { %p3981_p8 = por %p3980_p7, %p3979_p6 }
  0x17   :  { %p3982_p9 = pnand %p3981_p8, %p3975_p5 }
  0x19   :  { %3985 = shalt.err (!%p3982_p9)
}
  0x1a   :  { %85 = dma.hbm_to_vmem [thread:$0]  %s6249_s11, 256, %s80_s21, [#allocation9], %s4097_s16, %s4097_s16, %s4098_s17  }
  0x1b   :  { %s3994_s8 = scalar_lea.vmem %s44_s23, 1792  ;;  %p3999_p11 = scmp.lt.s32.totalorder %s44_s23, %s44_s23 }
  0x1c   :  { %p3995_p10 = scmp.ne.s32.totalorder %s44_s23, %s3994_s8  ;;  %p4000_p12 = scmp.lt.s32.totalorder %s3994_s8, %s3994_s8 }
  0x1e   :  { %p4001_p13 = por %p4000_p12, %p3999_p11 }
  0x20   :  { %p4002_p0 = pnand %p4001_p13, %p3995_p10 }
  0x22   :  { %4005 = shalt.err (!%p4002_p0)
}
  0x23   :  { %s4101_s27 = smov 448   ;;  %s4102_s28 = smov 28  }
  0x24   :  { %49 = dma.hbm_to_vmem [thread:$0]  %s6245_s7, 1792, %s44_s23, [#allocation3], %s4101_s27, %s4101_s27, %s4102_s28  }
  0x25   :  { %s4103_s15 = smov [#allocation7]   ;;  %s4104_s19 = smov [#allocation10]  }
  0x26   :  { %s68_s18 = sshll.u32 %s4103_s15, 4  ;;  %s91_s20 = sshll.u32 %s4104_s19, 4  ;;  %s69_s18 = int_to_ptr.vmem [resolvable:$true] %s68_s18  ;;  %s92_s20 = int_to_ptr.vmem [resolvable:$true] %s91_s20 }
  0x27   :  { %s4014_s11 = scalar_lea.vmem %s69_s18, 16  ;;  %s4018_s21 = scalar_lea.vmem %s69_s18, 32 }
  0x28   :  { %p4015_p1 = scmp.ne.s32.totalorder %s69_s18, %s4014_s11  ;;  %p4019_p2 = scmp.lt.s32.totalorder %s69_s18, %s69_s18 }
  0x29   :  { %p4020_p3 = scmp.lt.s32.totalorder %s4018_s21, %s4014_s11 }
  0x2b   :  { %p4021_p4 = por %p4020_p3, %p4019_p2 }
  0x2d   :  { %p4022_p5 = pnand %p4021_p4, %p4015_p1 }
  0x2f   :  { %4025 = shalt.err (!%p4022_p5)
}
  0x30   :  { %71 = dma.hbm_to_vmem [thread:$0]  %s6247_s9, 16, %s69_s18, [#allocation6]  }
  0x31   :  { %s4034_s25 = scalar_lea.vmem %s92_s20, 256  ;;  %p4039_p7 = scmp.lt.s32.totalorder %s92_s20, %s92_s20 }
  0x32   :  { %p4035_p6 = scmp.ne.s32.totalorder %s92_s20, %s4034_s25  ;;  %p4040_p8 = scmp.lt.s32.totalorder %s4034_s25, %s4034_s25 }
  0x34   :  { %p4041_p9 = por %p4040_p8, %p4039_p7 }
  0x36   :  { %p4042_p10 = pnand %p4041_p9, %p4035_p6 }
  0x38   :  { %4045 = shalt.err (!%p4042_p10)
}
  0x39   :  { %97 = dma.hbm_to_vmem [thread:$0]  %s6250_s12, 256, %s92_s20, [#allocation9], %s4097_s16, %s4097_s16, %s4098_s17  }
  0x3a   :  { %s4105_s26 = smov [#allocation11]  }
  0x3b   :  { %s104_s8 = sshll.u32 %s4105_s26, 4  ;;  %s105_s8 = int_to_ptr.vmem [resolvable:$true] %s104_s8 }
  0x3c   :  { %s4054_s27 = scalar_lea.vmem %s105_s8, 16  ;;  %s4058_s9 = scalar_lea.vmem %s105_s8, 32 }
  0x3d   :  { %p4055_p11 = scmp.ne.s32.totalorder %s105_s8, %s4054_s27  ;;  %p4059_p12 = scmp.lt.s32.totalorder %s105_s8, %s105_s8 }
  0x3e   :  { %p4060_p13 = scmp.lt.s32.totalorder %s4058_s9, %s4054_s27 }
  0x40   :  { %p4061_p0 = por %p4060_p13, %p4059_p12 }
  0x42   :  { %p4062_p1 = pnand %p4061_p0, %p4055_p11 }
  0x44   :  { %4065 = shalt.err (!%p4062_p1)
}
  0x45   :  { %107 = dma.hbm_to_vmem [thread:$0]  %s6251_s13, 16, %s105_s8, [#allocation12]  }
  0x46   :  { %4086 = dma.done.wait [#allocation3], 1792  }
  0x47   :  { %4087 = vsyncadd [#allocation3], 4294965504 }
  0x48   :  { %4088 = dma.done.wait [#allocation6], 272  }
  0x49   :  { %4089 = vsyncadd [#allocation6], 4294967024 }
  0x4a   :  { %4090 = dma.done.wait [#allocation9], 512  }
  0x4b   :  { %4091 = vsyncadd [#allocation9], 4294966784 }
  0x4c   :  { %4092 = dma.done.wait [#allocation12], 16  }
  0x4d   :  { %4093 = vsyncadd [#allocation12], 4294967280  ;;  %vm6270_vm0 = vcmask 130048   ;;  %v127_v0 = vld [vmem:[%s6238_s0] sm:$0xff]  ;;  %v128_v1 = vld [vmem:[%s6238_s0 + $0x8] sm:$0xff]  ;;  %v6253_v17 = vlaneseq  ;;  %vm6269_vm1 = vcmask 261120  }
  0x4e   :  { %v4224_v2 = vld [vmem:[%s6239_s1 + $0x38] sm:$0xff]  ;;  %164 = vxpose.xlu0.b32.start [1/2] (short) (narrow) %v127_v0, 32  ;;  %v4226_v3 = vpack.c.bf16 %v128_v1, %v127_v0  ;;  %v4233_v4 = vld [vmem:[%s6239_s1 + $0x30] sm:$0xff]  ;;  %v4242_v5 = vld [vmem:[%s6239_s1 + $0x28] sm:$0xff]  ;;  %v4106_v18 = vmov 1966171168  }
  0x4f   :  { %3776 = vmatprep.subr.msk.mxu0 %vm6270_vm0, %v4224_v2  ;;  %v4249_v6 = vld [vmem:[%s6239_s1 + $0x20] sm:$0xff]  ;;  %v4258_v7 = vld [vmem:[%s6239_s1 + $0x18] sm:$0xff]  ;;  %v4267_v8 = vld [vmem:[%s6239_s1 + $0x10] sm:$0xff]  ;;  %v324_v19 = vunpack.c.l.s4 %v4106_v18  ;;  %v4306_v20 = vshrl.u32 %v6253_v17, 7  ;;  %vm6267_vm2 = vmmov 0   ;;  %vm6353_vm15 = vcmask 523264  }
  0x50   :  { %6381 = vst [vmem:[#allocation19_spill] sm:$0xff] %v4226_v3  ;;  %3777 = vmatpush3.xpose.msk.msra.mxu0 %vm6270_vm0, %v4224_v2  ;;  %v4278_v9 = vld [vmem:[%s6239_s1 + $0x8] sm:$0xff]  ;;  %v4287_v10 = vld [vmem:[%s6239_s1] sm:$0xff]  ;;  %v139_v47 = vld [vmem:[%s6240_s2 + $0x10] sm:$0xff] }
  0x51   :  { %3778 = vmatprep.subr.msk.mxu0 %vm6270_vm0, %v4233_v4  ;;  %v3898_v15 = vld [vmem:[%s6242_s4 + $0x4] ss:$28 sps:$4 sm:$0xff]   ;;  %v3901_v16 = vld [vmem:[%s6242_s4 + $0xc] ss:$28 sps:$4 sm:$0xff]   ;;  %v325_v21 = vunpack.c.0.s8 %v324_v19  ;;  %v4330_v44 = vsub.s32 0, %v4306_v20  ;;  %v420_v54 = vcombine.high %v139_v47, %v139_v47 }
  0x52   :  { %165 = vxpose.xlu0.b32.end [2/2] (short) (narrow) %v128_v1, 32  ;;  %883 = vmatprep.mubr.bf16.mxu1 %v3898_v15  ;;  %v137_v22 = vld [vmem:[%s6240_s2] sm:$0xff]  ;;  %v138_v23 = vld [vmem:[%s6240_s2 + $0x8] sm:$0xff] }
  0x53   :  { %v322_v24 = vcombine.high %v137_v22, %v137_v22  ;;  %v4315_v25 = vsub.s32 %v325_v21, %v4306_v20  ;;  %v371_v26 = vcombine.high %v138_v23, %v138_v23 }
  0x54   :  { %3779 = vmatpush3.xpose.msk.msra.mxu0 %vm6270_vm0, %v4233_v4 }
  0x55   :  { %3780 = vmatprep.subr.msk.mxu0 %vm6270_vm0, %v4242_v5  ;;  %v336_v27 = vrot.slane %v322_v24, %v4315_v25  ;;  %v385_v28 = vrot.slane %v371_v26, %v4315_v25  ;;  %v329_v29 = vrot.slane %v137_v22, %v4315_v25  ;;  %v378_v30 = vrot.slane %v138_v23, %v4315_v25 }
  0x56   :  { %v4381_v15 = vrot.slane %v420_v54, %v4315_v25 }
  0x57   :  { %v338_v31 = vcombine.high %v336_v27, %v336_v27  ;;  %v387_v32 = vcombine.high %v385_v28, %v385_v28  ;;  %v337_v33 = vcombine.high %v329_v29, %v329_v29  ;;  %v386_v34 = vcombine.high %v378_v30, %v378_v30 }
  0x58   :  { %3781 = vmatpush3.xpose.msk.msra.mxu0 %vm6270_vm0, %v4242_v5  ;;  %v352_v39 = vrot.slane %v336_v27, %v4315_v25  ;;  %v401_v40 = vrot.slane %v385_v28, %v4315_v25  ;;  %v345_v41 = vrot.slane %v329_v29, %v4315_v25  ;;  %v394_v42 = vrot.slane %v378_v30, %v4315_v25 }
  0x59   :  { %3782 = vmatprep.subr.msk.mxu0 %vm6270_vm0, %v4249_v6  ;;  %v366_v35 = vrot.slane %v338_v31, %v4315_v25  ;;  %v415_v36 = vrot.slane %v387_v32, %v4315_v25  ;;  %v359_v37 = vrot.slane %v337_v33, %v4315_v25  ;;  %v408_v38 = vrot.slane %v386_v34, %v4315_v25 }
  0x5a   :  { %v368_v50 = vcombine.high %v352_v39, %v352_v39  ;;  %v417_v51 = vcombine.high %v401_v40, %v401_v40  ;;  %v367_v52 = vcombine.high %v345_v41, %v345_v41  ;;  %v416_v53 = vcombine.high %v394_v42, %v394_v42 }
  0x5b   :  { %v370_v43 = vcombine.high %v366_v35, %v366_v35  ;;  %v419_v45 = vcombine.high %v415_v36, %v415_v36  ;;  %v369_v46 = vcombine.high %v359_v37, %v359_v37  ;;  %v418_v49 = vcombine.high %v408_v38, %v408_v38 }
  0x5c   :  { %3783 = vmatpush3.xpose.msk.msra.mxu0 %vm6270_vm0, %v4249_v6  ;;  %v4352_v60 = vrot.slane %v368_v50, %v4330_v44  ;;  %v4355_v61 = vrot.slane %v417_v51, %v4330_v44  ;;  %v4358_v62 = vrot.slane %v367_v52, %v4330_v44  ;;  %v4361_v63 = vrot.slane %v416_v53, %v4330_v44 }
  0x5d   :  { %3784 = vmatprep.subr.msk.mxu0 %vm6270_vm0, %v4258_v7  ;;  %v4338_v55 = vrot.slane %v370_v43, %v4330_v44  ;;  %v4341_v56 = vrot.slane %v419_v45, %v4330_v44  ;;  %v4344_v57 = vrot.slane %v369_v46, %v4330_v44  ;;  %v4349_v59 = vrot.slane %v418_v49, %v4330_v44 }
  0x5e   :  { %6386 = vst [vmem:[#allocation24_spill] sm:$0xff] %v4352_v60  ;;  %6387 = vst [vmem:[#allocation25_spill] sm:$0xff] %v4355_v61  ;;  %v4364_v0 = vrot.slane %v366_v35, %v4330_v44  ;;  %v4367_v1 = vrot.slane %v415_v36, %v4330_v44  ;;  %v4391_v21 = vrot.slane %v401_v40, %v4330_v44 }
  0x5f   :  { %6382 = vst [vmem:[#allocation20_spill] sm:$0xff] %v4338_v55  ;;  %6383 = vst [vmem:[#allocation21_spill] sm:$0xff] %v4341_v56  ;;  %v4394_v22 = vrot.slane %v345_v41, %v4330_v44  ;;  %v436_v35 = vcombine.high %v4381_v15, %v4381_v15  ;;  %v4427_v46 = vrot.slane %v394_v42, %v4330_v44 }
  0x60   :  { %3785 = vmatpush3.xpose.msk.msra.mxu0 %vm6270_vm0, %v4258_v7  ;;  %6384 = vst [vmem:[#allocation22_spill] sm:$0xff] %v4344_v57  ;;  %6385 = vst [vmem:[#allocation23_spill] sm:$0xff] %v4349_v59 }
  0x61   :  { %3786 = vmatprep.subr.msk.mxu0 %vm6270_vm0, %v4267_v8  ;;  %6388 = vst [vmem:[#allocation26_spill] sm:$0xff] %v4358_v62  ;;  %6389 = vst [vmem:[#allocation27_spill] sm:$0xff] %v4361_v63  ;;  %v4438_v42 = vrot.slane %v436_v35, %v4315_v25 }
  0x62   :  { %6390 = vst [vmem:[#allocation28_spill] sm:$0xff] %v4364_v0  ;;  %6391 = vst [vmem:[#allocation29_spill] sm:$0xff] %v4367_v1 }
  0x63   :  { %6395 = vst [vmem:[#allocation33_spill] sm:$0xff] %v4391_v21  ;;  %6396 = vst [vmem:[#allocation34_spill] sm:$0xff] %v4394_v22  ;;  %v468_v35 = vcombine.high %v4438_v42, %v4438_v42 }
  0x64   :  { %3787 = vmatpush3.xpose.msk.msra.mxu0 %vm6270_vm0, %v4267_v8  ;;  %6397 = vst [vmem:[#allocation35_spill] sm:$0xff] %v4427_v46 }
  0x65   :  { %3788 = vmatprep.subr.msk.mxu0 %vm6270_vm0, %v4278_v9 }
  0x68   :  { %3789 = vmatpush3.xpose.msk.msra.mxu0 %vm6270_vm0, %v4278_v9 }
  0x69   :  { %3790 = vmatprep.subr.msk.mxu0 %vm6270_vm0, %v4287_v10 }
  0x6c   :  { %3791 = vmatpush3.xpose.msk.msra.mxu0 %vm6270_vm0, %v4287_v10 }
  0xca   :  { %v180_v11 = vpop.trf.xlu0 }
  0xcb   :  { %3792 = vmatprep.mubr.msk.f32.mxu0 %vm6270_vm0, %v180_v11  ;;  %v4370_v11 = vrot.slane %v359_v37, %v4330_v44 }
  0xcd   :  { %6392 = vst [vmem:[#allocation30_spill] sm:$0xff] %v4370_v11 }
  0xce   :  { %v181_v12 = vpop.trf.xlu0 }
  0xcf   :  { %3793 = vmatmul.mubr.msk.f32.vlgmr.msra.gmra.mxu0 %vm6270_vm0, %v181_v12 }
  0xd2   :  { %v182_v13 = vpop.trf.xlu0 }
  0xd3   :  { %3795 = vmatprep.mubr.msk.f32.mxu0 %vm6270_vm0, %v182_v13  ;;  %v4375_v13 = vrot.slane %v408_v38, %v4330_v44 }
  0xd5   :  { %6393 = vst [vmem:[#allocation31_spill] sm:$0xff] %v4375_v13 }
  0xd6   :  { %v183_v14 = vpop.trf.xlu0 }
  0xd7   :  { %3796 = vmatmul.mubr.msk.f32.gmra.mxu0 %vm6270_vm0, %v183_v14  ;;  %v4378_v14 = vrot.slane %v352_v39, %v4330_v44 }
  0xd8   :  { %932 = vmatprep.mubr.bf16.mxu0 %v3901_v16  ;;  %v4384_v16 = vrot.slane %v139_v47, %v4315_v25 }
  0xd9   :  { %6394 = vst [vmem:[#allocation32_spill] sm:$0xff] %v4378_v14 }
  0xda   :  { %v435_v36 = vcombine.high %v4384_v16, %v4384_v16 }
 0x18f   :  { %v4335_v48 = vpop.f32.mrf.mxu0 }
 0x190   :  { %v637_v33 = vmul.f32 %v4335_v48, %v4338_v55  ;;  %v669_v34 = vmul.f32 %v4335_v48, %v4341_v56  ;;  %v621_v51 = vmul.f32 %v4335_v48, %v4344_v57  ;;  %v653_v52 = vmul.f32 %v4335_v48, %v4349_v59 }
 0x191   :  { %v4346_v58 = vpop.f32.mrf.mxu0 }
 0x192   :  { %v636_v18 = vmul.f32 %v4338_v55, %v4346_v58  ;;  %v668_v19 = vmul.f32 %v4341_v56, %v4346_v58  ;;  %v620_v43 = vmul.f32 %v4344_v57, %v4346_v58  ;;  %v652_v45 = vmul.f32 %v4349_v59, %v4346_v58 }
 0x194   :  { %v738_v41 = vpack.c.bf16 %v637_v33, %v636_v18  ;;  %v754_v47 = vpack.c.bf16 %v669_v34, %v668_v19  ;;  %v4445_v18 = vrot.slane %v435_v36, %v4315_v25  ;;  %v730_v19 = vpack.c.bf16 %v621_v51, %v620_v43 }
 0x195   :  { %v633_v36 = vmul.f32 %v4335_v48, %v4352_v60  ;;  %v648_v43 = vmul.f32 %v4361_v63, %v4346_v58  ;;  %v617_v51 = vmul.f32 %v4335_v48, %v4358_v62 }
 0x197   :  { %v4372_v12 = vpop.f32.mrf.mxu0 }
 0x198   :  { %v639_v24 = vmul.f32 %v4372_v12, %v4338_v55  ;;  %v671_v26 = vmul.f32 %v4372_v12, %v4341_v56  ;;  %v623_v27 = vmul.f32 %v4372_v12, %v4344_v57  ;;  %v655_v28 = vmul.f32 %v4372_v12, %v4349_v59 }
 0x199   :  { %v4396_v23 = vpop.f32.mrf.mxu0  ;;  %v635_v53 = vmul.f32 %v4372_v12, %v4352_v60  ;;  %v667_v54 = vmul.f32 %v4372_v12, %v4355_v61  ;;  %v619_v33 = vmul.f32 %v4372_v12, %v4358_v62  ;;  %v651_v34 = vmul.f32 %v4372_v12, %v4361_v63 }
 0x19a   :  { %v638_v29 = vmul.f32 %v4338_v55, %v4396_v23  ;;  %v670_v30 = vmul.f32 %v4341_v56, %v4396_v23  ;;  %v622_v31 = vmul.f32 %v4344_v57, %v4396_v23  ;;  %v654_v32 = vmul.f32 %v4349_v59, %v4396_v23 }
 0x19b   :  { %v634_v49 = vmul.f32 %v4352_v60, %v4396_v23  ;;  %v666_v50 = vmul.f32 %v4355_v61, %v4396_v23 }
 0x19c   :  { %v739_v37 = vpack.c.bf16 %v639_v24, %v638_v29  ;;  %v755_v38 = vpack.c.bf16 %v671_v26, %v670_v30  ;;  %v731_v39 = vpack.c.bf16 %v623_v27, %v622_v31  ;;  %v747_v40 = vpack.c.bf16 %v655_v28, %v654_v32  ;;  %v3498_v28 = vld.sshfl [vmem:[%s6240_s2 + $0x18] sm:$0x1 pattern:$0x75316420] }
 0x19d   :  { %v746_v24 = vpack.c.bf16 %v653_v52, %v652_v45  ;;  %v618_v26 = vmul.f32 %v4358_v62, %v4396_v23  ;;  %v650_v27 = vmul.f32 %v4361_v63, %v4396_v23  ;;  %v737_v29 = vpack.c.bf16 %v635_v53, %v634_v49 }
 0x19e   :  { %3573 = vmatprep.subr.bf16.mxu1 %v739_v37  ;;  %3601 = vmatprep.subr.bf16.mxu0 %v755_v38  ;;  %v753_v30 = vpack.c.bf16 %v667_v54, %v666_v50  ;;  %v632_v31 = vmul.f32 %v4352_v60, %v4346_v58  ;;  %v664_v32 = vmul.f32 %v4355_v61, %v4346_v58 }
 0x19f   :  { %3574 = vmatpush3.bf16.msra.mxu1 %v731_v39  ;;  %3602 = vmatpush3.bf16.msra.mxu0 %v747_v40  ;;  %v665_v37 = vmul.f32 %v4335_v48, %v4355_v61  ;;  %v482_v38 = vrot.slane %v3498_v28, %v4315_v25  ;;  %v729_v39 = vpack.c.bf16 %v619_v33, %v618_v26 }
 0x1a0   :  { %3575 = vmatprep.subr.bf16.mxu1 %v738_v41  ;;  %3603 = vmatprep.subr.bf16.mxu0 %v754_v47  ;;  %v745_v40 = vpack.c.bf16 %v651_v34, %v650_v27  ;;  %v616_v41 = vmul.f32 %v4358_v62, %v4346_v58  ;;  %v736_v45 = vpack.c.bf16 %v633_v36, %v632_v31 }
 0x1a1   :  { %v752_v47 = vpack.c.bf16 %v665_v37, %v664_v32  ;;  %v630_v49 = vmul.f32 %v4364_v0, %v4396_v23  ;;  %v662_v50 = vmul.f32 %v4367_v1, %v4396_v23  ;;  %v649_v52 = vmul.f32 %v4335_v48, %v4361_v63 }
 0x1a2   :  { %v467_v53 = vcombine.high %v4445_v18, %v4445_v18  ;;  %v631_v54 = vmul.f32 %v4372_v12, %v4364_v0  ;;  %v728_v26 = vpack.c.bf16 %v617_v51, %v616_v41  ;;  %v614_v28 = vmul.f32 %v4370_v11, %v4396_v23 }
 0x1a3   :  { %3576 = vmatpush3.bf16.msra.mxu1 %v730_v19  ;;  %3604 = vmatpush3.bf16.msra.mxu0 %v746_v24  ;;  %v663_v19 = vmul.f32 %v4372_v12, %v4367_v1  ;;  %v4488_v24 = vrot.slane %v468_v35, %v4330_v44  ;;  %v744_v27 = vpack.c.bf16 %v649_v52, %v648_v43 }
 0x1a4   :  { %3577 = vmatprep.subr.bf16.mxu1 %v737_v29  ;;  %3605 = vmatprep.subr.bf16.mxu0 %v753_v30  ;;  %v646_v29 = vmul.f32 %v4375_v13, %v4396_v23  ;;  %v735_v30 = vpack.c.bf16 %v631_v54, %v630_v49  ;;  %v628_v32 = vmul.f32 %v4364_v0, %v4346_v58 }
 0x1a5   :  { %6398 = vst [vmem:[#allocation36_spill] sm:$0xff] %v4488_v24  ;;  %v751_v31 = vpack.c.bf16 %v663_v19, %v662_v50  ;;  %v660_v33 = vmul.f32 %v4367_v1, %v4346_v58  ;;  %v615_v34 = vmul.f32 %v4372_v12, %v4370_v11  ;;  %v647_v35 = vmul.f32 %v4372_v12, %v4375_v13 }
 0x1a6   :  { %v4503_v36 = vrot.slane %v482_v38, %v4330_v44  ;;  %v629_v37 = vmul.f32 %v4335_v48, %v4364_v0  ;;  %v644_v38 = vmul.f32 %v4375_v13, %v4346_v58  ;;  %v626_v50 = vmul.f32 %v4378_v14, %v4396_v23 }
 0x1a7   :  { %3578 = vmatpush3.bf16.msra.mxu1 %v729_v39  ;;  %3606 = vmatpush3.bf16.msra.mxu0 %v745_v40  ;;  %v661_v39 = vmul.f32 %v4335_v48, %v4367_v1  ;;  %v4510_v40 = vrot.slane %v467_v53, %v4330_v44  ;;  %v727_v41 = vpack.c.bf16 %v615_v34, %v614_v28 }
 0x1a8   :  { %3579 = vmatprep.subr.bf16.mxu1 %v736_v45  ;;  %3607 = vmatprep.subr.bf16.mxu0 %v752_v47  ;;  %6399 = vst [vmem:[#allocation37_spill] sm:$0xff] %v4503_v36  ;;  %v743_v43 = vpack.c.bf16 %v647_v35, %v646_v29  ;;  %v612_v45 = vmul.f32 %v4370_v11, %v4346_v58 }
 0x1a9   :  { %6400 = vst [vmem:[#allocation38_spill] sm:$0xff] %v4510_v40  ;;  %v734_v47 = vpack.c.bf16 %v629_v37, %v628_v32  ;;  %v750_v49 = vpack.c.bf16 %v661_v39, %v660_v33  ;;  %v658_v51 = vmul.f32 %v4391_v21, %v4396_v23  ;;  %v613_v52 = vmul.f32 %v4335_v48, %v4370_v11 }
 0x1aa   :  { %v645_v53 = vmul.f32 %v4335_v48, %v4375_v13  ;;  %v4526_v54 = vrot.slane %v4384_v16, %v4315_v25  ;;  %v627_v19 = vmul.f32 %v4372_v12, %v4378_v14  ;;  %v642_v16 = vmul.f32 %v4427_v46, %v4396_v23 }
 0x1ab   :  { %3580 = vmatpush3.bf16.msra.mxu1 %v728_v26  ;;  %3608 = vmatpush3.bf16.msra.mxu0 %v744_v27  ;;  %v659_v26 = vmul.f32 %v4372_v12, %v4391_v21  ;;  %v610_v27 = vmul.f32 %v4394_v22, %v4396_v23  ;;  %v726_v28 = vpack.c.bf16 %v613_v52, %v612_v45 }
 0x1ac   :  { %3581 = vmatprep.subr.bf16.mxu1 %v735_v30  ;;  %3609 = vmatprep.subr.bf16.mxu0 %v751_v31  ;;  %v742_v29 = vpack.c.bf16 %v645_v53, %v644_v38  ;;  %v611_v30 = vmul.f32 %v4372_v12, %v4394_v22  ;;  %v733_v31 = vpack.c.bf16 %v627_v19, %v626_v50 }
 0x1ad   :  { %v749_v32 = vpack.c.bf16 %v659_v26, %v658_v51  ;;  %v624_v33 = vmul.f32 %v4378_v14, %v4346_v58  ;;  %v656_v34 = vmul.f32 %v4391_v21, %v4346_v58  ;;  %v643_v35 = vmul.f32 %v4372_v12, %v4427_v46 }
 0x1ae   :  { %v4546_v37 = vrot.slane %v4381_v15, %v4315_v25  ;;  %v4550_v39 = vrot.slane %v4526_v54, %v4330_v44  ;;  %v657_v45 = vmul.f32 %v4335_v48, %v4391_v21  ;;  %v640_v15 = vmul.f32 %v4427_v46, %v4346_v58 }
 0x1af   :  { %3582 = vmatpush3.bf16.msra.mxu1 %v727_v41  ;;  %3610 = vmatpush3.bf16.msra.mxu0 %v743_v43  ;;  %v725_v41 = vpack.c.bf16 %v611_v30, %v610_v27  ;;  %v625_v43 = vmul.f32 %v4335_v48, %v4378_v14  ;;  %v741_v38 = vpack.c.bf16 %v643_v35, %v642_v16  ;;  %v3896_v35 = vld [vmem:[%s6242_s4] ss:$28 sps:$4 sm:$0xff]   ;;  %v6464_v14 = vlaneseq }
 0x1b0   :  { %3583 = vmatprep.subr.bf16.mxu1 %v734_v47  ;;  %3611 = vmatprep.subr.bf16.mxu0 %v750_v49  ;;  %6401 = vst [vmem:[#allocation39_spill] sm:$0xff] %v4550_v39  ;;  %v608_v47 = vmul.f32 %v4394_v22, %v4346_v58  ;;  %v702_v49 = vmul.f32 %v4488_v24, %v4396_v23 }
 0x1b1   :  { %v732_v50 = vpack.c.bf16 %v625_v43, %v624_v33  ;;  %v748_v51 = vpack.c.bf16 %v657_v45, %v656_v34  ;;  %v609_v52 = vmul.f32 %v4335_v48, %v4394_v22  ;;  %v706_v53 = vmul.f32 %v4503_v36, %v4396_v23 }
 0x1b2   :  { %v641_v19 = vmul.f32 %v4335_v48, %v4427_v46  ;;  %v703_v26 = vmul.f32 %v4372_v12, %v4488_v24  ;;  %v4572_v27 = vmul.f32 %v4550_v39, %v4346_v58  ;;  %v4580_v30 = vmul.f32 %v4335_v48, %v4550_v39 }
 0x1b3   :  { %3584 = vmatpush3.bf16.msra.mxu1 %v726_v28  ;;  %3612 = vmatpush3.bf16.msra.mxu0 %v742_v29  ;;  %v707_v28 = vmul.f32 %v4372_v12, %v4503_v36  ;;  %v466_v29 = vcombine.high %v4546_v37, %v4546_v37  ;;  %v724_v16 = vpack.c.bf16 %v609_v52, %v608_v47  ;;  %v1582_v13 = vand.u32 127, %v6464_v14 }
 0x1b4   :  { %3585 = vmatprep.subr.bf16.mxu1 %v733_v31  ;;  %3613 = vmatprep.subr.bf16.mxu0 %v749_v32  ;;  %v740_v31 = vpack.c.bf16 %v641_v19, %v640_v15  ;;  %v771_v32 = vpack.c.bf16 %v703_v26, %v702_v49  ;;  %v686_v33 = vmul.f32 %v4510_v40, %v4396_v23  ;;  %v3902_v19 = vld [vmem:[%s6242_s4 + $0x3c] ss:$28 sps:$4 sm:$0xff]  }
 0x1b5   :  { %v773_v34 = vpack.c.bf16 %v707_v28, %v706_v53  ;;  %v700_v43 = vmul.f32 %v4488_v24, %v4346_v58  ;;  %v704_v45 = vmul.f32 %v4503_v36, %v4346_v58  ;;  %v687_v47 = vmul.f32 %v4372_v12, %v4510_v40 }
 0x1b6   :  { %v465_v15 = vcombine.high %v4526_v54, %v4526_v54  ;;  %v701_v49 = vmul.f32 %v4335_v48, %v4488_v24  ;;  %v684_v53 = vmul.f32 %v4510_v40, %v4346_v58  ;;  %v3904_v54 = vld [vmem:[%s6242_s4 + $0x44] ss:$28 sps:$4 sm:$0xff]   ;;  %v1587_v1 = vadd.s32 4294967288, %v1582_v13 }
 0x1b7   :  { %3586 = vmatpush3.bf16.msra.mxu1 %v725_v41  ;;  %3614 = vmatpush3.bf16.msra.mxu0 %v741_v38  ;;  %v3899_v41 = vld [vmem:[%s6242_s4 + $0x8] ss:$28 sps:$4 sm:$0xff]   ;;  %v756_v38 = vpack.c.bf16 %v4580_v30, %v4572_v27  ;;  %v763_v52 = vpack.c.bf16 %v687_v47, %v686_v33  ;;  %v1594_v63 = vadd.s32 4294967280, %v1582_v13  ;;  %v1601_v62 = vadd.s32 4294967272, %v1582_v13 }
 0x1b8   :  { %3587 = vmatprep.subr.bf16.mxu1 %v732_v50  ;;  %3615 = vmatprep.subr.bf16.mxu0 %v748_v51  ;;  %v705_v50 = vmul.f32 %v4335_v48, %v4503_v36  ;;  %v4605_v51 = vrot.slane %v466_v29, %v4330_v44  ;;  %v770_v26 = vpack.c.bf16 %v701_v49, %v700_v43  ;;  %v3906_v43 = vld [vmem:[%s6242_s4 + $0x38] ss:$28 sps:$4 sm:$0xff]  }
 0x1b9   :  { %v5303_v60 = vsub.s32 %v1582_v13, %v4306_v20  ;;  %v5306_v59 = vsub.s32 %v1587_v1, %v4306_v20  ;;  %v5309_v57 = vsub.s32 %v1594_v63, %v4306_v20  ;;  %v5314_v55 = vsub.s32 %v1601_v62, %v4306_v20 }
 0x1ba   :  { %6402 = vst [vmem:[#allocation40_spill] sm:$0xff] %v4605_v51  ;;  %v772_v28 = vpack.c.bf16 %v705_v50, %v704_v45  ;;  %v698_v29 = vmul.f32 %v4605_v51, %v4396_v23  ;;  %v3907_v45 = vld [vmem:[%s6242_s4 + $0x40] ss:$28 sps:$4 sm:$0xff]   ;;  %v697_v49 = vmul.f32 %v4335_v48, %v4605_v51  ;;  %v4643_v50 = vrot.slane %v4438_v42, %v4330_v44 }
 0x1bb   :  { %3588 = vmatpush3.bf16.msra.mxu1 %v724_v16  ;;  %3616 = vmatpush3.bf16.msra.mxu0 %v740_v31  ;;  %v685_v16 = vmul.f32 %v4335_v48, %v4510_v40  ;;  %v4620_v31 = vrot.slane %v465_v15, %v4330_v44  ;;  %v3908_v15 = vld [vmem:[%s6242_s4 + $0x18] ss:$28 sps:$4 sm:$0xff]  }
 0x1bc   :  { %3629 = vmatprep.subr.bf16.mxu1 %v771_v32  ;;  %3798 = vmatprep.subr.bf16.mxu0 %v773_v34  ;;  %v699_v32 = vmul.f32 %v4372_v12, %v4605_v51  ;;  %6404 = vst [vmem:[#allocation42_spill] sm:$0xff] %v4643_v50 }
 0x1bd   :  { %6403 = vst [vmem:[#allocation41_spill] sm:$0xff] %v4620_v31  ;;  %v762_v33 = vpack.c.bf16 %v685_v16, %v684_v53  ;;  %v683_v47 = vmul.f32 %v4372_v12, %v4620_v31  ;;  %v681_v42 = vmul.f32 %v4335_v48, %v4620_v31 }
 0x1be   :  { %884 = vmatmul.mubr.bf16.vlgmr.msra.gmra.mxu1 %v3896_v35  ;;  %933 = vmatmul.mubr.bf16.vlgmr.msra.gmra.mxu0 %v3899_v41  ;;  %v682_v35 = vmul.f32 %v4620_v31, %v4396_v23  ;;  %v769_v41 = vpack.c.bf16 %v699_v32, %v698_v29  ;;  %v695_v29 = vmul.f32 %v4372_v12, %v4643_v50 }
 0x1bf   :  { %3630 = vmatpush3.bf16.msra.mxu1 %v763_v52  ;;  %3799 = vmatpush3.bf16.msra.mxu0 %v773_v34  ;;  %v696_v34 = vmul.f32 %v4605_v51, %v4346_v58  ;;  %v3912_v52 = vld [vmem:[%s6242_s4 + $0x14] ss:$28 sps:$4 sm:$0xff]  }
 0x1c0   :  { %3631 = vmatprep.subr.bf16.mxu1 %v770_v26  ;;  %3800 = vmatprep.subr.bf16.mxu0 %v772_v28  ;;  %v761_v53 = vpack.c.bf16 %v683_v47, %v682_v35  ;;  %v694_v26 = vmul.f32 %v4643_v50, %v4396_v23  ;;  %v692_v35 = vmul.f32 %v4643_v50, %v4346_v58 }
 0x1c1   :  { %891 = vmatprep.mubr.bf16.mxu1 %v3902_v19  ;;  %940 = vmatprep.mubr.bf16.mxu0 %v3904_v54  ;;  %v680_v19 = vmul.f32 %v4620_v31, %v4346_v58  ;;  %v768_v54 = vpack.c.bf16 %v697_v49, %v696_v34  ;;  %v693_v34 = vmul.f32 %v4335_v48, %v4643_v50 }
 0x1c3   :  { %3632 = vmatpush3.bf16.msra.mxu1 %v762_v33  ;;  %3801 = vmatpush3.bf16.msra.mxu0 %v772_v28  ;;  %v4658_v28 = vrot.slane %v4445_v18, %v4330_v44  ;;  %v760_v16 = vpack.c.bf16 %v681_v42, %v680_v19  ;;  %v767_v33 = vpack.c.bf16 %v695_v29, %v694_v26  ;;  %v3909_v18 = vld [vmem:[%s6242_s4 + $0x50] ss:$28 sps:$4 sm:$0xff]  }
 0x1c4   :  { %3633 = vmatprep.subr.bf16.mxu1 %v769_v41  ;;  %3814 = vmatprep.subr.msk.mxu0 %vm6270_vm0, %v4224_v2  ;;  %v674_v19 = vmul.f32 %v4550_v39, %v4396_v23  ;;  %v675_v42 = vmul.f32 %v4372_v12, %v4550_v39 }
 0x1c5   :  { %6405 = vst [vmem:[#allocation43_spill] sm:$0xff] %v4658_v28  ;;  %v678_v32 = vmul.f32 %v4658_v28, %v4396_v23  ;;  %v679_v41 = vmul.f32 %v4372_v12, %v4658_v28  ;;  %v676_v47 = vmul.f32 %v4658_v28, %v4346_v58 }
 0x1c6   :  { %892 = vmatmul.mubr.bf16.gmra.mxu1 %v3906_v43  ;;  %941 = vmatmul.mubr.bf16.gmra.mxu0 %v3907_v45  ;;  %v4676_v43 = vrot.slane %v4546_v37, %v4330_v44  ;;  %v757_v29 = vpack.c.bf16 %v675_v42, %v674_v19 }
 0x1c7   :  { %3634 = vmatpush3.bf16.msra.mxu1 %v761_v53  ;;  %3802 = vmatprep.mubr.msk.bf16.mxu0 %vm6269_vm1, %v3908_v15  ;;  %v759_v45 = vpack.c.bf16 %v679_v41, %v678_v32  ;;  %v766_v15 = vpack.c.bf16 %v693_v34, %v692_v35  ;;  %v4766_v41 = vld [vmem:[%s6241_s3] ss:$0 sm:$0xff] }
 0x1c8   :  { %3635 = vmatprep.subr.bf16.mxu1 %v768_v54  ;;  %981 = vmatprep.mubr.bf16.mxu1 %v3912_v52  ;;  %6406 = vst [vmem:[#allocation44_spill] sm:$0xff] %v4676_v43  ;;  %v690_v49 = vmul.f32 %v4676_v43, %v4396_v23  ;;  %v677_v52 = vmul.f32 %v4335_v48, %v4658_v28  ;;  %v6420_v28 = vmov 0 }
 0x1c9   :  { %v691_v37 = vmul.f32 %v4372_v12, %v4676_v43  ;;  %v688_v26 = vmul.f32 %v4676_v43, %v4346_v58  ;;  %vm6271_vm3 = vcmp.eq.s32.totalorder %v4306_v20, %v4766_v41 }
 0x1ca   :  { %v758_v53 = vpack.c.bf16 %v677_v52, %v676_v47  ;;  %v4769_v47 = vadd.s32 8, %v4306_v20 }
 0x1cb   :  { %3636 = vmatpush3.bf16.msra.mxu1 %v760_v16  ;;  %v765_v54 = vpack.c.bf16 %v691_v37, %v690_v49  ;;  %v3917_v16 = vld [vmem:[%s6243_s5] sm:$0xff]  }
 0x1cc   :  { %3637 = vmatprep.subr.bf16.mxu1 %v767_v33  ;;  %vm6272_vm4 = vcmp.eq.s32.totalorder %v4769_v47, %v4766_v41 }
 0x1ce   :  { %3803 = vmatmul.mubr.msk.bf16.vlgmr.msra.gmra.mxu0 %vm6269_vm1, %v3909_v18 }
 0x1cf   :  { %3638 = vmatpush3.bf16.msra.mxu1 %v759_v45  ;;  %3815 = vmatpush3.xpose.msk.msra.mxu0 %vm6270_vm0, %v4224_v2  ;;  %v689_v2 = vmul.f32 %v4335_v48, %v4676_v43  ;;  %v3913_v48 = vld [vmem:[%s6242_s4 + $0x4c] ss:$28 sps:$4 sm:$0xff]  }
 0x1d0   :  { %3639 = vmatprep.subr.bf16.mxu1 %v766_v15  ;;  %3816 = vmatprep.subr.msk.mxu0 %vm6270_vm0, %v4233_v4 }
 0x1d1   :  { %v764_v23 = vpack.c.bf16 %v689_v2, %v688_v26 }
 0x1d3   :  { %3640 = vmatpush3.bf16.msra.mxu1 %v758_v53  ;;  %3817 = vmatpush3.xpose.msk.msra.mxu0 %vm6270_vm0, %v4233_v4  ;;  %v3910_v4 = vld [vmem:[%s6242_s4 + $0x10] ss:$28 sps:$4 sm:$0xff]   ;;  %v6259_v53 = vmov 0  }
 0x1d4   :  { %3641 = vmatprep.subr.bf16.mxu1 %v765_v54  ;;  %3818 = vmatprep.subr.msk.mxu0 %vm6270_vm0, %v4242_v5  ;;  %v151_v19 = vsel %vm6271_vm3, 1, %v6259_v53  ;;  %v152_v42 = vsel %vm6272_vm4, 1, %v6259_v53 }
 0x1d5   :  { %v1054_v26 = vrot.slane %v151_v19, %v4315_v25 }
 0x1d7   :  { %3642 = vmatpush3.bf16.msra.mxu1 %v757_v29  ;;  %3819 = vmatpush3.xpose.msk.msra.mxu0 %vm6270_vm0, %v4242_v5  ;;  %v3915_v5 = vld [vmem:[%s6242_s4 + $0x48] ss:$28 sps:$4 sm:$0xff]   ;;  %v1062_v2 = vcombine.high %v1054_v26, %v1054_v26  ;;  %v1070_v29 = vrot.slane %v1054_v26, %v4315_v25 }
 0x1d8   :  { %3643 = vmatprep.subr.bf16.mxu1 %v764_v23  ;;  %3820 = vmatprep.subr.msk.mxu0 %vm6270_vm0, %v4249_v6  ;;  %v1047_v23 = vcombine.high %v151_v19, %v151_v19 }
 0x1d9   :  { %vm1145_vm5 = vcmp.ne.s32.totalorder %v1070_v29, 0 }
 0x1db   :  { %3644 = vmatpush3.bf16.msra.mxu1 %v756_v38  ;;  %3821 = vmatpush3.xpose.msk.msra.mxu0 %vm6270_vm0, %v4249_v6  ;;  %v3916_v6 = vld [vmem:[%s6243_s5 + $0x8] sm:$0xff]  }
 0x1dc   :  { %3822 = vmatprep.subr.msk.mxu0 %vm6270_vm0, %v4258_v7 }
 0x1de   :  { %982 = vmatmul.mubr.bf16.vlgmr.msra.gmra.mxu1 %v3910_v4  ;;  %v1096_v4 = vcombine.high %v152_v42, %v152_v42 }
 0x1df   :  { %989 = vmatprep.mubr.bf16.mxu1 %v3913_v48  ;;  %3823 = vmatpush3.xpose.msk.msra.mxu0 %vm6270_vm0, %v4258_v7  ;;  %v1103_v48 = vrot.slane %v152_v42, %v4315_v25 }
 0x1e0   :  { %3824 = vmatprep.subr.msk.mxu0 %vm6270_vm0, %v4267_v8 }
 0x1e3   :  { %3825 = vmatpush3.xpose.msk.msra.mxu0 %vm6270_vm0, %v4267_v8  ;;  %v6254_v8 = vmov 0.0  }
 0x1e4   :  { %3826 = vmatprep.subr.msk.mxu0 %vm6270_vm0, %v4278_v9  ;;  %3806 = vmatprep.subr.bf16.mxu1 %v6254_v8 }
 0x1e5   :  { %3807 = vmatpush3.bf16.msra.mxu1 %v3916_v6  ;;  %v1092_v6 = vcombine.high %v1070_v29, %v1070_v29 }
 0x1e6   :  { %990 = vmatmul.mubr.bf16.gmra.mxu1 %v3915_v5  ;;  %3808 = vmatprep.subr.bf16.mxu1 %v6254_v8  ;;  %v1084_v5 = vrot.slane %v1062_v2, %v4315_v25 }
 0x1e7   :  { %3827 = vmatpush3.xpose.msk.msra.mxu0 %vm6270_vm0, %v4278_v9  ;;  %3810 = vmatprep.mubr.msk.bf16.mxu1 %vm6267_vm2, %v6254_v8  ;;  %vm1147_vm7 = vcmp.ne.s32.totalorder %v1092_v6, 0 }
 0x1e8   :  { %3828 = vmatprep.subr.msk.mxu0 %vm6270_vm0, %v4287_v10  ;;  %vm1146_vm6 = vcmp.ne.s32.totalorder %v1084_v5, 0 }
 0x1e9   :  { %3809 = vmatpush3.bf16.msra.mxu1 %v3917_v16  ;;  %v1061_v16 = vrot.slane %v1047_v23, %v4315_v25 }
 0x1eb   :  { %3829 = vmatpush3.xpose.msk.msra.mxu0 %vm6270_vm0, %v4287_v10  ;;  %v1063_v17 = vcombine.high %v1061_v16, %v1061_v16 }
 0x1ee   :  { %3811 = vmatmul.mubr.msk.bf16.vlgmr.msra.gmra.mxu1 %vm6269_vm1, %v4226_v3 }
 0x27e   :  { %v3589_v7 = vpop.f32.mrf.mxu1  ;;  %v3617_v58 = vpop.f32.mrf.mxu0 }
 0x280   :  { %v3590_v12 = vpop.f32.mrf.mxu1  ;;  %v3618_v27 = vpop.f32.mrf.mxu0 }
 0x281   :  { %v3591_v42 = vadd.f32 %v3590_v12, %v3589_v7  ;;  %v3619_v2 = vadd.f32 %v3618_v27, %v3617_v58  ;;  %v1111_v7 = vcombine.high %v1103_v48, %v1103_v48 }
 0x282   :  { %v4742_v9 = vpop.f32.mrf.mxu1  ;;  %v4744_v30 = vpop.f32.mrf.mxu0 }
 0x283   :  { %v935_v58 = vadd.f32 %v3619_v2, %v3591_v42  ;;  %v1133_v2 = vrot.slane %v1111_v7, %v4315_v25 }
 0x284   :  { %v4746_v38 = vpop.f32.mrf.mxu1  ;;  %v4748_v10 = vpop.f32.mrf.mxu0 }
 0x286   :  { %v4753_v32 = vpop.f32.mrf.mxu1  ;;  %v4755_v33 = vpop.f32.mrf.mxu0 }
 0x288   :  { %v4759_v35 = vpop.f32.mrf.mxu1  ;;  %v4761_v18 = vpop.f32.mrf.mxu0 }
 0x28a   :  { %v3598_v34 = vpop.f32.mrf.mxu1  ;;  %v3626_v45 = vpop.f32.mrf.mxu0 }
 0x28c   :  { %v3599_v15 = vpop.f32.mrf.mxu1  ;;  %v3627_v49 = vpop.f32.mrf.mxu0 }
 0x28d   :  { %v3600_v52 = vadd.f32 %v3599_v15, %v3598_v34  ;;  %v3628_v37 = vadd.f32 %v3627_v49, %v3626_v45  ;;  %v1119_v34 = vrot.slane %v1103_v48, %v4315_v25  ;;  %v4794_v45 = vrot.slane %v1096_v4, %v4315_v25 }
 0x28e   :  { %v4797_v15 = vrot.slane %v1061_v16, %v4315_v25  ;;  %v1161_v49 = vsel %vm1145_vm5, 1, %v6259_v53  ;;  %v1163_v4 = vsel %vm1147_vm7, 1, %v6259_v53  ;;  %v4808_v6 = vpop.f32.mrf.mxu0  ;;  %vm1154_vm7 = vcmp.ne.s32.totalorder %v1133_v2, 0 }
 0x28f   :  { %v4781_v54 = vadd.f32 %v3628_v37, %v3600_v52  ;;  %v1094_v52 = vcombine.high %v1084_v5, %v1084_v5  ;;  %v1162_v37 = vsel %vm1146_vm6, 1, %v6259_v53  ;;  %v1141_v19 = vcombine.high %v1119_v34, %v1119_v34 }
 0x290   :  { %vm1149_vm8 = vcmp.ne.s32.totalorder %v4797_v15, 0  ;;  %v1112_v26 = vcombine.high %v4794_v45, %v4794_v45  ;;  %v1180_v23 = vrot.slane %v1161_v49, %v4330_v44  ;;  %v1184_v8 = vrot.slane %v1162_v37, %v4330_v44  ;;  %v1032_v48 = vpop.f32.mrf.mxu0 }
 0x291   :  { %v1165_v5 = vsel %vm1149_vm8, 1, %v6259_v53  ;;  %vm1155_vm9 = vcmp.ne.s32.totalorder %v1141_v19, 0  ;;  %vm1148_vm10 = vcmp.ne.s32.totalorder %v1094_v52, 0  ;;  %v1188_v27 = vrot.slane %v1163_v4, %v4330_v44 }
 0x292   :  { %v4811_v43 = vrot.slane %v1112_v26, %v4315_v25  ;;  %vm4814_vm11 = vcmp.eq.s32.totalorder %v1180_v23, 1  ;;  %v6407_v49 = vmov 0  ;;  %v1196_v16 = vrot.slane %v1165_v5, %v4330_v44 }
 0x293   :  { %v6408_v49 = vsel %vm4814_vm11, 4294967295, %v6407_v49  ;;  %v4820_v37 = vrot.slane %v1063_v17, %v4315_v25  ;;  %v6410_v19 = vmov 0   ;;  %vm1153_vm12 = vcmp.ne.s32.totalorder %v1119_v34, 0 }
 0x294   :  { %6409 = vst [vmem:[#allocation45_spill] sm:$0xff] %v6408_v49  ;;  %v1171_v52 = vsel %vm1155_vm9, 1, %v6410_v19  ;;  %v1164_v26 = vsel %vm1148_vm10, 1, %v6410_v19  ;;  %vm4824_vm13 = vcmp.eq.s32.totalorder %v1184_v8, 1  ;;  %v1144_v42 = vcombine.high %v4811_v43, %v4811_v43 }
 0x295   :  { %vm1150_vm14 = vcmp.ne.s32.totalorder %v4820_v37, 0  ;;  %vm4834_vm5 = vcmp.eq.s32.totalorder %v1188_v27, 1  ;;  %vm4838_vm6 = vcmp.eq.s32.totalorder %v1196_v16, 1  ;;  %v6417_v8 = vmov 0 }
 0x296   :  { %v6418_v8 = vsel %vm4838_vm6, 4294967295, %v6417_v8  ;;  %v1220_v23 = vrot.slane %v1171_v52, %v4330_v44  ;;  %v1192_v4 = vrot.slane %v1164_v26, %v4330_v44  ;;  %v1169_v5 = vsel %vm1153_vm12, 1, %v6410_v19 }
 0x297   :  { %6419 = vst [vmem:[#allocation48_spill] sm:$0xff] %v6418_v8  ;;  %vm1160_vm8 = vcmp.ne.s32.totalorder %v1144_v42, 0  ;;  %v1143_v16 = vcombine.high %v1133_v2, %v1133_v2 }
 0x298   :  { %vm4860_vm9 = vcmp.eq.s32.totalorder %v1220_v23, 1  ;;  %vm4864_vm10 = vcmp.eq.s32.totalorder %v1192_v4, 1  ;;  %v1176_v50 = vsel %vm1160_vm8, 1, %v6410_v19  ;;  %v1170_v23 = vsel %vm1154_vm7, 1, %v6410_v19 }
 0x299   :  { %v6421_v28 = vsel %vm4860_vm9, 4294967295, %v6420_v28  ;;  %vm1156_vm12 = vcmp.ne.s32.totalorder %v1143_v16, 0  ;;  %v4898_v16 = vpop.f32.mrf.mxu0 }
 0x29a   :  { %6422 = vst [vmem:[#allocation49_spill] sm:$0xff] %v6421_v28 }
 0x29e   :  { %v3645_v29 = vpop.f32.mrf.mxu1 }
 0x2a0   :  { %v3646_v3 = vpop.f32.mrf.mxu1 }
 0x2a1   :  { %v3647_v12 = vadd.f32 %v3646_v3, %v3645_v29  ;;  %v6411_v3 = vmov 0  ;;  %v6414_v29 = vmov 0 }
 0x2a2   :  { %v6412_v3 = vsel %vm4824_vm13, 4294967295, %v6411_v3  ;;  %v6415_v29 = vsel %vm4834_vm5, 4294967295, %v6414_v29  ;;  %v3648_v34 = vpop.f32.mrf.mxu1 }
 0x2a3   :  { %v984_v53 = vadd.f32 %v3647_v12, %v935_v58  ;;  %6413 = vst [vmem:[#allocation46_spill] sm:$0xff] %v6412_v3  ;;  %6416 = vst [vmem:[#allocation47_spill] sm:$0xff] %v6415_v29  ;;  %v1166_v58 = vsel %vm1150_vm14, 1, %v6410_v19 }
 0x2a4   :  { %v1200_v42 = vrot.slane %v1166_v58, %v4330_v44  ;;  %v1093_v58 = vcombine.high %v4797_v15, %v4797_v15  ;;  %v1240_v15 = vrot.slane %v1176_v50, %v4330_v44 }
 0x2a5   :  { %v4832_v17 = vadd.f32 %v1032_v48, %v984_v53  ;;  %v3649_v48 = vpop.f32.mrf.mxu1 }
 0x2a6   :  { %vm4887_vm14 = vcmp.eq.s32.totalorder %v1200_v42, 1  ;;  %vm1151_vm8 = vcmp.ne.s32.totalorder %v1093_v58, 0  ;;  %vm4908_vm2 = vcmp.eq.s32.totalorder %v1240_v15, 1  ;;  %v1035_v58 = vpop.f32.mrf.mxu0 }
 0x2a7   :  { %v1261_v53 = vsel %vm4824_vm13, %v4832_v17, -inf  ;;  %v1257_v7 = vsel %vm4814_vm11, %v4832_v17, -inf  ;;  %v1273_v52 = vsel %vm4838_vm6, %v4832_v17, -inf  ;;  %v1265_v26 = vsel %vm4834_vm5, %v4832_v17, -inf }
 0x2a8   :  { %v1333_v12 = vsel %vm6353_vm15, %v1261_v53, -inf  ;;  %v1321_v27 = vsel %vm6353_vm15, %v1257_v7, -inf  ;;  %v6423_v53 = vmov 0  ;;  %v1212_v7 = vrot.slane %v1169_v5, %v4330_v44 }
 0x2a9   :  { %1334 = vmax.xlane.f32.xlu0 %v1333_v12  ;;  %1322 = vmax.xlane.f32.xlu1 %v1321_v27  ;;  %v6424_v53 = vsel %vm4864_vm10, 4294967295, %v6423_v53  ;;  %v3594_v12 = vadd.f32 %v4746_v38, %v4742_v9  ;;  %v3622_v27 = vadd.f32 %v4748_v10, %v4744_v30  ;;  %v1369_v4 = vsel %vm6353_vm15, %v1273_v52, -inf }
 0x2aa   :  { %6425 = vst [vmem:[#allocation50_spill] sm:$0xff] %v6424_v53  ;;  %v1345_v31 = vsel %vm6353_vm15, %v1265_v26, -inf  ;;  %v3650_v5 = vadd.f32 %v3649_v48, %v3648_v34  ;;  %v1297_v9 = vsel %vm4860_vm9, %v4832_v17, -inf  ;;  %v1269_v30 = vsel %vm4864_vm10, %v4832_v17, -inf }
 0x2ab   :  { %v6426_v38 = vmov 0  ;;  %vm4891_vm7 = vcmp.eq.s32.totalorder %v1212_v7, 1  ;;  %v6429_v10 = vmov 0  ;;  %v938_v2 = vadd.f32 %v3622_v27, %v3594_v12 }
 0x2ac   :  { %v6427_v38 = vsel %vm4887_vm14, 4294967295, %v6426_v38  ;;  %v6430_v10 = vsel %vm4891_vm7, 4294967295, %v6429_v10  ;;  %v1172_v34 = vsel %vm1156_vm12, 1, %v6410_v19  ;;  %v1441_v52 = vsel %vm6353_vm15, %v1297_v9, -inf }
 0x2ad   :  { %1370 = vmax.xlane.f32.xlu0 %v1369_v4  ;;  %1346 = vmax.xlane.f32.xlu1 %v1345_v31  ;;  %6428 = vst [vmem:[#allocation51_spill] sm:$0xff] %v6427_v38  ;;  %6431 = vst [vmem:[#allocation52_spill] sm:$0xff] %v6430_v10  ;;  %v1216_v31 = vrot.slane %v1170_v23, %v4330_v44  ;;  %v1357_v26 = vsel %vm6353_vm15, %v1269_v30, -inf  ;;  %v987_v48 = vadd.f32 %v3650_v5, %v938_v2  ;;  %v6432_v7 = vmov 0 }
 0x2ae   :  { %v1277_v42 = vsel %vm4887_vm14, %v4832_v17, -inf  ;;  %v1289_v50 = vsel %vm4891_vm7, %v4832_v17, -inf  ;;  %v6433_v7 = vsel %vm4908_vm2, 4294967295, %v6432_v7  ;;  %v6435_v12 = vmov 0 }
 0x2af   :  { %6434 = vst [vmem:[#allocation53_spill] sm:$0xff] %v6433_v7  ;;  %vm4912_vm12 = vcmp.eq.s32.totalorder %v1216_v31, 1  ;;  %v1224_v27 = vrot.slane %v1172_v34, %v4330_v44  ;;  %v1126_v23 = vrot.slane %v4794_v45, %v4315_v25  ;;  %v1167_v4 = vsel %vm1151_vm8, 1, %v6410_v19 }
 0x2b0   :  { %v6436_v12 = vsel %vm4912_vm12, 4294967295, %v6435_v12  ;;  %v1381_v5 = vsel %vm6353_vm15, %v1277_v42, -inf  ;;  %v1417_v9 = vsel %vm6353_vm15, %v1289_v50, -inf  ;;  %v1095_v30 = vcombine.high %v4820_v37, %v4820_v37 }
 0x2b1   :  { %1442 = vmax.xlane.f32.xlu0 %v1441_v52  ;;  %1358 = vmax.xlane.f32.xlu1 %v1357_v26  ;;  %6437 = vst [vmem:[#allocation54_spill] sm:$0xff] %v6436_v12  ;;  %vm1157_vm1 = vcmp.ne.s32.totalorder %v1126_v23, 0  ;;  %v4924_v15 = vadd.f32 %v1035_v58, %v987_v48  ;;  %v1317_v31 = vsel %vm4908_vm2, %v4832_v17, -inf  ;;  %v1293_v25 = vsel %vm4912_vm12, %v4832_v17, -inf }
 0x2b2   :  { %vm4932_vm8 = vcmp.eq.s32.totalorder %v1224_v27, 1  ;;  %v6438_v45 = vmov 0  ;;  %v1204_v2 = vrot.slane %v1167_v4, %v4330_v44  ;;  %v1173_v37 = vsel %vm1157_vm1, 1, %v6410_v19 }
 0x2b3   :  { %v6439_v45 = vsel %vm4932_vm8, 4294967295, %v6438_v45  ;;  %v1501_v34 = vsel %vm6353_vm15, %v1317_v31, -inf  ;;  %v1429_v52 = vsel %vm6353_vm15, %v1293_v25, -inf  ;;  %vm1152_vm0 = vcmp.ne.s32.totalorder %v1095_v30, 0  ;;  %v3651_v31 = vpop.f32.mrf.mxu1 }
 0x2b4   :  { %6440 = vst [vmem:[#allocation55_spill] sm:$0xff] %v6439_v45  ;;  %v1302_v26 = vsel %vm4932_vm8, %v4924_v15, -inf  ;;  %v1301_v48 = vsel %vm4932_vm8, %v4832_v17, -inf  ;;  %vm4946_vm3 = vcmp.eq.s32.totalorder %v1204_v2, 1  ;;  %v6441_v42 = vmov 0 }
 0x2b5   :  { %1382 = vmax.xlane.f32.xlu0 %v1381_v5  ;;  %1418 = vmax.xlane.f32.xlu1 %v1417_v9  ;;  %v6442_v42 = vsel %vm4946_vm3, 4294967295, %v6441_v42  ;;  %v1228_v50 = vrot.slane %v1173_v37, %v4330_v44  ;;  %v1168_v27 = vsel %vm1152_vm0, 1, %v6410_v19  ;;  %v1456_v4 = vsel %vm6353_vm15, %v1302_v26, -inf  ;;  %v3652_v26 = vpop.f32.mrf.mxu1 }
 0x2b6   :  { %6443 = vst [vmem:[#allocation56_spill] sm:$0xff] %v6442_v42  ;;  %v1453_v58 = vsel %vm6353_vm15, %v1301_v48, -inf  ;;  %vm1158_vm1 = vcmp.ne.s32.totalorder %v4811_v43, 0  ;;  %v1142_v5 = vcombine.high %v1126_v23, %v1126_v23  ;;  %v1282_v9 = vsel %vm4946_vm3, %v4924_v15, -inf }
 0x2b7   :  { %v1281_v30 = vsel %vm4946_vm3, %v4832_v17, -inf  ;;  %vm4961_vm4 = vcmp.eq.s32.totalorder %v1228_v50, 1  ;;  %v6444_v25 = vmov 0  ;;  %v1208_v2 = vrot.slane %v1168_v27, %v4330_v44 }
 0x2b8   :  { %v6445_v25 = vsel %vm4961_vm4, 4294967295, %v6444_v25  ;;  %v1174_v43 = vsel %vm1158_vm1, 1, %v6410_v19  ;;  %v1396_v23 = vsel %vm6353_vm15, %v1282_v9, -inf  ;;  %v1393_v37 = vsel %vm6353_vm15, %v1281_v30, -inf }
 0x2b9   :  { %1502 = vmax.xlane.f32.xlu0 %v1501_v34  ;;  %1430 = vmax.xlane.f32.xlu1 %v1429_v52  ;;  %6446 = vst [vmem:[#allocation57_spill] sm:$0xff] %v6445_v25  ;;  %vm1159_vm0 = vcmp.ne.s32.totalorder %v1142_v5, 0  ;;  %v1306_v34 = vsel %vm4961_vm4, %v4924_v15, -inf  ;;  %v1305_v52 = vsel %vm4961_vm4, %v4832_v17, -inf  ;;  %vm4975_vm2 = vcmp.eq.s32.totalorder %v1208_v2, 1 }
 0x2ba   :  { %v6447_v48 = vmov 0  ;;  %v1232_v50 = vrot.slane %v1174_v43, %v4330_v44  ;;  %v3597_v27 = vadd.f32 %v4759_v35, %v4753_v32  ;;  %v1468_v5 = vsel %vm6353_vm15, %v1306_v34, -inf }
 0x2bb   :  { %v6448_v48 = vsel %vm4975_vm2, 4294967295, %v6447_v48  ;;  %v1465_v9 = vsel %vm6353_vm15, %v1305_v52, -inf  ;;  %v3653_v30 = vadd.f32 %v3652_v26, %v3651_v31  ;;  %v1286_v2 = vsel %vm4975_vm2, %v4924_v15, -inf }
 0x2bc   :  { %6449 = vst [vmem:[#allocation58_spill] sm:$0xff] %v6448_v48  ;;  %v1285_v32 = vsel %vm4975_vm2, %v4832_v17, -inf  ;;  %vm4993_vm1 = vcmp.eq.s32.totalorder %v1232_v50, 1  ;;  %v6450_v35 = vmov 0  ;;  %v6453_v34 = vmov 0 }
 0x2bd   :  { %1457 = vmax.xlane.f32.xlu0 %v1456_v4  ;;  %1454 = vmax.xlane.f32.xlu1 %v1453_v58  ;;  %v3625_v4 = vadd.f32 %v4761_v18, %v4755_v33  ;;  %v1175_v58 = vsel %vm1159_vm0, 1, %v6410_v19  ;;  %v6451_v35 = vsel %vm4993_vm1, 4294967295, %v6450_v35  ;;  %v1408_v19 = vsel %vm6353_vm15, %v1286_v2, -inf }
 0x2be   :  { %6452 = vst [vmem:[#allocation59_spill] sm:$0xff] %v6451_v35  ;;  %v1236_v33 = vrot.slane %v1175_v58, %v4330_v44  ;;  %v1405_v31 = vsel %vm6353_vm15, %v1285_v32, -inf  ;;  %v1262_v2 = vsel %vm4824_vm13, %v4924_v15, -inf }
 0x2bf   :  { %v943_v18 = vadd.f32 %v3625_v4, %v3597_v27 }
 0x2c0   :  { %vm5006_vm0 = vcmp.eq.s32.totalorder %v1236_v33, 1  ;;  %v1336_v33 = vsel %vm6353_vm15, %v1262_v2, -inf }
 0x2c1   :  { %1397 = vmax.xlane.f32.xlu0 %v1396_v23  ;;  %1394 = vmax.xlane.f32.xlu1 %v1393_v37  ;;  %v992_v43 = vadd.f32 %v3653_v30, %v943_v18  ;;  %v1310_v23 = vsel %vm4993_vm1, %v4924_v15, -inf  ;;  %v1309_v37 = vsel %vm4993_vm1, %v4832_v17, -inf  ;;  %v6454_v34 = vsel %vm5006_vm0, 4294967295, %v6453_v34 }
 0x2c2   :  { %6455 = vst [vmem:[#allocation60_spill] sm:$0xff] %v6454_v34  ;;  %v1480_v44 = vsel %vm6353_vm15, %v1310_v23, -inf  ;;  %v1477_v52 = vsel %vm6353_vm15, %v1309_v37, -inf  ;;  %v1314_v50 = vsel %vm5006_vm0, %v4924_v15, -inf  ;;  %v1313_v27 = vsel %vm5006_vm0, %v4832_v17, -inf }
 0x2c3   :  { %v5013_v26 = vadd.f32 %v4808_v6, %v992_v43  ;;  %v1492_v4 = vsel %vm6353_vm15, %v1314_v50, -inf  ;;  %v1489_v58 = vsel %vm6353_vm15, %v1313_v27, -inf  ;;  %v1270_v37 = vsel %vm4864_vm10, %v4924_v15, -inf }
 0x2c4   :  { %v1360_v50 = vsel %vm6353_vm15, %v1270_v37, -inf  ;;  %v1298_v37 = vsel %vm4860_vm9, %v4924_v15, -inf }
 0x2c5   :  { %1469 = vmax.xlane.f32.xlu0 %v1468_v5  ;;  %1466 = vmax.xlane.f32.xlu1 %v1465_v9  ;;  %v1291_v6 = vsel %vm4891_vm7, %v5013_v26, -inf  ;;  %v1258_v5 = vsel %vm4814_vm11, %v4924_v15, -inf  ;;  %v1299_v17 = vsel %vm4860_vm9, %v5013_v26, -inf  ;;  %v1279_v18 = vsel %vm4887_vm14, %v5013_v26, -inf }
 0x2c6   :  { %v1423_v9 = vsel %vm6353_vm15, %v1291_v6, -inf  ;;  %v1324_v30 = vsel %vm6353_vm15, %v1258_v5, -inf  ;;  %v1447_v32 = vsel %vm6353_vm15, %v1299_v17, -inf  ;;  %v1303_v23 = vsel %vm4932_vm8, %v5013_v26, -inf }
 0x2c7   :  { %v1283_v27 = vsel %vm4946_vm3, %v5013_v26, -inf  ;;  %v1294_v17 = vsel %vm4912_vm12, %v4924_v15, -inf }
 0x2c8   :  { %v1399_v6 = vsel %vm6353_vm15, %v1283_v27, -inf }
 0x2c9   :  { %1409 = vmax.xlane.f32.xlu0 %v1408_v19  ;;  %1406 = vmax.xlane.f32.xlu1 %v1405_v31  ;;  %v1266_v19 = vsel %vm4834_vm5, %v4924_v15, -inf  ;;  %v1387_v31 = vsel %vm6353_vm15, %v1279_v18, -inf  ;;  %v1287_v18 = vsel %vm4975_vm2, %v5013_v26, -inf  ;;  %vm6456_vm2 = vnez %v6433_v7 }
 0x2ca   :  { %v1348_v43 = vsel %vm6353_vm15, %v1266_v19, -inf  ;;  %v1274_v19 = vsel %vm4838_vm6, %v4924_v15, -inf }
 0x2cd   :  { %1481 = vmax.xlane.f32.xlu0 %v1480_v44  ;;  %1478 = vmax.xlane.f32.xlu1 %v1477_v52  ;;  %v3654_v44 = vpop.f32.mrf.mxu1  ;;  %v1459_v52 = vsel %vm6353_vm15, %v1303_v23, -inf }
 0x2d1   :  { %1493 = vmax.xlane.f32.xlu0 %v1492_v4  ;;  %1490 = vmax.xlane.f32.xlu1 %v1489_v58  ;;  %v1290_v4 = vsel %vm4891_vm7, %v4924_v15, -inf  ;;  %v3655_v58 = vpop.f32.mrf.mxu1 }
 0x2d2   :  { %v1420_v5 = vsel %vm6353_vm15, %v1290_v4, -inf }
 0x2d5   :  { %1424 = vmax.xlane.f32.xlu0 %v1423_v9  ;;  %1325 = vmax.xlane.f32.xlu1 %v1324_v30  ;;  %v3656_v9 = vadd.f32 %v3655_v58, %v3654_v44  ;;  %v1307_v30 = vsel %vm4961_vm4, %v5013_v26, -inf }
 0x2d6   :  { %v1471_v2 = vsel %vm6353_vm15, %v1307_v30, -inf }
 0x2d9   :  { %1448 = vmax.xlane.f32.xlu0 %v1447_v32  ;;  %1337 = vmax.xlane.f32.xlu1 %v1336_v33  ;;  %v1432_v32 = vsel %vm6353_vm15, %v1294_v17, -inf  ;;  %v995_v33 = vadd.f32 %v3656_v9, %v4781_v54  ;;  %v1311_v54 = vsel %vm4993_vm1, %v5013_v26, -inf  ;;  %v1259_v17 = vsel %vm4814_vm11, %v5013_v26, -inf }
 0x2da   :  { %v1483_v44 = vsel %vm6353_vm15, %v1311_v54, -inf }
 0x2db   :  { %v5081_v23 = vadd.f32 %v4898_v16, %v995_v33  ;;  %v1263_v33 = vsel %vm4824_vm13, %v5013_v26, -inf }
 0x2dd   :  { %1388 = vmax.xlane.f32.xlu0 %v1387_v31  ;;  %1349 = vmax.xlane.f32.xlu1 %v1348_v43  ;;  %v1411_v31 = vsel %vm6353_vm15, %v1287_v18, -inf  ;;  %v1372_v43 = vsel %vm6353_vm15, %v1274_v19, -inf  ;;  %v1268_v16 = vsel %vm4834_vm5, %v5081_v23, -inf  ;;  %v1272_v58 = vsel %vm4864_vm10, %v5081_v23, -inf }
 0x2de   :  { %v1354_v27 = vsel %vm6353_vm15, %v1268_v16, -inf  ;;  %v1292_v30 = vsel %vm4891_vm7, %v5081_v23, -inf  ;;  %v1339_v19 = vsel %vm6353_vm15, %v1263_v33, -inf  ;;  %v6457_v16 = vmov 0.0  }
 0x2e1   :  { %1460 = vmax.xlane.f32.xlu0 %v1459_v52  ;;  %1361 = vmax.xlane.f32.xlu1 %v1360_v50  ;;  %v1444_v52 = vsel %vm6353_vm15, %v1298_v37, -inf  ;;  %v1278_v50 = vsel %vm4887_vm14, %v4924_v15, -inf }
 0x2e2   :  { %v1384_v4 = vsel %vm6353_vm15, %v1278_v50, -inf }
 0x2e5   :  { %1400 = vmax.xlane.f32.xlu0 %v1399_v6  ;;  %1421 = vmax.xlane.f32.xlu1 %v1420_v5  ;;  %v1318_v6 = vsel %vm6456_vm2, %v4924_v15, -inf  ;;  %v1366_v5 = vsel %vm6353_vm15, %v1272_v58, -inf  ;;  %v1312_v15 = vsel %vm4993_vm1, %v5081_v23, -inf  ;;  %vm6458_vm1 = vcmp.eq.s32.totalorder %v4769_v47, %v4766_v41 }
 0x2e6   :  { %v1504_v9 = vsel %vm6353_vm15, %v1318_v6, -inf  ;;  %v1486_v18 = vsel %vm6353_vm15, %v1312_v15, -inf  ;;  %v3485_v50 = vsel %vm6458_vm1, 1.0, %v6457_v16  ;;  %v1295_v58 = vsel %vm4912_vm12, %v5013_v26, -inf }
 0x2e7   :  { %v159_v6 = vsel %vm6353_vm15, %v3485_v50, 0.0  ;;  %v1275_v47 = vsel %vm4838_vm6, %v5013_v26, -inf  ;;  %v1260_v15 = vsel %vm4814_vm11, %v5081_v23, -inf  ;;  %vm6459_vm1 = vnez %v6448_v48 }
 0x2e8   :  { %v1330_v33 = vsel %vm6353_vm15, %v1260_v15, -inf }
 0x2e9   :  { %1472 = vmax.xlane.f32.xlu0 %v1471_v2  ;;  %1433 = vmax.xlane.f32.xlu1 %v1432_v32  ;;  %v1426_v2 = vsel %vm6353_vm15, %v1292_v30, -inf  ;;  %v1327_v32 = vsel %vm6353_vm15, %v1259_v17, -inf  ;;  %v1315_v30 = vsel %vm5006_vm0, %v5013_v26, -inf }
 0x2ea   :  { %v1495_v17 = vsel %vm6353_vm15, %v1315_v30, -inf }
 0x2ed   :  { %1412 = vmax.xlane.f32.xlu0 %v1411_v31  ;;  %1373 = vmax.xlane.f32.xlu1 %v1372_v43  ;;  %v1316_v31 = vsel %vm5006_vm0, %v5081_v23, -inf  ;;  %v1267_v43 = vsel %vm4834_vm5, %v5013_v26, -inf }
 0x2ee   :  { %v1498_v54 = vsel %vm6353_vm15, %v1316_v31, -inf  ;;  %v1351_v37 = vsel %vm6353_vm15, %v1267_v43, -inf  ;;  %v1276_v43 = vsel %vm4838_vm6, %v5081_v23, -inf }
 0x2f1   :  { %1484 = vmax.xlane.f32.xlu0 %v1483_v44  ;;  %1445 = vmax.xlane.f32.xlu1 %v1444_v52  ;;  %v1320_v44 = vsel %vm6456_vm2, %v5081_v23, -inf  ;;  %v1271_v52 = vsel %vm4864_vm10, %v5013_v26, -inf  ;;  %vm6472_vm10 = vcmask 1041409  }
 0x2f5   :  { %1355 = vmax.xlane.f32.xlu0 %v1354_v27  ;;  %1385 = vmax.xlane.f32.xlu1 %v1384_v4  ;;  %v1510_v27 = vsel %vm6353_vm15, %v1320_v44, -inf  ;;  %v1363_v4 = vsel %vm6353_vm15, %v1271_v52, -inf  ;;  %v1280_v52 = vsel %vm4887_vm14, %v5081_v23, -inf }
 0x2f6   :  { %v1390_v50 = vsel %vm6353_vm15, %v1280_v52, -inf }
 0x2f9   :  { %1367 = vmax.xlane.f32.xlu0 %v1366_v5  ;;  %1505 = vmax.xlane.f32.xlu1 %v1504_v9  ;;  %v1435_v5 = vsel %vm6353_vm15, %v1295_v58, -inf  ;;  %v1375_v9 = vsel %vm6353_vm15, %v1275_v47, -inf }
 0x2fd   :  { %1427 = vmax.xlane.f32.xlu0 %v1426_v2  ;;  %1328 = vmax.xlane.f32.xlu1 %v1327_v32  ;;  %v1319_v2 = vsel %vm6456_vm2, %v5013_v26, -inf  ;;  %v1296_v26 = vsel %vm4912_vm12, %v5081_v23, -inf  ;;  %vm6460_vm2 = vcmp.eq.s32.totalorder %v4306_v20, %v4766_v41 }
 0x2fe   :  { %v1507_v32 = vsel %vm6353_vm15, %v1319_v2, -inf  ;;  %v1438_v31 = vsel %vm6353_vm15, %v1296_v26, -inf  ;;  %v3484_v26 = vsel %vm6460_vm2, 1.0, %v6457_v16 }
 0x301   :  { %1487 = vmax.xlane.f32.xlu0 %v1486_v18  ;;  %1340 = vmax.xlane.f32.xlu1 %v1339_v19  ;;  %v1264_v18 = vsel %vm4824_vm13, %v5081_v23, -inf }
 0x302   :  { %v1342_v19 = vsel %vm6353_vm15, %v1264_v18, -inf }
 0x305   :  { %1499 = vmax.xlane.f32.xlu0 %v1498_v54  ;;  %1352 = vmax.xlane.f32.xlu1 %v1351_v37  ;;  %v1378_v54 = vsel %vm6353_vm15, %v1276_v43, -inf  ;;  %v1300_v37 = vsel %vm4860_vm9, %v5081_v23, -inf }
 0x306   :  { %v1450_v44 = vsel %vm6353_vm15, %v1300_v37, -inf }
 0x309   :  { %1511 = vmax.xlane.f32.xlu0 %v1510_v27  ;;  %1364 = vmax.xlane.f32.xlu1 %v1363_v4  ;;  %v1304_v27 = vsel %vm4932_vm8, %v5081_v23, -inf }
 0x30d   :  { %1436 = vmax.xlane.f32.xlu1 %v1435_v5  ;;  %160 = vadd.xlane.f32.xlu0 %v159_v6  ;;  %v1462_v6 = vsel %vm6353_vm15, %v1304_v27, -inf  ;;  %v1284_v5 = vsel %vm4946_vm3, %v5081_v23, -inf  ;;  %vm6484_vm3 = vcmask 195712  }
 0x30e   :  { %v1402_v30 = vsel %vm6353_vm15, %v1284_v5, -inf  ;;  %vm6485_vm5 = vmmov %vm6484_vm3 }
 0x311   :  { %1376 = vmax.xlane.f32.xlu1 %v1375_v9 }
 0x315   :  { %1496 = vmax.xlane.f32.xlu1 %v1495_v17  ;;  %v1308_v17 = vsel %vm4961_vm4, %v5081_v23, -inf }
 0x316   :  { %v1474_v15 = vsel %vm6353_vm15, %v1308_v17, -inf }
 0x319   :  { %1508 = vmax.xlane.f32.xlu1 %v1507_v32 }
 0x31d   :  { %1331 = vmax.xlane.f32.xlu1 %v1330_v33  ;;  %v1288_v33 = vsel %vm6459_vm1, %v5081_v23, -inf  ;;  %vm6465_vm1 = vcmask 130112  }
 0x31e   :  { %vm6466_vm2 = vmmov %vm6465_vm1 }
 0x31f   :  { %vm6467_vm8 = vmmov %vm6465_vm1 }
 0x321   :  { %1343 = vmax.xlane.f32.xlu1 %v1342_v19 }
 0x325   :  { %1439 = vmax.xlane.f32.xlu1 %v1438_v31  ;;  %v1414_v31 = vsel %vm6353_vm15, %v1288_v33, -inf }
 0x329   :  { %1379 = vmax.xlane.f32.xlu1 %v1378_v54  ;;  %v156_v54 = vsel %vm6353_vm15, %v3484_v26, 0.0  ;;  %vm6470_vm15 = vcmask 261312  }
 0x32d   :  { %1451 = vmax.xlane.f32.xlu1 %v1450_v44 }
 0x331   :  { %1391 = vmax.xlane.f32.xlu1 %v1390_v50  ;;  %v5231_v50 = vpop.f32.mrf.mxu1 }
 0x332   :  { %v5187_v4 = vpop.xlane.xlu0 %1334  ;;  %v5189_v58 = vpop.xlane.xlu1 %1322  ;;  %6461 = vst [vmem:[#allocation61_spill] sm:$0xff] %v5231_v50 }
 0x333   :  { %v3812_v41 = vpop.f32.mrf.mxu1  ;;  %v1611_v13 = vrot.slane %v5187_v4, %v5303_v60 }
 0x335   :  { %1463 = vmax.xlane.f32.xlu1 %v1462_v6  ;;  %v5237_v5 = vpop.f32.mrf.mxu1 }
 0x336   :  { %v5195_v47 = vpop.xlane.xlu0 %1370  ;;  %v5197_v9 = vpop.xlane.xlu1 %1346  ;;  %6462 = vst [vmem:[#allocation62_spill] sm:$0xff] %v5237_v5 }
 0x337   :  { %v3813_v17 = vpop.f32.mrf.mxu1  ;;  %v1630_v20 = vrot.slane %v5197_v9, %v5303_v60 }
 0x339   :  { %1403 = vmax.xlane.f32.xlu1 %v1402_v30 }
 0x33a   :  { %v5203_v2 = vpop.xlane.xlu0 %1442  ;;  %v5205_v32 = vpop.xlane.xlu1 %1358 }
 0x33b   :  { %v1782_v4 = vrot.slane %v5203_v2, %v5303_v60 }
 0x33d   :  { %1475 = vmax.xlane.f32.xlu1 %v1474_v15 }
 0x33e   :  { %v5211_v18 = vpop.xlane.xlu0 %1382  ;;  %v5213_v19 = vpop.xlane.xlu1 %1418 }
 0x33f   :  { %v1744_v1 = vrot.slane %v5213_v19, %v5303_v60 }
 0x341   :  { %1415 = vmax.xlane.f32.xlu1 %v1414_v31 }
 0x342   :  { %v5220_v43 = vpop.xlane.xlu1 %1430  ;;  %v5223_v37 = vpop.xlane.xlu0 %1502 }
 0x343   :  { %v1763_v19 = vrot.slane %v5220_v43, %v5303_v60 }
 0x345   :  { %157 = vadd.xlane.f32.xlu1 %v156_v54 }
 0x346   :  { %v5225_v23 = vpop.xlane.xlu1 %1454  ;;  %v5227_v44 = vpop.xlane.xlu0 %1457 }
 0x34a   :  { %v5229_v52 = vpop.xlane.xlu1 %1394  ;;  %v5235_v6 = vpop.xlane.xlu0 %1397 }
 0x34e   :  { %v5233_v27 = vpop.xlane.xlu1 %1466  ;;  %v5241_v15 = vpop.xlane.xlu0 %1469 }
 0x352   :  { %v5239_v30 = vpop.xlane.xlu1 %1406  ;;  %v5247_v31 = vpop.xlane.xlu0 %1409 }
 0x356   :  { %v5243_v33 = vpop.xlane.xlu1 %1478  ;;  %v5251_v41 = vpop.xlane.xlu0 %1481 }
 0x35a   :  { %v5245_v26 = vpop.xlane.xlu1 %1490  ;;  %v5255_v45 = vpop.xlane.xlu0 %1493 }
 0x35e   :  { %v5249_v54 = vpop.xlane.xlu1 %1325  ;;  %v5259_v17 = vpop.xlane.xlu0 %1424 }
 0x362   :  { %v1338_v7 = vpop.xlane.xlu1 %1337  ;;  %v5261_v29 = vpop.xlane.xlu0 %1448 }
 0x363   :  { %v1615_v56 = vrot.slane %v1338_v7, %v5306_v59  ;;  %v1668_v7 = vrot.slane %v5195_v47, %v5303_v60  ;;  %v1591_v47 = vrot.slane %v5249_v54, %v5306_v59 }
 0x365   :  { %v1616_v9 = vsel %vm6466_vm2, %v1615_v56, %v1611_v13 }
 0x366   :  { %v5253_v48 = vpop.xlane.xlu1 %1349  ;;  %v5265_v12 = vpop.xlane.xlu0 %1388 }
 0x367   :  { %v1634_v43 = vrot.slane %v5253_v48, %v5306_v59 }
 0x36a   :  { %v5257_v34 = vpop.xlane.xlu1 %1361  ;;  %v5271_v25 = vpop.xlane.xlu0 %1460 }
 0x36e   :  { %v1422_v53 = vpop.xlane.xlu1 %1421  ;;  %v5275_v3 = vpop.xlane.xlu0 %1400 }
 0x36f   :  { %v1748_v14 = vrot.slane %v1422_v53, %v5306_v59  ;;  %v1586_v53 = vrot.slane %v5189_v58, %v5303_v60  ;;  %v1753_v58 = vrot.slane %v5259_v17, %v5309_v57 }
 0x372   :  { %v1434_v42 = vpop.xlane.xlu1 %1433  ;;  %v5281_v16 = vpop.xlane.xlu0 %1472 }
 0x373   :  { %v1767_v63 = vrot.slane %v1434_v42, %v5306_v59  ;;  %v1749_v42 = vsel %vm6465_vm1, %v1748_v14, %v1744_v1  ;;  %vm6468_vm1 = vcmask 195712  }
 0x374   :  { %v1754_v54 = vsel %vm6468_vm1, %v1753_v58, %v1749_v42  ;;  %vm6469_vm2 = vmmov %vm6468_vm1 }
 0x375   :  { %v1768_v14 = vsel %vm6467_vm8, %v1767_v63, %v1763_v19  ;;  %vm6471_vm8 = vmmov %vm6470_vm15  ;;  %v1687_v19 = vrot.slane %v5211_v18, %v5303_v60 }
 0x376   :  { %v5263_v35 = vpop.xlane.xlu1 %1373  ;;  %v5285_v40 = vpop.xlane.xlu0 %1412  ;;  %vm6476_vm0 = vmmov %vm6468_vm1 }
 0x377   :  { %6463 = vst [vmem:[#allocation63_spill] sm:$0xff] %v5285_v40 }
 0x37a   :  { %v5267_v38 = vpop.xlane.xlu1 %1445  ;;  %v5289_v24 = vpop.xlane.xlu0 %1484 }
 0x37b   :  { %v1786_v17 = vrot.slane %v5267_v38, %v5306_v59  ;;  %v1649_v38 = vrot.slane %v5205_v32, %v5303_v60 }
 0x37e   :  { %v5269_v10 = vpop.xlane.xlu1 %1385  ;;  %v5293_v22 = vpop.xlane.xlu0 %1355 }
 0x37f   :  { %v1691_v18 = vrot.slane %v5269_v10, %v5306_v59  ;;  %v1644_v10 = vrot.slane %v5293_v22, %v5314_v55 }
 0x382   :  { %v5273_v8 = vpop.xlane.xlu1 %1505  ;;  %v5300_v0 = vpop.xlane.xlu0 %1367 }
 0x386   :  { %v5277_v49 = vpop.xlane.xlu1 %1328  ;;  %v1428_v50 = vpop.xlane.xlu0 %1427 }
 0x387   :  { %v1758_v40 = vrot.slane %v1428_v50, %v5314_v55  ;;  %v1598_v56 = vrot.slane %v5277_v49, %v5309_v57 }
 0x389   :  { %v1759_v13 = vsel %vm6470_vm15, %v1758_v40, %v1754_v54  ;;  %vm6473_vm15 = vcmask 130112   ;;  %v1663_v54 = vrot.slane %v5300_v0, %v5314_v55  ;;  %v1801_v0 = vrot.slane %v5225_v23, %v5303_v60 }
 0x38a   :  { %v5279_v28 = vpop.xlane.xlu1 %1340  ;;  %v1593_v40 = vsel %vm6473_vm15, %v1591_v47, %v1586_v53 }
 0x38e   :  { %v5283_v51 = vpop.xlane.xlu1 %1352 }
 0x38f   :  { %v1639_v48 = vrot.slane %v5283_v51, %v5309_v57  ;;  %v1653_v51 = vrot.slane %v5257_v34, %v5306_v59 }
 0x392   :  { %v5287_v39 = vpop.xlane.xlu1 %1364 }
 0x396   :  { %v1437_v36 = vpop.xlane.xlu1 %1436 }
 0x397   :  { %v1772_v62 = vrot.slane %v1437_v36, %v5309_v57  ;;  %v1620_v36 = vrot.slane %v5279_v28, %v5309_v57 }
 0x399   :  { %v1773_v28 = vsel %vm6469_vm2, %v1772_v62, %v1768_v14  ;;  %v1621_v49 = vsel %vm6468_vm1, %v1620_v36, %v1616_v9  ;;  %vm6474_vm2 = vmmov %vm6471_vm8  ;;  %v1600_v9 = vsel %vm6476_vm0, %v1598_v56, %v1593_v40  ;;  %v1658_v36 = vrot.slane %v5287_v39, %v5309_v57 }
 0x39a   :  { %v5291_v46 = vpop.xlane.xlu1 %1376  ;;  %vm6478_vm1 = vmmov %vm6476_vm0 }
 0x39b   :  { %v1677_v34 = vrot.slane %v5291_v46, %v5309_v57 }
 0x39e   :  { %v5295_v21 = vpop.xlane.xlu1 %1496 }
 0x3a2   :  { %v5298_v11 = vpop.xlane.xlu1 %1508 }
 0x3a6   :  { %v1332_v61 = vpop.xlane.xlu1 %1331 }
 0x3a7   :  { %v1605_v63 = vrot.slane %v1332_v61, %v5314_v55  ;;  %v1672_v61 = vrot.slane %v5263_v35, %v5306_v59 }
 0x3aa   :  { %v1344_v5 = vpop.xlane.xlu1 %1343 }
 0x3ab   :  { %v1625_v50 = vrot.slane %v1344_v5, %v5314_v55 }
 0x3ad   :  { %v1626_v58 = vsel %vm6474_vm2, %v1625_v50, %v1621_v49 }
 0x3ae   :  { %v1440_v2 = vpop.xlane.xlu1 %1439 }
 0x3af   :  { %v1777_v1 = vrot.slane %v1440_v2, %v5314_v55 }
 0x3b1   :  { %v1778_v5 = vsel %vm6471_vm8, %v1777_v1, %v1773_v28  ;;  %vm6475_vm8 = vmmov %vm6473_vm15  ;;  %v5390_v1 = vpop.xlane.xlu0 %1487 }
 0x3b2   :  { %v1907_v62 = vsel %vm6472_vm10, %v1778_v5, %v1759_v13  ;;  %v1380_v42 = vpop.xlane.xlu1 %1379  ;;  %v1635_v32 = vsel %vm6475_vm8, %v1634_v43, %v1630_v20  ;;  %vm6477_vm10 = vmmov %vm6475_vm8  ;;  %v1791_v20 = vrot.slane %v5261_v29, %v5309_v57  ;;  %v1805_v13 = vrot.slane %v5227_v44, %v5306_v59 }
 0x3b3   :  { %v1787_v53 = vsel %vm6477_vm10, %v1786_v17, %v1782_v4  ;;  %v1640_v47 = vsel %vm6478_vm1, %v1639_v48, %v1635_v32  ;;  %vm6479_vm15 = vmmov %vm6474_vm2  ;;  %vm6480_vm2 = vcmask 1041409   ;;  %v1682_v43 = vrot.slane %v1380_v42, %v5314_v55 }
 0x3b4   :  { %v1607_v35 = vsel %vm6479_vm15, %v1605_v63, %v1600_v9  ;;  %vm6481_vm0 = vmmov %vm6475_vm8  ;;  %vm6367_vm10 = vcmask 1044484   ;;  %v1645_v29 = vsel %vm6479_vm15, %v1644_v10, %v1640_v47  ;;  %v1792_v17 = vsel %vm6485_vm5, %v1791_v20, %v1787_v53 }
 0x3b5   :  { %v1894_v2 = vsel %vm6480_vm2, %v1626_v58, %v1607_v35  ;;  %v1654_v4 = vsel %vm6481_vm0, %v1653_v51, %v1649_v38  ;;  %vm6482_vm8 = vmmov %vm6481_vm0  ;;  %v1696_v48 = vrot.slane %v5265_v12, %v5309_v57  ;;  %v1710_v42 = vrot.slane %v5235_v6, %v5306_v59  ;;  %v1500_v23 = vpop.xlane.xlu0 %1499 }
 0x3b6   :  { %v1452_v39 = vpop.xlane.xlu1 %1451  ;;  %v1673_v14 = vsel %vm6482_vm8, %v1672_v61, %v1668_v7  ;;  %vm6483_vm1 = vmmov %vm6481_vm0  ;;  %v1659_v22 = vsel %vm6484_vm3, %v1658_v36, %v1654_v4  ;;  %vm6487_vm0 = vcmask 1042434   ;;  %v1706_v44 = vrot.slane %v5229_v52, %v5303_v60 }
 0x3b7   :  { %v1796_v46 = vrot.slane %v1452_v39, %v5314_v55  ;;  %v1692_v50 = vsel %vm6483_vm1, %v1691_v18, %v1687_v19  ;;  %vm6486_vm2 = vmmov %vm6484_vm3  ;;  %v1896_v7 = vsel %vm6487_vm0, %v1645_v29, %v1894_v2  ;;  %v1877_v32 = vrot.slane %v5223_v37, %v5303_v60 }
 0x3b8   :  { %v1678_v56 = vsel %vm6486_vm2, %v1677_v34, %v1673_v14  ;;  %vm6488_vm8 = vmmov %vm6479_vm15  ;;  %vm6366_vm15 = vcmask 1045509   ;;  %vm6492_vm2 = vcmask 1043459   ;;  %v1824_v52 = vrot.slane %v5241_v15, %v5306_v59 }
 0x3b9   :  { %v1797_v28 = vsel %vm6488_vm8, %v1796_v46, %v1792_v17  ;;  %vm6489_vm1 = vmmov %vm6488_vm8  ;;  %v1820_v9 = vrot.slane %v5233_v27, %v5303_v60  ;;  %v1729_v36 = vrot.slane %v5247_v31, %v5306_v59  ;;  %v1725_v53 = vrot.slane %v5239_v30, %v5303_v60  ;;  %v1512_v20 = vpop.xlane.xlu0 %1511 }
 0x3ba   :  { %v1683_v63 = vsel %vm6489_vm1, %v1682_v43, %v1678_v56  ;;  %vm6490_vm3 = vmmov %vm6487_vm0  ;;  %v1392_v38 = vpop.xlane.xlu1 %1391  ;;  %vm6493_vm0 = vcmask 195712   ;;  %v1810_v47 = vrot.slane %v5271_v25, %v5309_v57  ;;  %v1843_v37 = vrot.slane %v5251_v41, %v5306_v59 }
 0x3bb   :  { %v1908_v5 = vsel %vm6490_vm3, %v1797_v28, %v1907_v62  ;;  %vm6491_vm5 = vmmov %vm6489_vm1  ;;  %v1701_v49 = vrot.slane %v1392_v38, %v5314_v55  ;;  %v1697_v40 = vsel %vm6493_vm0, %v1696_v48, %v1692_v50  ;;  %v1839_v34 = vrot.slane %v5243_v33, %v5303_v60 }
 0x3bc   :  { %v1664_v19 = vsel %vm6491_vm5, %v1663_v54, %v1659_v22  ;;  %vm6494_vm8 = vmmov %vm6489_vm1  ;;  %vm6495_vm1 = vcmask 130112   ;;  %v1862_v27 = vrot.slane %v5255_v45, %v5306_v59  ;;  %v1858_v31 = vrot.slane %v5245_v26, %v5303_v60 }
 0x3bd   :  { %v1898_v12 = vsel %vm6492_vm2, %v1664_v19, %v1896_v7  ;;  %v1702_v51 = vsel %vm6494_vm8, %v1701_v49, %v1697_v40  ;;  %v1806_v6 = vsel %vm6495_vm1, %v1805_v13, %v1801_v0  ;;  %vm6496_vm3 = vmmov %vm6495_vm1  ;;  %v1715_v30 = vrot.slane %v5275_v3, %v5309_v57  ;;  %v5471_v17 = vpop.xlane.xlu0 %160 }
 0x3be   :  { %v1900_v62 = vsel %vm6367_vm10, %v1683_v63, %v1898_v12  ;;  %v1464_v61 = vpop.xlane.xlu1 %1463  ;;  %v1711_v18 = vsel %vm6496_vm3, %v1710_v42, %v1706_v44  ;;  %v1829_v25 = vrot.slane %v5281_v16, %v5309_v57  ;;  %v1848_v41 = vrot.slane %v5289_v24, %v5309_v57  ;;  %vm6497_vm0 = vmmov %vm6495_vm1 }
 0x3bf   :  { %v1902_v58 = vsel %vm6366_vm15, %v1702_v51, %v1900_v62  ;;  %v1815_v15 = vrot.slane %v1464_v61, %v5314_v55  ;;  %v1881_v33 = vrot.slane %v5273_v8, %v5306_v59  ;;  %v1867_v10 = vrot.slane %v5295_v21, %v5309_v57  ;;  %vm6498_vm8 = vmmov %vm6497_vm0 }
 0x3c0   :  { %v1825_v45 = vsel %vm6497_vm0, %v1824_v52, %v1820_v9  ;;  %v1730_v26 = vsel %vm6498_vm8, %v1729_v36, %v1725_v53  ;;  %vm6499_vm1 = vcmask 195712   ;;  %v1886_v16 = vrot.slane %v5298_v11, %v5309_v57  ;;  %vm6500_vm3 = vmmov %vm6497_vm0  ;;  %v6504_v11 = vld [vmem:[#allocation63_spill] sm:$0xff]  ;;  %v6523_v9 = vld [vmem:[#allocation61_spill] sm:$0xff] }
 0x3c1   :  { %v1811_v3 = vsel %vm6499_vm1, %v1810_v47, %v1806_v6  ;;  %v1844_v2 = vsel %vm6500_vm3, %v1843_v37, %v1839_v34  ;;  %v1853_v24 = vrot.slane %v5390_v1, %v5314_v55  ;;  %vm6501_vm2 = vmmov %vm6497_vm0  ;;  %v1734_v50 = vrot.slane %v6504_v11, %v5309_v57  ;;  %v3518_v6 = vld [vmem:[%s6244_s6] ss:$0 sm:$0xff] }
 0x3c2   :  { %v1404_v35 = vpop.xlane.xlu1 %1403  ;;  %v1816_v8 = vsel %vm6491_vm5, %v1815_v15, %v1811_v3  ;;  %v1863_v39 = vsel %vm6501_vm2, %v1862_v27, %v1858_v31  ;;  %vm6502_vm0 = vmmov %vm6499_vm1  ;;  %v1872_v54 = vrot.slane %v1500_v23, %v5314_v55  ;;  %v1891_v48 = vrot.slane %v1512_v20, %v5314_v55  ;;  %v6529_v3 = vld [vmem:[#allocation21_spill] sm:$0xff] }
 0x3c3   :  { %v1720_v43 = vrot.slane %v1404_v35, %v5314_v55  ;;  %v1716_v4 = vsel %vm6502_vm0, %v1715_v30, %v1711_v18  ;;  %vm6503_vm8 = vmmov %vm6502_vm0  ;;  %v6522_v18 = vld [vmem:[#allocation62_spill] sm:$0xff] }
 0x3c4   :  { %v1830_v14 = vsel %vm6503_vm8, %v1829_v25, %v1825_v45  ;;  %vm6505_vm1 = vmmov %vm6502_vm0  ;;  %v3920_v25 = vld [vmem:[#allocation2 + $0x4] ss:$28 sps:$4 sm:$0xff]  }
 0x3c5   :  { %v1849_v29 = vsel %vm6505_vm1, %v1848_v41, %v1844_v2  ;;  %vm6506_vm3 = vmmov %vm6501_vm2  ;;  %vm6509_vm2 = vcmask 1043459   ;;  %vm6513_vm1 = vcmask 1044484   ;;  %v3923_v41 = vld [vmem:[#allocation2 + $0xc] ss:$28 sps:$4 sm:$0xff]   ;;  %2395 = vmatprep.mubr.bf16.mxu1 %v3920_v25  ;;  %v6528_v45 = vld [vmem:[#allocation20_spill] sm:$0xff] }
 0x3c6   :  { %v1476_v21 = vpop.xlane.xlu1 %1475  ;;  %v1882_v1 = vsel %vm6506_vm3, %v1881_v33, %v1877_v32  ;;  %vm6507_vm15 = vmmov %vm6502_vm0  ;;  %v1909_v7 = vsel %vm6509_vm2, %v1816_v8, %v1908_v5  ;;  %vm6516_vm2 = vcmask 195712  }
 0x3c7   :  { %v1834_v46 = vrot.slane %v1476_v21, %v5314_v55  ;;  %v1868_v22 = vsel %vm6507_vm15, %v1867_v10, %v1863_v39  ;;  %vm6508_vm5 = vmmov %vm6502_vm0  ;;  %vm6510_vm0 = vcmask 261312   ;;  %vm6373_vm15 = vcmp.gt.f32.partialorder %v5471_v17, 0.0  ;;  %v6531_v39 = vld [vmem:[#allocation23_spill] sm:$0xff] }
 0x3c8   :  { %v1887_v56 = vsel %vm6508_vm5, %v1886_v16, %v1882_v1  ;;  %vm6511_vm8 = vmmov %vm6510_vm0  ;;  %vm6515_vm5 = vcmask 1045509   ;;  %v1735_v5 = vsel %vm6516_vm2, %v1734_v50, %v1730_v26 }
 0x3c9   :  { %v1835_v28 = vsel %vm6510_vm0, %v1834_v46, %v1830_v14  ;;  %v1854_v13 = vsel %vm6511_vm8, %v1853_v24, %v1849_v29  ;;  %vm6512_vm10 = vmmov %vm6510_vm0  ;;  %v1892_v44 = vsel %vm6510_vm0, %v1891_v48, %v1887_v56  ;;  %vm6517_vm8 = vcmask 1046534  }
 0x3ca   :  { %v1721_v63 = vsel %vm6512_vm10, %v1720_v43, %v1716_v4  ;;  %v1910_v38 = vsel %vm6513_vm1, %v1835_v28, %v1909_v7  ;;  %v1416_v0 = vpop.xlane.xlu1 %1415  ;;  %vm6514_vm3 = vmmov %vm6510_vm0  ;;  %vm6520_vm1 = vcmask 1047559   ;;  %v6530_v43 = vld [vmem:[#allocation22_spill] sm:$0xff] }
 0x3cb   :  { %v1739_v19 = vrot.slane %v1416_v0, %v5314_v55  ;;  %v1873_v49 = vsel %vm6514_vm3, %v1872_v54, %v1868_v22  ;;  %v1911_v42 = vsel %vm6515_vm5, %v1854_v13, %v1910_v38  ;;  %vm6518_vm12 = vmmov %vm6510_vm0  ;;  %v6532_v38 = vld [vmem:[#allocation24_spill] sm:$0xff]  ;;  %vm6552_vm0 = vcmask 261120  }
 0x3cc   :  { %v1912_v12 = vsel %vm6517_vm8, %v1873_v49, %v1911_v42  ;;  %vm6519_vm10 = vmmov %vm6517_vm8 }
 0x3cd   :  { %v1740_v40 = vsel %vm6518_vm12, %v1739_v19, %v1735_v5  ;;  %v1904_v62 = vsel %vm6519_vm10, %v1721_v63, %v1902_v58  ;;  %v1913_v51 = vsel %vm6520_vm1, %v1892_v44, %v1912_v12  ;;  %vm6521_vm14 = vmmov %vm6520_vm1  ;;  %v6533_v19 = vld [vmem:[#allocation25_spill] sm:$0xff]  ;;  %vm6556_vm10 = vmmov 0  }
 0x3ce   :  { %v1906_v23 = vsel %vm6521_vm14, %v1740_v40, %v1904_v62  ;;  %v5492_v61 = vpop.xlane.xlu1 %157  ;;  %v1917_v32 = vsel %vm6373_vm15, %v1913_v51, 0.0  ;;  %vm6524_vm14 = vcmask 130048   ;;  %v6534_v51 = vld [vmem:[#allocation26_spill] sm:$0xff]  ;;  %vm6554_vm8 = vmmov %vm6552_vm0 }
 0x3cf   :  { %vm6372_vm3 = vcmp.gt.f32.partialorder %v5492_v61, 0.0  ;;  %v1980_v52 = vadd.f32 %v6522_v18, %v1917_v32  ;;  %vm6525_vm12 = vmmov %vm6524_vm14  ;;  %v6535_v32 = vld [vmem:[#allocation27_spill] sm:$0xff] }
 0x3d0   :  { %v1916_v58 = vsel %vm6372_vm3, %v1906_v23, 0.0  ;;  %vm6526_vm5 = vmmov %vm6525_vm12 }
 0x3d1   :  { %v1979_v36 = vadd.f32 %v6523_v9, %v1916_v58  ;;  %v1989_v53 = vadd.f32 %v3518_v6, %v1980_v52  ;;  %vm6527_vm2 = vmmov %vm6526_vm5 }
 0x3d2   :  { %vm6557_vm1 = vmmov %vm6552_vm0 }
 0x3d3   :  { %v1988_v47 = vadd.f32 %v3518_v6, %v1979_v36  ;;  %v1991_v37 = vmax.f32 %v1989_v53, 0.0 }
 0x3d5   :  { %v1990_v34 = vmax.f32 %v1988_v47, 0.0 }
 0x3d7   :  { %1992 = vxpose.xlu1.b32.start [1/2] (short) (narrow) %v1990_v34, 32  ;;  %v5504_v15 = vpack.c.bf16 %v1991_v37, %v1990_v34 }
 0x3db   :  { %1993 = vxpose.xlu1.b32.end [2/2] (short) (narrow) %v1991_v37, 32 }
 0x453   :  { %v2008_v35 = vpop.trf.xlu1 }
 0x454   :  { %3830 = vmatprep.mubr.msk.f32.mxu0 %vm6524_vm14, %v2008_v35  ;;  %vm6558_vm14 = vmmov %vm6552_vm0 }
 0x457   :  { %v2009_v27 = vpop.trf.xlu1 }
 0x458   :  { %3831 = vmatmul.mubr.msk.f32.vlgmr.msra.gmra.mxu0 %vm6525_vm12, %v2009_v27  ;;  %vm6560_vm12 = vmmov %vm6552_vm0 }
 0x45b   :  { %v2010_v31 = vpop.trf.xlu1 }
 0x45c   :  { %3833 = vmatprep.mubr.msk.f32.mxu0 %vm6526_vm5, %v2010_v31  ;;  %vm6563_vm5 = vcmask 523264  }
 0x45f   :  { %v2011_v30 = vpop.trf.xlu1 }
 0x460   :  { %3834 = vmatmul.mubr.msk.f32.gmra.mxu0 %vm6527_vm2, %v2011_v30  ;;  %vm6564_vm2 = vmmov %vm6563_vm5 }
 0x461   :  { %2444 = vmatprep.mubr.bf16.mxu0 %v3923_v41  ;;  %v6536_v41 = vld [vmem:[#allocation28_spill] sm:$0xff] }
 0x518   :  { %v5510_v33 = vpop.f32.mrf.mxu0 }
 0x519   :  { %v2150_v29 = vmul.f32 %v5510_v33, %v6528_v45  ;;  %v2182_v1 = vmul.f32 %v5510_v33, %v6529_v3  ;;  %v2134_v42 = vmul.f32 %v5510_v33, %v6530_v43  ;;  %v2166_v5 = vmul.f32 %v5510_v33, %v6531_v39 }
 0x51a   :  { %v5512_v20 = vpop.f32.mrf.mxu0  ;;  %v2146_v47 = vmul.f32 %v5510_v33, %v6532_v38  ;;  %v2178_v37 = vmul.f32 %v5510_v33, %v6533_v19 }
 0x51b   :  { %v2149_v26 = vmul.f32 %v5512_v20, %v6528_v45  ;;  %v2181_v16 = vmul.f32 %v5512_v20, %v6529_v3  ;;  %v2133_v13 = vmul.f32 %v5512_v20, %v6530_v43  ;;  %v2165_v48 = vmul.f32 %v5512_v20, %v6531_v39 }
 0x51c   :  { %v2145_v58 = vmul.f32 %v5512_v20, %v6532_v38  ;;  %v2177_v9 = vmul.f32 %v5512_v20, %v6533_v19  ;;  %v2129_v27 = vmul.f32 %v5512_v20, %v6534_v51  ;;  %v2161_v31 = vmul.f32 %v5512_v20, %v6535_v32 }
 0x51d   :  { %v2251_v28 = vpack.c.bf16 %v2150_v29, %v2149_v26  ;;  %v2267_v63 = vpack.c.bf16 %v2182_v1, %v2181_v16  ;;  %v2243_v40 = vpack.c.bf16 %v2134_v42, %v2133_v13  ;;  %v2259_v62 = vpack.c.bf16 %v2166_v5, %v2165_v48  ;;  %v6537_v26 = vld [vmem:[#allocation29_spill] sm:$0xff] }
 0x51e   :  { %v2249_v30 = vpack.c.bf16 %v2146_v47, %v2145_v58  ;;  %v2265_v25 = vpack.c.bf16 %v2178_v37, %v2177_v9  ;;  %v2130_v16 = vmul.f32 %v5510_v33, %v6534_v51  ;;  %v2141_v1 = vmul.f32 %v5512_v20, %v6536_v41  ;;  %v6541_v5 = vld [vmem:[#allocation33_spill] sm:$0xff]  ;;  %v6543_v58 = vld [vmem:[#allocation35_spill] sm:$0xff] }
 0x51f   :  { %v2169_v37 = vmul.f32 %v5512_v20, %v6541_v5 }
 0x520   :  { %v5514_v10 = vpop.f32.mrf.mxu0 }
 0x521   :  { %v2152_v24 = vmul.f32 %v5514_v10, %v6528_v45  ;;  %v2184_v8 = vmul.f32 %v5514_v10, %v6529_v3  ;;  %v2136_v21 = vmul.f32 %v5514_v10, %v6530_v43  ;;  %v2168_v4 = vmul.f32 %v5514_v10, %v6531_v39 }
 0x522   :  { %v5520_v2 = vpop.f32.mrf.mxu0  ;;  %v2148_v44 = vmul.f32 %v5514_v10, %v6532_v38  ;;  %v2180_v12 = vmul.f32 %v5514_v10, %v6533_v19  ;;  %v2132_v36 = vmul.f32 %v5514_v10, %v6534_v51  ;;  %v2164_v53 = vmul.f32 %v5514_v10, %v6535_v32 }
 0x523   :  { %v2151_v14 = vmul.f32 %v5520_v2, %v6528_v45  ;;  %v2183_v46 = vmul.f32 %v5520_v2, %v6529_v3  ;;  %v2135_v11 = vmul.f32 %v5520_v2, %v6530_v43  ;;  %v2167_v50 = vmul.f32 %v5520_v2, %v6531_v39 }
 0x524   :  { %v2147_v0 = vmul.f32 %v5520_v2, %v6532_v38  ;;  %v2179_v49 = vmul.f32 %v5520_v2, %v6533_v19  ;;  %v2131_v23 = vmul.f32 %v5520_v2, %v6534_v51  ;;  %v2163_v6 = vmul.f32 %v5520_v2, %v6535_v32 }
 0x525   :  { %v2252_v22 = vpack.c.bf16 %v2152_v24, %v2151_v14  ;;  %v2268_v54 = vpack.c.bf16 %v2184_v8, %v2183_v46  ;;  %v2244_v56 = vpack.c.bf16 %v2136_v21, %v2135_v11  ;;  %v2260_v7 = vpack.c.bf16 %v2168_v4, %v2167_v50  ;;  %v6538_v4 = vld [vmem:[#allocation30_spill] sm:$0xff]  ;;  %v6539_v46 = vld [vmem:[#allocation31_spill] sm:$0xff] }
 0x526   :  { %v2250_v18 = vpack.c.bf16 %v2148_v44, %v2147_v0  ;;  %v2266_v52 = vpack.c.bf16 %v2180_v12, %v2179_v49  ;;  %v2242_v34 = vpack.c.bf16 %v2132_v36, %v2131_v23  ;;  %v2258_v35 = vpack.c.bf16 %v2164_v53, %v2163_v6  ;;  %v6540_v49 = vld [vmem:[#allocation32_spill] sm:$0xff]  ;;  %v6542_v23 = vld [vmem:[#allocation34_spill] sm:$0xff] }
 0x527   :  { %3676 = vmatprep.subr.bf16.mxu1 %v2252_v22  ;;  %3704 = vmatprep.subr.bf16.mxu0 %v2268_v54  ;;  %v2143_v45 = vmul.f32 %v5520_v2, %v6536_v41  ;;  %v2175_v3 = vmul.f32 %v5520_v2, %v6537_v26  ;;  %v2162_v24 = vmul.f32 %v5510_v33, %v6535_v32 }
 0x528   :  { %3677 = vmatpush3.bf16.msra.mxu1 %v2244_v56  ;;  %3705 = vmatpush3.bf16.msra.mxu0 %v2260_v7  ;;  %v2144_v8 = vmul.f32 %v5514_v10, %v6536_v41  ;;  %v2176_v43 = vmul.f32 %v5514_v10, %v6537_v26  ;;  %v2241_v21 = vpack.c.bf16 %v2130_v16, %v2129_v27 }
 0x529   :  { %3678 = vmatprep.subr.bf16.mxu1 %v2251_v28  ;;  %3706 = vmatprep.subr.bf16.mxu0 %v2267_v63  ;;  %v2257_v39 = vpack.c.bf16 %v2162_v24, %v2161_v31  ;;  %v2127_v14 = vmul.f32 %v5520_v2, %v6538_v4  ;;  %v2159_v11 = vmul.f32 %v5520_v2, %v6539_v46 }
 0x52a   :  { %v2248_v50 = vpack.c.bf16 %v2144_v8, %v2143_v45  ;;  %v2264_v29 = vpack.c.bf16 %v2176_v43, %v2175_v3  ;;  %v2173_v22 = vmul.f32 %v5512_v20, %v6537_v26  ;;  %v2128_v54 = vmul.f32 %v5514_v10, %v6538_v4  ;;  %v6544_v45 = vld [vmem:[#allocation36_spill] sm:$0xff]  ;;  %v6545_v8 = vld [vmem:[#allocation37_spill] sm:$0xff] }
 0x52b   :  { %v2160_v56 = vmul.f32 %v5514_v10, %v6539_v46  ;;  %v2142_v7 = vmul.f32 %v5510_v33, %v6536_v41  ;;  %v2174_v28 = vmul.f32 %v5510_v33, %v6537_v26  ;;  %v2125_v63 = vmul.f32 %v5512_v20, %v6538_v4 }
 0x52c   :  { %3679 = vmatpush3.bf16.msra.mxu1 %v2243_v40  ;;  %3707 = vmatpush3.bf16.msra.mxu0 %v2259_v62  ;;  %v2240_v13 = vpack.c.bf16 %v2128_v54, %v2127_v14  ;;  %v2157_v38 = vmul.f32 %v5512_v20, %v6539_v46  ;;  %v2139_v42 = vmul.f32 %v5520_v2, %v6540_v49 }
 0x52d   :  { %3680 = vmatprep.subr.bf16.mxu1 %v2250_v18  ;;  %3708 = vmatprep.subr.bf16.mxu0 %v2266_v52  ;;  %v2256_v48 = vpack.c.bf16 %v2160_v56, %v2159_v11  ;;  %v2247_v0 = vpack.c.bf16 %v2142_v7, %v2141_v1  ;;  %v2263_v19 = vpack.c.bf16 %v2174_v28, %v2173_v22  ;;  %v6547_v22 = vld [vmem:[#allocation38_spill] sm:$0xff]  ;;  %v3918_v7 = vld [vmem:[#allocation2] ss:$28 sps:$4 sm:$0xff]   ;;  %v3921_v28 = vld [vmem:[#allocation2 + $0x8] ss:$28 sps:$4 sm:$0xff]  }
 0x52e   :  { %v2171_v44 = vmul.f32 %v5520_v2, %v6541_v5  ;;  %v2126_v12 = vmul.f32 %v5510_v33, %v6538_v4  ;;  %v2158_v40 = vmul.f32 %v5510_v33, %v6539_v46  ;;  %v2140_v62 = vmul.f32 %v5514_v10, %v6540_v49  ;;  %v6546_v4 = vld [vmem:[#allocation39_spill] sm:$0xff] }
 0x52f   :  { %v2172_v51 = vmul.f32 %v5514_v10, %v6541_v5  ;;  %v2123_v32 = vmul.f32 %v5520_v2, %v6542_v23  ;;  %v2124_v52 = vmul.f32 %v5514_v10, %v6542_v23  ;;  %v2155_v9 = vmul.f32 %v5520_v2, %v6543_v58 }
 0x530   :  { %3681 = vmatpush3.bf16.msra.mxu1 %v2242_v34  ;;  %3709 = vmatpush3.bf16.msra.mxu0 %v2258_v35  ;;  %v2239_v6 = vpack.c.bf16 %v2126_v12, %v2125_v63  ;;  %v2255_v18 = vpack.c.bf16 %v2158_v40, %v2157_v38  ;;  %v2246_v36 = vpack.c.bf16 %v2140_v62, %v2139_v42  ;;  %v6548_v62 = vld [vmem:[#allocation40_spill] sm:$0xff] }
 0x531   :  { %3682 = vmatprep.subr.bf16.mxu1 %v2249_v30  ;;  %3710 = vmatprep.subr.bf16.mxu0 %v2265_v25  ;;  %v2262_v53 = vpack.c.bf16 %v2172_v51, %v2171_v44  ;;  %v2137_v47 = vmul.f32 %v5512_v20, %v6540_v49  ;;  %v2156_v34 = vmul.f32 %v5514_v10, %v6543_v58  ;;  %v3929_v44 = vld [vmem:[#allocation2 + $0x3c] ss:$28 sps:$4 sm:$0xff]  }
 0x532   :  { %v2238_v35 = vpack.c.bf16 %v2124_v52, %v2123_v32  ;;  %v2138_v27 = vmul.f32 %v5510_v33, %v6540_v49  ;;  %v2170_v31 = vmul.f32 %v5510_v33, %v6541_v5  ;;  %v2121_v25 = vmul.f32 %v5512_v20, %v6542_v23  ;;  %v3924_v5 = vld [vmem:[#allocation2 + $0x44] ss:$28 sps:$4 sm:$0xff]  }
 0x533   :  { %v2254_v30 = vpack.c.bf16 %v2156_v34, %v2155_v9  ;;  %v2153_v41 = vmul.f32 %v5512_v20, %v6543_v58  ;;  %v2215_v26 = vmul.f32 %v5520_v2, %v6544_v45  ;;  %v2122_v24 = vmul.f32 %v5510_v33, %v6542_v23  ;;  %v3926_v9 = vld [vmem:[#allocation2 + $0x40] ss:$28 sps:$4 sm:$0xff]  }
 0x534   :  { %3683 = vmatpush3.bf16.msra.mxu1 %v2241_v21  ;;  %3711 = vmatpush3.bf16.msra.mxu0 %v2257_v39  ;;  %v2245_v3 = vpack.c.bf16 %v2138_v27, %v2137_v47  ;;  %v2261_v16 = vpack.c.bf16 %v2170_v31, %v2169_v37  ;;  %v2219_v43 = vmul.f32 %v5520_v2, %v6545_v8  ;;  %v3927_v37 = vld [vmem:[#allocation2 + $0x18] ss:$28 sps:$4 sm:$0xff]  }
 0x535   :  { %3684 = vmatprep.subr.bf16.mxu1 %v2248_v50  ;;  %3712 = vmatprep.subr.bf16.mxu0 %v2264_v29  ;;  %v2154_v21 = vmul.f32 %v5510_v33, %v6543_v58  ;;  %v2216_v39 = vmul.f32 %v5514_v10, %v6544_v45  ;;  %v5654_v14 = vmul.f32 %v5512_v20, %v6546_v4  ;;  %v3936_v27 = vld [vmem:[#allocation2 + $0x14] ss:$28 sps:$4 sm:$0xff]  }
 0x536   :  { %v2220_v46 = vmul.f32 %v5514_v10, %v6545_v8  ;;  %v5660_v11 = vmul.f32 %v5510_v33, %v6546_v4  ;;  %v2237_v50 = vpack.c.bf16 %v2122_v24, %v2121_v25  ;;  %v2199_v54 = vmul.f32 %v5520_v2, %v6547_v22  ;;  %v6553_v24 = vld [vmem:[#allocation43_spill] sm:$0xff] }
 0x537   :  { %v2253_v29 = vpack.c.bf16 %v2154_v21, %v2153_v41  ;;  %v2284_v1 = vpack.c.bf16 %v2216_v39, %v2215_v26  ;;  %v2200_v38 = vmul.f32 %v5514_v10, %v6547_v22  ;;  %v2197_v42 = vmul.f32 %v5512_v20, %v6547_v22  ;;  %v6551_v41 = vld [vmem:[#allocation42_spill] sm:$0xff] }
 0x538   :  { %3685 = vmatpush3.bf16.msra.mxu1 %v2240_v13  ;;  %3713 = vmatpush3.bf16.msra.mxu0 %v2256_v48  ;;  %v2286_v56 = vpack.c.bf16 %v2220_v46, %v2219_v43  ;;  %v2213_v13 = vmul.f32 %v5512_v20, %v6544_v45  ;;  %v2217_v48 = vmul.f32 %v5512_v20, %v6545_v8  ;;  %v3928_v21 = vld [vmem:[#allocation2 + $0x50] ss:$28 sps:$4 sm:$0xff]  }
 0x539   :  { %3686 = vmatprep.subr.bf16.mxu1 %v2247_v0  ;;  %3714 = vmatprep.subr.bf16.mxu0 %v2263_v19  ;;  %v2269_v63 = vpack.c.bf16 %v5660_v11, %v5654_v14  ;;  %v2214_v0 = vmul.f32 %v5510_v33, %v6544_v45  ;;  %v2218_v19 = vmul.f32 %v5510_v33, %v6545_v8  ;;  %v3942_v14 = vld [vmem:[%s6248_s10 + $0x8] sm:$0xff]   ;;  %v3943_v11 = vld [vmem:[%s6248_s10] sm:$0xff]   ;;  %s4110_s10 = smov [#allocation13]  }
 0x53a   :  { %v2276_v49 = vpack.c.bf16 %v2200_v38, %v2199_v54  ;;  %v2211_v51 = vmul.f32 %v5520_v2, %v6548_v62  ;;  %v2198_v23 = vmul.f32 %v5510_v33, %v6547_v22  ;;  %v2212_v32 = vmul.f32 %v5514_v10, %v6548_v62  ;;  %s3468_s25 = sshll.u32 %s4110_s10, 4  ;;  %s3469_s25 = int_to_ptr.vmem [resolvable:$true] %s3468_s25 }
 0x53b   :  { %v2283_v12 = vpack.c.bf16 %v2214_v0, %v2213_v13  ;;  %v2285_v40 = vpack.c.bf16 %v2218_v19, %v2217_v48  ;;  %v2210_v34 = vmul.f32 %v5510_v33, %v6548_v62  ;;  %v2207_v45 = vmul.f32 %v5520_v2, %v6551_v41  ;;  %v3933_v13 = vld [vmem:[#allocation8] sm:$0xff]   ;;  %s4066_s7 = scalar_lea.vmem %s3469_s25, 256  ;;  %p4071_p3 = scmp.lt.s32.totalorder %s3469_s25, %s3469_s25 }
 0x53c   :  { %3687 = vmatpush3.bf16.msra.mxu1 %v2239_v6  ;;  %3715 = vmatpush3.bf16.msra.mxu0 %v2255_v18  ;;  %v2275_v6 = vpack.c.bf16 %v2198_v23, %v2197_v42  ;;  %v6549_v18 = vld [vmem:[#allocation41_spill] sm:$0xff]  ;;  %v2282_v58 = vpack.c.bf16 %v2212_v32, %v2211_v51  ;;  %v2191_v8 = vmul.f32 %v5520_v2, %v6553_v24  ;;  %p4067_p2 = scmp.ne.s32.totalorder %s3469_s25, %s4066_s7  ;;  %p4072_p4 = scmp.lt.s32.totalorder %s4066_s7, %s4066_s7 }
 0x53d   :  { %3688 = vmatprep.subr.bf16.mxu1 %v2246_v36  ;;  %3716 = vmatprep.subr.bf16.mxu0 %v2262_v53  ;;  %v2195_v52 = vmul.f32 %v5520_v2, %v6549_v18  ;;  %v2209_v36 = vmul.f32 %v5512_v20, %v6548_v62  ;;  %v3932_v53 = vld [vmem:[#allocation2 + $0x38] ss:$28 sps:$4 sm:$0xff]   ;;  %v2196_v47 = vmul.f32 %v5514_v10, %v6549_v18 }
 0x53e   :  { %v2194_v26 = vmul.f32 %v5510_v33, %v6549_v18  ;;  %v2205_v39 = vmul.f32 %v5512_v20, %v6551_v41  ;;  %v2192_v46 = vmul.f32 %v5514_v10, %v6553_v24  ;;  %v2189_v22 = vmul.f32 %v5512_v20, %v6553_v24  ;;  %p4073_p5 = por %p4072_p4, %p4071_p3 }
 0x53f   :  { %v2274_v31 = vpack.c.bf16 %v2196_v47, %v2195_v52  ;;  %v2281_v25 = vpack.c.bf16 %v2210_v34, %v2209_v36  ;;  %v2187_v0 = vmul.f32 %v5520_v2, %v6546_v4  ;;  %v2188_v42 = vmul.f32 %v5514_v10, %v6546_v4  ;;  %v3940_v4 = vld [vmem:[#allocation5 + $0x8] sm:$0xff]  }
 0x540   :  { %3689 = vmatpush3.bf16.msra.mxu1 %v2238_v35  ;;  %3717 = vmatpush3.bf16.msra.mxu0 %v2254_v30  ;;  %v6550_v35 = vmov 0.0   ;;  %v2193_v30 = vmul.f32 %v5512_v20, %v6549_v18  ;;  %p4074_p6 = pnand %p4073_p5, %p4067_p2 }
 0x541   :  { %3690 = vmatprep.subr.bf16.mxu1 %v2245_v3  ;;  %3718 = vmatprep.subr.bf16.mxu0 %v2261_v16  ;;  %v2208_v3 = vmul.f32 %v5514_v10, %v6551_v41 }
 0x542   :  { %v2273_v16 = vpack.c.bf16 %v2194_v26, %v2193_v30 }
 0x543   :  { %v2280_v43 = vpack.c.bf16 %v2208_v3, %v2207_v45 }
 0x544   :  { %3691 = vmatpush3.bf16.msra.mxu1 %v2237_v50  ;;  %3719 = vmatpush3.bf16.msra.mxu0 %v2253_v29  ;;  %v3931_v50 = vld [vmem:[#allocation8 + $0x8] sm:$0xff]   ;;  %v2206_v29 = vmul.f32 %v5510_v33, %v6551_v41 }
 0x545   :  { %3732 = vmatprep.subr.bf16.mxu1 %v2284_v1  ;;  %3836 = vmatprep.subr.bf16.mxu0 %v2286_v56  ;;  %v2272_v1 = vpack.c.bf16 %v2192_v46, %v2191_v8 }
 0x546   :  { %v2279_v54 = vpack.c.bf16 %v2206_v29, %v2205_v39 }
 0x547   :  { %2396 = vmatmul.mubr.bf16.vlgmr.msra.gmra.mxu1 %v3918_v7  ;;  %2445 = vmatmul.mubr.bf16.vlgmr.msra.gmra.mxu0 %v3921_v28  ;;  %v2190_v28 = vmul.f32 %v5510_v33, %v6553_v24 }
 0x548   :  { %3733 = vmatpush3.bf16.msra.mxu1 %v2276_v49  ;;  %3837 = vmatpush3.bf16.msra.mxu0 %v2286_v56  ;;  %v6555_v56 = vld [vmem:[#allocation44_spill] sm:$0xff] }
 0x549   :  { %3734 = vmatprep.subr.bf16.mxu1 %v2283_v12  ;;  %3838 = vmatprep.subr.bf16.mxu0 %v2285_v40  ;;  %v2203_v7 = vmul.f32 %v5520_v2, %v6555_v56  ;;  %v2204_v48 = vmul.f32 %v5514_v10, %v6555_v56  ;;  %v2271_v38 = vpack.c.bf16 %v2190_v28, %v2189_v22  ;;  %v3937_v10 = vld [vmem:[#allocation2 + $0x4c] ss:$28 sps:$4 sm:$0xff]  }
 0x54a   :  { %2452 = vmatprep.mubr.bf16.mxu0 %v3924_v5  ;;  %2403 = vmatprep.mubr.bf16.mxu1 %v3929_v44  ;;  %v2201_v49 = vmul.f32 %v5512_v20, %v6555_v56  ;;  %v2202_v5 = vmul.f32 %v5510_v33, %v6555_v56  ;;  %v2270_v44 = vpack.c.bf16 %v2188_v42, %v2187_v0  ;;  %v3934_v20 = vld [vmem:[#allocation2 + $0x10] ss:$28 sps:$4 sm:$0xff]   ;;  %v3939_v12 = vld [vmem:[#allocation2 + $0x48] ss:$28 sps:$4 sm:$0xff]  }
 0x54b   :  { %v2278_v19 = vpack.c.bf16 %v2204_v48, %v2203_v7  ;;  %v3941_v33 = vld [vmem:[#allocation5] sm:$0xff]  }
 0x54c   :  { %3735 = vmatpush3.bf16.msra.mxu1 %v2275_v6  ;;  %3839 = vmatpush3.bf16.msra.mxu0 %v2285_v40  ;;  %v2277_v2 = vpack.c.bf16 %v2202_v5, %v2201_v49 }
 0x54d   :  { %3736 = vmatprep.subr.bf16.mxu1 %v2282_v58  ;;  %3852 = vmatprep.subr.bf16.mxu0 %v6550_v35 }
 0x54f   :  { %2453 = vmatmul.mubr.bf16.gmra.mxu0 %v3926_v9  ;;  %2404 = vmatmul.mubr.bf16.gmra.mxu1 %v3932_v53 }
 0x550   :  { %3737 = vmatpush3.bf16.msra.mxu1 %v2274_v31  ;;  %3840 = vmatprep.mubr.msk.bf16.mxu0 %vm6552_vm0, %v3927_v37  ;;  %vm6567_vm0 = vmmov %vm6564_vm2 }
 0x551   :  { %3738 = vmatprep.subr.bf16.mxu1 %v2281_v25  ;;  %2493 = vmatprep.mubr.bf16.mxu1 %v3936_v27 }
 0x554   :  { %3739 = vmatpush3.bf16.msra.mxu1 %v2273_v16 }
 0x555   :  { %3740 = vmatprep.subr.bf16.mxu1 %v2280_v43 }
 0x557   :  { %3841 = vmatmul.mubr.msk.bf16.vlgmr.msra.gmra.mxu0 %vm6554_vm8, %v3928_v21  ;;  %vm6568_vm8 = vmmov %vm6567_vm0 }
 0x558   :  { %3741 = vmatpush3.bf16.msra.mxu1 %v2272_v1  ;;  %3853 = vmatpush3.bf16.msra.mxu0 %v3931_v50 }
 0x559   :  { %3742 = vmatprep.subr.bf16.mxu1 %v2279_v54  ;;  %3854 = vmatprep.subr.bf16.mxu0 %v6550_v35 }
 0x55a   :  { %3856 = vmatprep.mubr.msk.bf16.mxu0 %vm6556_vm10, %v6550_v35 }
 0x55c   :  { %3743 = vmatpush3.bf16.msra.mxu1 %v2271_v38  ;;  %3855 = vmatpush3.bf16.msra.mxu0 %v3933_v13 }
 0x55d   :  { %3744 = vmatprep.subr.bf16.mxu1 %v2278_v19  ;;  %3868 = vmatprep.subr.bf16.mxu0 %v6550_v35  ;;  %v6561_v19 = vld [vmem:[#allocation49_spill] sm:$0xff] }
 0x55f   :  { %3857 = vmatmul.mubr.msk.bf16.vlgmr.msra.gmra.mxu0 %vm6557_vm1, %v5504_v15  ;;  %vm6572_vm1 = vmmov %vm6567_vm0 }
 0x560   :  { %3745 = vmatpush3.bf16.msra.mxu1 %v2270_v44  ;;  %3872 = vmatprep.mubr.msk.bf16.mxu0 %vm6556_vm10, %v6550_v35 }
 0x561   :  { %3746 = vmatprep.subr.bf16.mxu1 %v2277_v2 }
 0x564   :  { %3747 = vmatpush3.bf16.msra.mxu1 %v2269_v63  ;;  %v6559_v63 = vld [vmem:[#allocation19_spill] sm:$0xff] }
 0x565   :  { %3844 = vmatprep.subr.bf16.mxu1 %v6550_v35 }
 0x567   :  { %2494 = vmatmul.mubr.bf16.vlgmr.msra.gmra.mxu1 %v3934_v20 }
 0x568   :  { %2501 = vmatprep.mubr.bf16.mxu1 %v3937_v10  ;;  %3845 = vmatpush3.bf16.msra.mxu1 %v3940_v4 }
 0x569   :  { %3846 = vmatprep.subr.bf16.mxu1 %v6550_v35 }
 0x56c   :  { %3847 = vmatpush3.bf16.msra.mxu1 %v3941_v33 }
 0x56d   :  { %3860 = vmatprep.subr.bf16.mxu1 %v6550_v35 }
 0x56f   :  { %2502 = vmatmul.mubr.bf16.gmra.mxu1 %v3939_v12 }
 0x570   :  { %3848 = vmatprep.mubr.msk.bf16.mxu1 %vm6556_vm10, %v6550_v35 }
 0x577   :  { %3849 = vmatmul.mubr.msk.bf16.vlgmr.msra.gmra.mxu1 %vm6558_vm14, %v5504_v15 }
 0x578   :  { %3861 = vmatpush3.bf16.msra.mxu1 %v3942_v14  ;;  %3864 = vmatprep.mubr.msk.bf16.mxu1 %vm6556_vm10, %v6550_v35  ;;  %vm6571_vm10 = vmmov %vm6567_vm0 }
 0x579   :  { %3862 = vmatprep.subr.bf16.mxu1 %v6550_v35 }
 0x57c   :  { %3863 = vmatpush3.bf16.msra.mxu1 %v3943_v11 }
 0x57f   :  { %3865 = vmatmul.mubr.msk.bf16.vlgmr.msra.gmra.mxu1 %vm6560_vm12, %v6559_v63 }
 0x607   :  { %v3692_v40 = vpop.f32.mrf.mxu1  ;;  %v3720_v62 = vpop.f32.mrf.mxu0 }
 0x609   :  { %v3693_v51 = vpop.f32.mrf.mxu1  ;;  %v3721_v23 = vpop.f32.mrf.mxu0 }
 0x60a   :  { %v3694_v43 = vadd.f32 %v3693_v51, %v3692_v40  ;;  %v3722_v21 = vadd.f32 %v3721_v23, %v3720_v62 }
 0x60b   :  { %v3695_v32 = vpop.f32.mrf.mxu1  ;;  %v3723_v15 = vpop.f32.mrf.mxu0 }
 0x60c   :  { %v2447_v50 = vadd.f32 %v3722_v21, %v3694_v43 }
 0x60d   :  { %v3696_v6 = vpop.f32.mrf.mxu1  ;;  %v3724_v18 = vpop.f32.mrf.mxu0 }
 0x60e   :  { %v3697_v29 = vadd.f32 %v3696_v6, %v3695_v32  ;;  %v3725_v1 = vadd.f32 %v3724_v18, %v3723_v15  ;;  %v6570_v15 = vld [vmem:[#allocation52_spill] sm:$0xff] }
 0x60f   :  { %v5756_v52 = vpop.f32.mrf.mxu0  ;;  %v5758_v58 = vpop.f32.mrf.mxu1 }
 0x610   :  { %v2450_v28 = vadd.f32 %v3725_v1, %v3697_v29 }
 0x611   :  { %v5760_v9 = vpop.f32.mrf.mxu0  ;;  %v5762_v36 = vpop.f32.mrf.mxu1 }
 0x613   :  { %v3729_v53 = vpop.f32.mrf.mxu0  ;;  %v3701_v47 = vpop.f32.mrf.mxu1 }
 0x615   :  { %v3730_v37 = vpop.f32.mrf.mxu0  ;;  %v3702_v34 = vpop.f32.mrf.mxu1 }
 0x616   :  { %v3731_v27 = vadd.f32 %v3730_v37, %v3729_v53  ;;  %v3703_v31 = vadd.f32 %v3702_v34, %v3701_v47 }
 0x617   :  { %v5764_v30 = vpop.f32.mrf.mxu0 }
 0x618   :  { %v2458_v25 = vadd.f32 %v3731_v27, %v3703_v31  ;;  %v6573_v31 = vld [vmem:[#allocation51_spill] sm:$0xff] }
 0x619   :  { %v2544_v41 = vpop.f32.mrf.mxu0  ;;  %vm6574_vm14 = vnez %v6573_v31 }
 0x61b   :  { %v3843_v45 = vpop.f32.mrf.mxu0 }
 0x61d   :  { %v2547_v26 = vpop.f32.mrf.mxu0 }
 0x61f   :  { %v3329_v3 = vpop.f32.mrf.mxu0 }
 0x621   :  { %v3858_v16 = vpop.f32.mrf.mxu0 }
 0x623   :  { %v5766_v24 = vpop.f32.mrf.mxu0 }
 0x625   :  { %v3859_v8 = vpop.f32.mrf.mxu0 }
 0x627   :  { %v3748_v39 = vpop.f32.mrf.mxu1 }
 0x629   :  { %v3749_v46 = vpop.f32.mrf.mxu1 }
 0x62a   :  { %v3750_v22 = vadd.f32 %v3749_v46, %v3748_v39  ;;  %v6581_v46 = vld [vmem:[#allocation47_spill] sm:$0xff] }
 0x62b   :  { %v3751_v54 = vpop.f32.mrf.mxu1 }
 0x62c   :  { %v2496_v56 = vadd.f32 %v3750_v22, %v2447_v50 }
 0x62d   :  { %v3752_v7 = vpop.f32.mrf.mxu1 }
 0x62e   :  { %v5768_v13 = vadd.f32 %v2544_v41, %v2496_v56  ;;  %v3753_v48 = vadd.f32 %v3752_v7, %v3751_v54  ;;  %v6584_v7 = vld [vmem:[#allocation56_spill] sm:$0xff] }
 0x62f   :  { %v3754_v38 = vpop.f32.mrf.mxu1 }
 0x630   :  { %v2499_v0 = vadd.f32 %v3753_v48, %v2450_v28  ;;  %v2599_v49 = vsel %vm4860_vm9, %v5768_v13, -inf  ;;  %v2559_v5 = vsel %vm4814_vm11, %v5768_v13, -inf  ;;  %v2563_v33 = vsel %vm4824_vm13, %v5768_v13, -inf  ;;  %v6586_v48 = vld [vmem:[#allocation50_spill] sm:$0xff]  ;;  %vm6593_vm9 = vmmov %vm6572_vm1 }
 0x631   :  { %v3755_v44 = vpop.f32.mrf.mxu1  ;;  %v2743_v2 = vsel %vm6563_vm5, %v2599_v49, -inf  ;;  %v2623_v20 = vsel %vm6564_vm2, %v2559_v5, -inf  ;;  %v2635_v62 = vsel %vm6568_vm8, %v2563_v33, -inf  ;;  %v2591_v6 = vsel %vm4891_vm7, %v5768_v13, -inf  ;;  %vm6577_vm5 = vmmov %vm6567_vm0 }
 0x632   :  { %v5778_v10 = vadd.f32 %v2547_v26, %v2499_v0  ;;  %2744 = vmax.xlane.f32.xlu1 %v2743_v2  ;;  %2624 = vmax.xlane.f32.xlu0 %v2623_v20  ;;  %v2719_v34 = vsel %vm6572_vm1, %v2591_v6, -inf  ;;  %v6575_v26 = vld [vmem:[#allocation54_spill] sm:$0xff]  ;;  %vm6578_vm2 = vmmov %vm6567_vm0  ;;  %vm6582_vm8 = vnez %v6581_v46  ;;  %v3700_v5 = vadd.f32 %v5762_v36, %v5758_v58 }
 0x633   :  { %v3757_v12 = vpop.f32.mrf.mxu1  ;;  %vm6576_vm12 = vnez %v6575_v26  ;;  %v2567_v50 = vsel %vm6582_vm8, %v5768_v13, -inf  ;;  %vm6594_vm8 = vmmov %vm6572_vm1 }
 0x634   :  { %v2576_v11 = vsel %vm4838_vm6, %v5778_v10, -inf  ;;  %v2608_v32 = vsel %vm4961_vm4, %v5778_v10, -inf  ;;  %v2580_v41 = vsel %vm6574_vm14, %v5778_v10, -inf  ;;  %v2595_v16 = vsel %vm6576_vm12, %v5768_v13, -inf  ;;  %vm6597_vm12 = vmmov %vm6572_vm1 }
 0x635   :  { %v3758_v63 = vpop.f32.mrf.mxu1  ;;  %v2674_v40 = vsel %vm6567_vm0, %v2576_v11, -inf  ;;  %v2770_v37 = vsel %vm6571_vm10, %v2608_v32, -inf  ;;  %v2686_v43 = vsel %vm6577_vm5, %v2580_v41, -inf  ;;  %v2731_v21 = vsel %vm6578_vm2, %v2595_v16, -inf  ;;  %vm6583_vm10 = vmmov %vm6572_vm1 }
 0x636   :  { %v3759_v51 = vadd.f32 %v3758_v63, %v3757_v12  ;;  %2675 = vmax.xlane.f32.xlu1 %v2674_v40  ;;  %2636 = vmax.xlane.f32.xlu0 %v2635_v62  ;;  %v2647_v56 = vsel %vm6572_vm1, %v2567_v50, -inf  ;;  %vm6585_vm5 = vnez %v6584_v7  ;;  %vm6587_vm2 = vnez %v6586_v48  ;;  %v6589_v63 = vld [vmem:[#allocation60_spill] sm:$0xff]  ;;  %vm6601_vm7 = vmmov %vm6572_vm1 }
 0x637   :  { %v5794_v18 = vpop.f32.mrf.mxu1  ;;  %v2584_v28 = vsel %vm6585_vm5, %v5778_v10, -inf  ;;  %v2571_v0 = vsel %vm6587_vm2, %v5768_v13, -inf  ;;  %v3756_v11 = vadd.f32 %v3755_v44, %v3754_v38  ;;  %vm6590_vm3 = vnez %v6589_v63  ;;  %v6595_v38 = vld [vmem:[#allocation58_spill] sm:$0xff] }
 0x638   :  { %v2507_v53 = vadd.f32 %v3759_v51, %v2458_v25  ;;  %v2659_v33 = vsel %vm6572_vm1, %v2571_v0, -inf  ;;  %v2616_v40 = vsel %vm6590_vm3, %v5778_v10, -inf  ;;  %v2575_v51 = vsel %vm4838_vm6, %v5768_v13, -inf }
 0x639   :  { %v3850_v47 = vpop.f32.mrf.mxu1  ;;  %v2794_v36 = vsel %vm6593_vm9, %v2616_v40, -inf  ;;  %v2671_v6 = vsel %vm6597_vm12, %v2575_v51, -inf  ;;  %vm6602_vm12 = vmmov %vm6572_vm1 }
 0x63a   :  { %v5798_v27 = vadd.f32 %v3843_v45, %v2507_v53  ;;  %2771 = vmax.xlane.f32.xlu1 %v2770_v37  ;;  %2720 = vmax.xlane.f32.xlu0 %v2719_v34  ;;  %v6579_v45 = vld [vmem:[#allocation59_spill] sm:$0xff]  ;;  %v6598_v47 = vld [vmem:[#allocation53_spill] sm:$0xff]  ;;  %v2607_v34 = vsel %vm4961_vm4, %v5768_v13, -inf }
 0x63b   :  { %v5806_v8 = vpop.f32.mrf.mxu1  ;;  %vm6580_vm0 = vnez %v6579_v45  ;;  %vm6599_vm9 = vnez %v6598_v47  ;;  %v2767_v16 = vsel %vm6601_vm7, %v2607_v34, -inf  ;;  %vm6603_vm7 = vmmov %vm6572_vm1  ;;  %v2572_v47 = vsel %vm6587_vm2, %v5778_v10, -inf }
 0x63c   :  { %v2612_v39 = vsel %vm6580_vm0, %v5778_v10, -inf  ;;  %v2620_v37 = vsel %vm6599_vm9, %v5778_v10, -inf  ;;  %v2611_v50 = vsel %vm6580_vm0, %v5768_v13, -inf }
 0x63d   :  { %v3851_v25 = vpop.f32.mrf.mxu1  ;;  %v2782_v54 = vsel %vm6583_vm10, %v2612_v39, -inf  ;;  %vm6588_vm10 = vmmov %vm6572_vm1 }
 0x63e   :  { %2687 = vmax.xlane.f32.xlu1 %v2686_v43  ;;  %2732 = vmax.xlane.f32.xlu0 %v2731_v21  ;;  %v2698_v20 = vsel %vm6588_vm10, %v2584_v28, -inf  ;;  %vm6596_vm10 = vnez %v6595_v38  ;;  %v2579_v25 = vsel %vm6574_vm14, %v5768_v13, -inf }
 0x63f   :  { %v3382_v29 = vpop.f32.mrf.mxu1  ;;  %v2588_v44 = vsel %vm6596_vm10, %v5778_v10, -inf  ;;  %v2683_v21 = vsel %vm6572_vm1, %v2579_v25, -inf }
 0x640   :  { %v5816_v1 = vadd.f32 %v3382_v29, %v3329_v3  ;;  %v3728_v3 = vadd.f32 %v5760_v9, %v5756_v52  ;;  %v6591_v52 = vld [vmem:[#allocation55_spill] sm:$0xff]  ;;  %v2710_v32 = vsel %vm6572_vm1, %v2588_v44, -inf  ;;  %v2560_v44 = vsel %vm4814_vm11, %v5778_v10, -inf }
 0x641   :  { %v3866_v22 = vpop.f32.mrf.mxu1  ;;  %vm6592_vm15 = vnez %v6591_v52 }
 0x642   :  { %2783 = vmax.xlane.f32.xlu1 %v2782_v54  ;;  %2648 = vmax.xlane.f32.xlu0 %v2647_v56  ;;  %v2603_v9 = vsel %vm6592_vm15, %v5768_v13, -inf  ;;  %v2455_v58 = vadd.f32 %v3728_v3, %v3700_v5  ;;  %v2583_v56 = vsel %vm6585_vm5, %v5768_v13, -inf  ;;  %v2615_v3 = vsel %vm6590_vm3, %v5768_v13, -inf }
 0x643   :  { %v3385_v49 = vpop.f32.mrf.mxu1  ;;  %v2695_v0 = vsel %vm6572_vm1, %v2583_v56, -inf }
 0x644   :  { %v5831_v2 = vadd.f32 %v3385_v49, %v5766_v24  ;;  %v2755_v24 = vsel %vm6594_vm8, %v2603_v9, -inf  ;;  %v2504_v62 = vadd.f32 %v3756_v11, %v2455_v58  ;;  %vm6600_vm8 = vmmov %vm6572_vm1  ;;  %v2619_v58 = vsel %vm6599_vm9, %v5768_v13, -inf }
 0x645   :  { %v3867_v12 = vpop.f32.mrf.mxu1  ;;  %v2806_v41 = vsel %vm6600_vm8, %v2620_v37, -inf  ;;  %vm6604_vm8 = vmmov %vm6572_vm1 }
 0x646   :  { %2699 = vmax.xlane.f32.xlu1 %v2698_v20  ;;  %2660 = vmax.xlane.f32.xlu0 %v2659_v33  ;;  %v5852_v53 = vadd.f32 %v5764_v30, %v2504_v62  ;;  %v2779_v22 = vsel %vm6604_vm8, %v2611_v50, -inf  ;;  %vm6607_vm8 = vmmov %vm6572_vm1  ;;  %v2587_v12 = vsel %vm6596_vm10, %v5768_v13, -inf }
 0x647   :  { %v2791_v20 = vsel %vm6607_vm8, %v2615_v3, -inf  ;;  %v2707_v40 = vsel %vm6572_vm1, %v2587_v12, -inf  ;;  %vm6610_vm8 = vmmov %vm6572_vm1  ;;  %v2604_v3 = vsel %vm6592_vm15, %v5778_v10, -inf }
 0x648   :  { %v2573_v30 = vsel %vm6587_vm2, %v5852_v53, -inf  ;;  %v2605_v39 = vsel %vm6592_vm15, %v5852_v53, -inf  ;;  %v2577_v54 = vsel %vm4838_vm6, %v5852_v53, -inf  ;;  %v2609_v49 = vsel %vm4961_vm4, %v5852_v53, -inf }
 0x649   :  { %v2665_v43 = vsel %vm6602_vm12, %v2573_v30, -inf  ;;  %v2761_v29 = vsel %vm6603_vm7, %v2605_v39, -inf  ;;  %vm6605_vm12 = vmmov %vm6572_vm1  ;;  %v2581_v33 = vsel %vm6574_vm14, %v5852_v53, -inf  ;;  %v2613_v9 = vsel %vm6580_vm0, %v5852_v53, -inf }
 0x64a   :  { %2795 = vmax.xlane.f32.xlu1 %v2794_v36  ;;  %2756 = vmax.xlane.f32.xlu0 %v2755_v24  ;;  %v2677_v28 = vsel %vm6605_vm12, %v2577_v54, -inf  ;;  %vm6606_vm7 = vmmov %vm6572_vm1  ;;  %v2803_v24 = vsel %vm6610_vm8, %v2619_v58, -inf  ;;  %v2585_v62 = vsel %vm6585_vm5, %v5852_v53, -inf  ;;  %v2617_v13 = vsel %vm6590_vm3, %v5852_v53, -inf }
 0x64b   :  { %v2773_v5 = vsel %vm6606_vm7, %v2609_v49, -inf  ;;  %vm6608_vm12 = vmmov %vm6572_vm1  ;;  %v2565_v12 = vsel %vm4824_vm13, %v5852_v53, -inf }
 0x64c   :  { %v2689_v11 = vsel %vm6608_vm12, %v2581_v33, -inf  ;;  %vm6609_vm7 = vmmov %vm6572_vm1 }
 0x64d   :  { %v2785_v36 = vsel %vm6609_vm7, %v2613_v9, -inf  ;;  %vm6611_vm12 = vmmov %vm6572_vm1 }
 0x64e   :  { %2711 = vmax.xlane.f32.xlu1 %v2710_v32  ;;  %2672 = vmax.xlane.f32.xlu0 %v2671_v6  ;;  %v2701_v51 = vsel %vm6611_vm12, %v2585_v62, -inf  ;;  %v2626_v32 = vsel %vm6572_vm1, %v2560_v44, -inf  ;;  %v2564_v6 = vsel %vm4824_vm13, %v5778_v10, -inf  ;;  %vm6612_vm7 = vmmov %vm6572_vm1  ;;  %vm6614_vm12 = vnez %v6570_v15 }
 0x64f   :  { %v2797_v37 = vsel %vm6612_vm7, %v2617_v13, -inf  ;;  %vm6613_vm8 = vmmov %vm6572_vm1  ;;  %vm6616_vm7 = vnez %v6575_v26  ;;  %v2566_v13 = vsel %vm4824_vm13, %v5798_v27, -inf  ;;  %v2574_v26 = vsel %vm6587_vm2, %v5798_v27, -inf }
 0x650   :  { %v2638_v34 = vsel %vm6613_vm8, %v2564_v6, -inf  ;;  %vm6615_vm3 = vmmov %vm6572_vm1  ;;  %v2597_v9 = vsel %vm6616_vm7, %v5852_v53, -inf  ;;  %v2598_v42 = vsel %vm6616_vm7, %v5798_v27, -inf }
 0x651   :  { %vm6617_vm8 = vmmov %vm6572_vm1 }
 0x652   :  { %2807 = vmax.xlane.f32.xlu1 %v2806_v41  ;;  %2768 = vmax.xlane.f32.xlu0 %v2767_v16  ;;  %v2589_v41 = vsel %vm6596_vm10, %v5852_v53, -inf  ;;  %v2592_v16 = vsel %vm6614_vm12, %v5778_v10, -inf  ;;  %vm6618_vm10 = vmmov %vm6572_vm1 }
 0x653   :  { %v2713_v30 = vsel %vm6572_vm1, %v2589_v41, -inf  ;;  %v2722_v25 = vsel %vm6615_vm3, %v2592_v16, -inf  ;;  %vm6619_vm3 = vnez %v6581_v46  ;;  %vm6620_vm5 = vmmov %vm6572_vm1  ;;  %v2606_v46 = vsel %vm6592_vm15, %v5798_v27, -inf }
 0x654   :  { %v2570_v4 = vsel %vm6619_vm3, %v5798_v27, -inf  ;;  %vm6632_vm13 = vmmov %vm6572_vm1 }
 0x655   :  { %v2656_v41 = vsel %vm6632_vm13, %v2570_v4, -inf  ;;  %vm6637_vm2 = vmmov %vm6572_vm1 }
 0x656   :  { %2666 = vmax.xlane.f32.xlu1 %v2665_v43  ;;  %2684 = vmax.xlane.f32.xlu0 %v2683_v21  ;;  %v2621_v43 = vsel %vm6599_vm9, %v5852_v53, -inf  ;;  %v2596_v21 = vsel %vm6616_vm7, %v5778_v10, -inf  ;;  %vm6634_vm7 = vmmov %vm6572_vm1 }
 0x657   :  { %v2809_v39 = vsel %vm6617_vm8, %v2621_v43, -inf  ;;  %v2734_v50 = vsel %vm6618_vm10, %v2596_v21, -inf  ;;  %vm6621_vm8 = vnez %v6561_v19  ;;  %vm6622_vm10 = vmmov %vm6572_vm1  ;;  %v2578_v19 = vsel %vm4838_vm6, %v5798_v27, -inf }
 0x658   :  { %v2601_v62 = vsel %vm6621_vm8, %v5852_v53, -inf  ;;  %v2602_v15 = vsel %vm6621_vm8, %v5798_v27, -inf  ;;  %vm6638_vm15 = vmmov %vm6572_vm1  ;;  %vm6640_vm6 = vnez %v6584_v7 }
 0x65a   :  { %2762 = vmax.xlane.f32.xlu1 %v2761_v29  ;;  %2780 = vmax.xlane.f32.xlu0 %v2779_v22  ;;  %v2622_v29 = vsel %vm6599_vm9, %v5798_v27, -inf  ;;  %v2568_v22 = vsel %vm6619_vm3, %v5778_v10, -inf  ;;  %vm6623_vm9 = vmmov %vm6572_vm1 }
 0x65b   :  { %v2812_v54 = vsel %vm6572_vm1, %v2622_v29, -inf  ;;  %v2650_v56 = vsel %vm6620_vm5, %v2568_v22, -inf  ;;  %v2662_v49 = vsel %vm6623_vm9, %v2572_v47, -inf  ;;  %vm6624_vm5 = vmmov %vm6572_vm1  ;;  %v2582_v22 = vsel %vm6574_vm14, %v5798_v27, -inf }
 0x65c   :  { %vm6626_vm9 = vmmov %vm6572_vm1  ;;  %v2692_v14 = vsel %vm6638_vm15, %v2582_v22, -inf  ;;  %v2586_v47 = vsel %vm6640_vm6, %v5798_v27, -inf }
 0x65d   :  { %vm6641_vm14 = vmmov %vm6572_vm1 }
 0x65e   :  { %2678 = vmax.xlane.f32.xlu1 %v2677_v28  ;;  %2696 = vmax.xlane.f32.xlu0 %v2695_v0  ;;  %v2600_v28 = vsel %vm6621_vm8, %v5778_v10, -inf  ;;  %v2593_v10 = vsel %vm6614_vm12, %v5852_v53, -inf  ;;  %vm6636_vm8 = vmmov %vm6572_vm1 }
 0x65f   :  { %v2746_v0 = vsel %vm6622_vm10, %v2600_v28, -inf  ;;  %vm6625_vm10 = vmmov %vm6572_vm1  ;;  %v2680_v48 = vsel %vm6636_vm8, %v2578_v19, -inf }
 0x662   :  { %2774 = vmax.xlane.f32.xlu1 %v2773_v5  ;;  %2792 = vmax.xlane.f32.xlu0 %v2791_v20  ;;  %v2758_v5 = vsel %vm6624_vm5, %v2604_v3, -inf  ;;  %v2561_v20 = vsel %vm4814_vm11, %v5852_v53, -inf  ;;  %vm6627_vm5 = vmmov %vm6572_vm1  ;;  %v2704_v3 = vsel %vm6641_vm14, %v2586_v47, -inf }
 0x663   :  { %v2629_v33 = vsel %vm6572_vm1, %v2561_v20, -inf  ;;  %v2737_v58 = vsel %vm6627_vm5, %v2597_v9, -inf  ;;  %vm6630_vm5 = vmmov %vm6572_vm1 }
 0x664   :  { %v2644_v6 = vsel %vm6630_vm5, %v2566_v13, -inf  ;;  %vm6645_vm5 = vnez %v6595_v38 }
 0x666   :  { %2690 = vmax.xlane.f32.xlu1 %v2689_v11  ;;  %2708 = vmax.xlane.f32.xlu0 %v2707_v40  ;;  %v2641_v11 = vsel %vm6625_vm10, %v2565_v12, -inf  ;;  %v2725_v40 = vsel %vm6626_vm9, %v2593_v10, -inf  ;;  %vm6628_vm10 = vmmov %vm6572_vm1 }
 0x667   :  { %v2749_v44 = vsel %vm6628_vm10, %v2601_v62, -inf  ;;  %vm6629_vm9 = vmmov %vm6572_vm1  ;;  %vm6642_vm10 = vnez %v6589_v63  ;;  %v3944_v62 = vld [vmem:[#allocation10 + $0x8] sm:$0xff]  }
 0x668   :  { %v2618_v45 = vsel %vm6642_vm10, %v5798_v27, -inf  ;;  %3869 = vmatpush3.bf16.msra.mxu0 %v3944_v62  ;;  %vm6658_vm10 = vcmask 261312  }
 0x669   :  { %3870 = vmatprep.subr.bf16.mxu0 %v6550_v35 }
 0x66a   :  { %2786 = vmax.xlane.f32.xlu1 %v2785_v36  ;;  %2804 = vmax.xlane.f32.xlu0 %v2803_v24  ;;  %v2569_v36 = vsel %vm6619_vm3, %v5852_v53, -inf  ;;  %v2594_v53 = vsel %vm6614_vm12, %v5798_v27, -inf  ;;  %vm6633_vm12 = vmmov %vm6572_vm1 }
 0x66b   :  { %v2653_v24 = vsel %vm6572_vm1, %v2569_v36, -inf  ;;  %v2752_v16 = vsel %vm6633_vm12, %v2602_v15, -inf  ;;  %vm6635_vm3 = vmmov %vm6572_vm1 }
 0x66c   :  { %v2764_v21 = vsel %vm6635_vm3, %v2606_v46, -inf }
 0x66e   :  { %2702 = vmax.xlane.f32.xlu1 %v2701_v51  ;;  %2627 = vmax.xlane.f32.xlu0 %v2626_v32  ;;  %v2562_v51 = vsel %vm4814_vm11, %v5798_v27, -inf  ;;  %vm6631_vm11 = vmmov %vm6572_vm1 }
 0x66f   :  { %v2632_v32 = vsel %vm6629_vm9, %v2562_v51, -inf  ;;  %vm6644_vm9 = vcmask 130112  }
 0x670   :  { %vm6648_vm13 = vmmov %vm6644_vm9 }
 0x671   :  { %vm6649_vm12 = vmmov %vm6644_vm9 }
 0x672   :  { %2798 = vmax.xlane.f32.xlu1 %v2797_v37  ;;  %2639 = vmax.xlane.f32.xlu0 %v2638_v34  ;;  %v2728_v37 = vsel %vm6572_vm1, %v2594_v53, -inf  ;;  %v2740_v34 = vsel %vm6631_vm11, %v2598_v42, -inf  ;;  %vm6647_vm11 = vmmov %vm6644_vm9 }
 0x676   :  { %2714 = vmax.xlane.f32.xlu1 %v2713_v30  ;;  %2723 = vmax.xlane.f32.xlu0 %v2722_v25  ;;  %v2668_v25 = vsel %vm6634_vm7, %v2574_v26, -inf  ;;  %vm6650_vm7 = vmmov %vm6644_vm9 }
 0x677   :  { %vm6651_vm3 = vmmov %vm6650_vm7 }
 0x678   :  { %vm6652_vm8 = vmmov %vm6651_vm3 }
 0x67a   :  { %2810 = vmax.xlane.f32.xlu1 %v2809_v39  ;;  %2735 = vmax.xlane.f32.xlu0 %v2734_v50  ;;  %v2610_v50 = vsel %vm4961_vm4, %v5798_v27, -inf  ;;  %vm6639_vm4 = vmmov %vm6572_vm1 }
 0x67b   :  { %v2776_v52 = vsel %vm6637_vm2, %v2610_v50, -inf  ;;  %vm6653_vm2 = vmmov %vm6651_vm3 }
 0x67c   :  { %vm6654_vm15 = vmmov %vm6653_vm2 }
 0x67e   :  { %2813 = vmax.xlane.f32.xlu1 %v2812_v54  ;;  %2651 = vmax.xlane.f32.xlu0 %v2650_v56  ;;  %v2614_v56 = vsel %vm6580_vm0, %v5798_v27, -inf  ;;  %vm6643_vm0 = vmmov %vm6572_vm1 }
 0x67f   :  { %v2788_v23 = vsel %vm6639_vm4, %v2614_v56, -inf  ;;  %v2800_v12 = vsel %vm6643_vm0, %v2618_v45, -inf  ;;  %vm6646_vm1 = vmmov %vm6643_vm0  ;;  %vm6655_vm4 = vcmask 195712  }
 0x680   :  { %vm6656_vm6 = vmmov %vm6655_vm4 }
 0x681   :  { %vm6657_vm14 = vmmov %vm6655_vm4 }
 0x682   :  { %2747 = vmax.xlane.f32.xlu0 %v2746_v0  ;;  %vm6659_vm0 = vmmov %vm6658_vm10 }
 0x686   :  { %2663 = vmax.xlane.f32.xlu0 %v2662_v49 }
 0x68a   :  { %2759 = vmax.xlane.f32.xlu0 %v2758_v5 }
 0x68e   :  { %2630 = vmax.xlane.f32.xlu0 %v2629_v33 }
 0x692   :  { %2642 = vmax.xlane.f32.xlu0 %v2641_v11  ;;  %v2590_v11 = vsel %vm6645_vm5, %v5798_v27, -inf  ;;  %v3945_v27 = vld [vmem:[#allocation10] sm:$0xff]   ;;  %vm6661_vm5 = vmmov %vm6655_vm4 }
 0x693   :  { %v2716_v63 = vsel %vm6646_vm1, %v2590_v11, -inf  ;;  %3871 = vmatpush3.bf16.msra.mxu0 %v3945_v27  ;;  %vm6662_vm1 = vmmov %vm6659_vm0 }
 0x696   :  { %2726 = vmax.xlane.f32.xlu0 %v2725_v40 }
 0x69a   :  { %2738 = vmax.xlane.f32.xlu0 %v2737_v58 }
 0x69e   :  { %2654 = vmax.xlane.f32.xlu0 %v2653_v24 }
 0x6a2   :  { %2750 = vmax.xlane.f32.xlu0 %v2749_v44 }
 0x6a6   :  { %2633 = vmax.xlane.f32.xlu0 %v2632_v32 }
 0x6aa   :  { %2645 = vmax.xlane.f32.xlu0 %v2644_v6 }
 0x6ae   :  { %2729 = vmax.xlane.f32.xlu0 %v2728_v37 }
 0x6b2   :  { %2741 = vmax.xlane.f32.xlu0 %v2740_v34 }
 0x6b6   :  { %2657 = vmax.xlane.f32.xlu0 %v2656_v41 }
 0x6ba   :  { %2753 = vmax.xlane.f32.xlu0 %v2752_v16 }
 0x6bb   :  { %v2625_v30 = vpop.xlane.xlu0 %2624  ;;  %v2745_v28 = vpop.xlane.xlu1 %2744 }
 0x6bc   :  { %v2882_v51 = vrot.slane %v2625_v30, %v5303_v60 }
 0x6be   :  { %2669 = vmax.xlane.f32.xlu0 %v2668_v25 }
 0x6bf   :  { %v2637_v43 = vpop.xlane.xlu0 %2636  ;;  %v2676_v49 = vpop.xlane.xlu1 %2675 }
 0x6c0   :  { %v2962_v20 = vrot.slane %v2676_v49, %v5306_v59  ;;  %v2901_v37 = vrot.slane %v2637_v43, %v5303_v60 }
 0x6c2   :  { %2765 = vmax.xlane.f32.xlu0 %v2764_v21 }
 0x6c3   :  { %v2721_v39 = vpop.xlane.xlu0 %2720  ;;  %v6072_v13 = vpop.xlane.xlu1 %2771 }
 0x6c4   :  { %v3034_v35 = vrot.slane %v2721_v39, %v5303_v60 }
 0x6c6   :  { %2681 = vmax.xlane.f32.xlu0 %v2680_v48 }
 0x6c7   :  { %v2733_v29 = vpop.xlane.xlu0 %2732  ;;  %v6079_v41 = vpop.xlane.xlu1 %2687 }
 0x6c8   :  { %v3053_v30 = vrot.slane %v2733_v29, %v5303_v60 }
 0x6ca   :  { %2777 = vmax.xlane.f32.xlu0 %v2776_v52  ;;  %v3072_v52 = vrot.slane %v2745_v28, %v5303_v60 }
 0x6cb   :  { %v2649_v54 = vpop.xlane.xlu0 %2648  ;;  %v6085_v46 = vpop.xlane.xlu1 %2783 }
 0x6cc   :  { %v2920_v19 = vrot.slane %v2649_v54, %v5303_v60 }
 0x6ce   :  { %2693 = vmax.xlane.f32.xlu0 %v2692_v14 }
 0x6cf   :  { %v6033_v0 = vpop.xlane.xlu0 %2660  ;;  %v6092_v22 = vpop.xlane.xlu1 %2699 }
 0x6d2   :  { %2789 = vmax.xlane.f32.xlu0 %v2788_v23  ;;  %v2939_v23 = vrot.slane %v6033_v0, %v5303_v60 }
 0x6d3   :  { %v6039_v31 = vpop.xlane.xlu0 %2756  ;;  %v6099_v54 = vpop.xlane.xlu1 %2795 }
 0x6d4   :  { %v3091_v28 = vrot.slane %v6039_v31, %v5303_v60 }
 0x6d6   :  { %2705 = vmax.xlane.f32.xlu0 %v2704_v3 }
 0x6d7   :  { %v2673_v5 = vpop.xlane.xlu0 %2672 }
 0x6d8   :  { %v2958_v33 = vrot.slane %v2673_v5, %v5303_v60 }
 0x6da   :  { %v6049_v7 = vsel %vm6644_vm9, %v2962_v20, %v2958_v33  ;;  %2801 = vmax.xlane.f32.xlu0 %v2800_v12  ;;  %v6106_v33 = vpop.xlane.xlu1 %2711  ;;  %vm6660_vm9 = vcmask 1041409  }
 0x6db   :  { %v6054_v10 = vpop.xlane.xlu0 %2768 }
 0x6de   :  { %2717 = vmax.xlane.f32.xlu0 %v2716_v63  ;;  %v6111_v62 = vpop.xlane.xlu1 %2807 }
 0x6df   :  { %v6057_v40 = vpop.xlane.xlu0 %2684 }
 0x6e3   :  { %v6059_v9 = vpop.xlane.xlu0 %2780 }
 0x6e7   :  { %v6061_v58 = vpop.xlane.xlu0 %2696 }
 0x6eb   :  { %v6063_v36 = vpop.xlane.xlu0 %2792 }
 0x6ef   :  { %v6065_v24 = vpop.xlane.xlu0 %2708 }
 0x6f3   :  { %v6067_v44 = vpop.xlane.xlu0 %2804 }
 0x6f7   :  { %v2628_v38 = vpop.xlane.xlu0 %2627 }
 0x6f8   :  { %v2886_v32 = vrot.slane %v2628_v38, %v5306_v59 }
 0x6fa   :  { %v2887_v6 = vsel %vm6647_vm11, %v2886_v32, %v2882_v51  ;;  %vm6663_vm11 = vmmov %vm6659_vm0 }
 0x6fb   :  { %v2640_v53 = vpop.xlane.xlu0 %2639 }
 0x6fc   :  { %v2905_v42 = vrot.slane %v2640_v53, %v5306_v59  ;;  %v2667_v53 = vpop.xlane.xlu1 %2666 }
 0x6fe   :  { %v2906_v34 = vsel %vm6648_vm13, %v2905_v42, %v2901_v37  ;;  %vm6664_vm13 = vmmov %vm6660_vm9 }
 0x6ff   :  { %v2724_v4 = vpop.xlane.xlu0 %2723 }
 0x700   :  { %v3038_v15 = vrot.slane %v2724_v4, %v5306_v59  ;;  %v2763_v42 = vpop.xlane.xlu1 %2762 }
 0x702   :  { %v3039_v16 = vsel %vm6649_vm12, %v3038_v15, %v3034_v35  ;;  %vm6665_vm12 = vmmov %vm6655_vm4 }
 0x703   :  { %v2736_v26 = vpop.xlane.xlu0 %2735 }
 0x704   :  { %v3057_v25 = vrot.slane %v2736_v26, %v5306_v59  ;;  %v2679_v15 = vpop.xlane.xlu1 %2678 }
 0x706   :  { %v3058_v43 = vsel %vm6650_vm7, %v3057_v25, %v3053_v30  ;;  %vm6666_vm7 = vmmov %vm6659_vm0 }
 0x707   :  { %v2652_v21 = vpop.xlane.xlu0 %2651 }
 0x708   :  { %v2924_v39 = vrot.slane %v2652_v21, %v5306_v59  ;;  %v2775_v25 = vpop.xlane.xlu1 %2774 }
 0x70a   :  { %v2925_v48 = vsel %vm6651_vm3, %v2924_v39, %v2920_v19  ;;  %vm6667_vm3 = vcmask 1042434  }
 0x70b   :  { %v2748_v50 = vpop.xlane.xlu0 %2747 }
 0x70c   :  { %v3076_v29 = vrot.slane %v2748_v50, %v5306_v59 }
 0x70e   :  { %v3077_v14 = vsel %vm6652_vm8, %v3076_v29, %v3072_v52  ;;  %v2691_v29 = vpop.xlane.xlu1 %2690  ;;  %vm6668_vm8 = vmmov %vm6655_vm4 }
 0x70f   :  { %v2664_v56 = vpop.xlane.xlu0 %2663 }
 0x710   :  { %v2943_v47 = vrot.slane %v2664_v56, %v5306_v59 }
 0x712   :  { %v2944_v49 = vsel %vm6653_vm2, %v2943_v47, %v2939_v23  ;;  %vm6669_vm2 = vmmov %vm6659_vm0 }
 0x713   :  { %v2760_v3 = vpop.xlane.xlu0 %2759 }
 0x714   :  { %v3095_v45 = vrot.slane %v2760_v3, %v5306_v59 }
 0x716   :  { %v3096_v5 = vsel %vm6654_vm15, %v3095_v45, %v3091_v28  ;;  %vm6670_vm15 = vmmov %vm6667_vm3 }
 0x717   :  { %v2631_v20 = vpop.xlane.xlu0 %2630 }
 0x718   :  { %v2891_v12 = vrot.slane %v2631_v20, %v5309_v57 }
 0x71a   :  { %v2892_v0 = vsel %vm6655_vm4, %v2891_v12, %v2887_v6 }
 0x71b   :  { %v2643_v11 = vpop.xlane.xlu0 %2642 }
 0x71c   :  { %v2910_v63 = vrot.slane %v2643_v11, %v5309_v57 }
 0x71e   :  { %v2911_v27 = vsel %vm6656_vm6, %v2910_v63, %v2906_v34  ;;  %v2787_v63 = vpop.xlane.xlu1 %2786  ;;  %vm6671_vm6 = vmmov %vm6659_vm0 }
 0x71f   :  { %v2727_v38 = vpop.xlane.xlu0 %2726 }
 0x720   :  { %v3043_v31 = vrot.slane %v2727_v38, %v5309_v57 }
 0x722   :  { %v3044_v51 = vsel %vm6657_vm14, %v3043_v31, %v3039_v16  ;;  %vm6672_vm14 = vcmask 1043459  }
 0x723   :  { %v2739_v32 = vpop.xlane.xlu0 %2738 }
 0x724   :  { %v3062_v39 = vrot.slane %v2739_v32, %v5309_v57 }
 0x726   :  { %v3063_v23 = vsel %vm6661_vm5, %v3062_v39, %v3058_v43  ;;  %vm6675_vm5 = vmmov %vm6655_vm4 }
 0x727   :  { %v2655_v37 = vpop.xlane.xlu0 %2654 }
 0x728   :  { %v2929_v47 = vrot.slane %v2655_v37, %v5309_v57  ;;  %v2948_v37 = vrot.slane %v2667_v53, %v5309_v57 }
 0x72b   :  { %v2751_v4 = vpop.xlane.xlu0 %2750 }
 0x72c   :  { %v3081_v11 = vrot.slane %v2751_v4, %v5309_v57 }
 0x72f   :  { %v2634_v35 = vpop.xlane.xlu0 %2633 }
 0x730   :  { %v2896_v6 = vrot.slane %v2634_v35, %v5314_v55 }
 0x732   :  { %v2897_v34 = vsel %vm6658_vm10, %v2896_v6, %v2892_v0  ;;  %v2930_v0 = vsel %vm6665_vm12, %v2929_v47, %v2925_v48  ;;  %v2703_v48 = vpop.xlane.xlu1 %2702  ;;  %vm6673_vm10 = vmmov %vm6655_vm4  ;;  %v3119_v47 = vrot.slane %v2775_v25, %v5309_v57  ;;  %v2986_v25 = vrot.slane %v2691_v29, %v5309_v57 }
 0x733   :  { %v2646_v26 = vpop.xlane.xlu0 %2645  ;;  %vm6679_vm12 = vmmov %vm6655_vm4  ;;  %v3133_v29 = vrot.slane %v6085_v46, %v5306_v59  ;;  %v3000_v46 = vrot.slane %v6092_v22, %v5306_v59 }
 0x734   :  { %v2915_v30 = vrot.slane %v2646_v26, %v5314_v55  ;;  %v2949_v26 = vsel %vm6655_vm4, %v2948_v37, %v2944_v49  ;;  %v3110_v49 = vrot.slane %v6054_v10, %v5303_v60  ;;  %v2977_v10 = vrot.slane %v6057_v40, %v5303_v60 }
 0x735   :  { %v3129_v40 = vrot.slane %v6059_v9, %v5303_v60  ;;  %v2996_v9 = vrot.slane %v6061_v58, %v5303_v60 }
 0x736   :  { %v2916_v21 = vsel %vm6659_vm0, %v2915_v30, %v2911_v27  ;;  %v2799_v39 = vpop.xlane.xlu1 %2798 }
 0x737   :  { %v3183_v19 = vsel %vm6660_vm9, %v2916_v21, %v2897_v34  ;;  %v2730_v16 = vpop.xlane.xlu0 %2729  ;;  %v3100_v34 = vrot.slane %v2763_v42, %v5309_v57  ;;  %vm6674_vm9 = vmmov %vm6672_vm14  ;;  %v3157_v22 = vrot.slane %v2799_v39, %v5309_v57  ;;  %v3015_v39 = vrot.slane %v6065_v24, %v5303_v60 }
 0x738   :  { %v3048_v50 = vrot.slane %v2730_v16, %v5314_v55  ;;  %v2967_v16 = vrot.slane %v2679_v15, %v5309_v57  ;;  %v3114_v15 = vrot.slane %v6072_v13, %v5306_v59  ;;  %v2981_v13 = vrot.slane %v6079_v41, %v5306_v59 }
 0x739   :  { %v3101_v53 = vsel %vm6673_vm10, %v3100_v34, %v3096_v5  ;;  %vm6688_vm10 = vmmov %vm6659_vm0 }
 0x73a   :  { %v3049_v3 = vsel %vm6662_vm1, %v3048_v50, %v3044_v51  ;;  %v3082_v51 = vsel %vm6668_vm8, %v3081_v11, %v3077_v14  ;;  %vm6676_vm1 = vmmov %vm6659_vm0 }
 0x73b   :  { %v2742_v52 = vpop.xlane.xlu0 %2741 }
 0x73c   :  { %v3067_v56 = vrot.slane %v2742_v52, %v5314_v55 }
 0x73e   :  { %v3068_v28 = vsel %vm6663_vm11, %v3067_v56, %v3063_v23  ;;  %v2968_v23 = vsel %vm6675_vm5, %v2967_v16, %v6049_v7  ;;  %vm6677_vm11 = vcmask 1044484  }
 0x73f   :  { %v3190_v45 = vsel %vm6664_vm13, %v3068_v28, %v3049_v3  ;;  %v2658_v20 = vpop.xlane.xlu0 %2657  ;;  %vm6678_vm13 = vcmask 130112  }
 0x740   :  { %v2934_v12 = vrot.slane %v2658_v20, %v5314_v55  ;;  %v2715_v20 = vpop.xlane.xlu1 %2714  ;;  %vm6682_vm8 = vmmov %vm6678_vm13 }
 0x742   :  { %v2935_v27 = vsel %vm6666_vm7, %v2934_v12, %v2930_v0  ;;  %vm6680_vm7 = vmmov %vm6659_vm0 }
 0x743   :  { %v3184_v43 = vsel %vm6667_vm3, %v2935_v27, %v3183_v19  ;;  %v2754_v38 = vpop.xlane.xlu0 %2753  ;;  %vm6681_vm3 = vmmov %vm6677_vm11 }
 0x744   :  { %v3086_v31 = vrot.slane %v2754_v38, %v5314_v55  ;;  %v2811_v41 = vpop.xlane.xlu1 %2810 }
 0x746   :  { %v3087_v32 = vsel %vm6669_vm2, %v3086_v31, %v3082_v51  ;;  %vm6683_vm2 = vmmov %vm6655_vm4  ;;  %v3138_v51 = vrot.slane %v2787_v63, %v5309_v57  ;;  %vm6685_vm4 = vcmask 1045509   ;;  %v3005_v63 = vrot.slane %v2703_v48, %v5309_v57 }
 0x747   :  { %v3191_v35 = vsel %vm6670_vm15, %v3087_v32, %v3190_v45  ;;  %v2670_v6 = vpop.xlane.xlu0 %2669  ;;  %v3115_v45 = vsel %vm6678_vm13, %v3114_v15, %v3110_v49  ;;  %vm6684_vm15 = vmmov %vm6659_vm0 }
 0x748   :  { %v2953_v4 = vrot.slane %v2670_v6, %v5314_v55  ;;  %v3120_v7 = vsel %vm6679_vm12, %v3119_v47, %v3115_v45  ;;  %v2814_v58 = vpop.xlane.xlu1 %2813  ;;  %vm6691_vm5 = vmmov %vm6683_vm2 }
 0x749   :  { %v3181_v49 = vrot.slane %v2814_v58, %v5314_v55 }
 0x74a   :  { %v2954_v30 = vsel %vm6671_vm6, %v2953_v4, %v2949_v26  ;;  %vm6686_vm6 = vmmov %vm6682_vm8 }
 0x74b   :  { %v3185_v21 = vsel %vm6672_vm14, %v2954_v30, %v3184_v43  ;;  %v2766_v19 = vpop.xlane.xlu0 %2765  ;;  %v2982_v43 = vsel %vm6682_vm8, %v2981_v13, %v2977_v10  ;;  %v3134_v6 = vsel %vm6686_vm6, %v3133_v29, %v3129_v40  ;;  %vm6687_vm14 = vmmov %vm6683_vm2 }
 0x74c   :  { %v3105_v14 = vrot.slane %v2766_v19, %v5314_v55  ;;  %v2987_v31 = vsel %vm6683_vm2, %v2986_v25, %v2982_v43  ;;  %v3139_v26 = vsel %vm6687_vm14, %v3138_v51, %v3134_v6  ;;  %vm6693_vm13 = vmmov %vm6686_vm6 }
 0x74d   :  { %vm6694_vm12 = vmmov %vm6686_vm6 }
 0x74e   :  { %v3106_v50 = vsel %vm6659_vm0, %v3105_v14, %v3101_v53  ;;  %vm6689_vm0 = vmmov %vm6685_vm4  ;;  %v3148_v14 = vrot.slane %v6063_v36, %v5303_v60  ;;  %v3167_v53 = vrot.slane %v6067_v44, %v5303_v60  ;;  %v3171_v36 = vrot.slane %v6111_v62, %v5306_v59 }
 0x74f   :  { %v3192_v52 = vsel %vm6674_vm9, %v3106_v50, %v3191_v35  ;;  %v2682_v56 = vpop.xlane.xlu0 %2681  ;;  %vm6690_vm9 = vmmov %vm6686_vm6  ;;  %v3152_v50 = vrot.slane %v6099_v54, %v5306_v59  ;;  %v3019_v62 = vrot.slane %v6106_v33, %v5306_v59 }
 0x750   :  { %v2972_v42 = vrot.slane %v2682_v56, %v5314_v55  ;;  %v3001_v19 = vsel %vm6690_vm9, %v3000_v46, %v2996_v9  ;;  %v3172_v54 = vsel %vm6694_vm12, %v3171_v36, %v3167_v53  ;;  %vm6697_vm8 = vmmov %vm6676_vm1 }
 0x751   :  { %v3006_v48 = vsel %vm6691_vm5, %v3005_v63, %v3001_v19  ;;  %v3153_v44 = vsel %vm6693_vm13, %v3152_v50, %v3148_v14  ;;  %vm6706_vm5 = vcmp.gt.f32.partialorder %v5492_v61, 0.0 }
 0x752   :  { %v2973_v5 = vsel %vm6676_vm1, %v2972_v42, %v2968_v23 }
 0x753   :  { %v3186_v3 = vsel %vm6677_vm11, %v2973_v5, %v3185_v21  ;;  %v2778_v28 = vpop.xlane.xlu0 %2777  ;;  %vm6692_vm11 = vcmask 1046534   ;;  %v3024_v5 = vrot.slane %v2715_v20, %v5309_v57  ;;  %v3550_v20 = vld [vmem:[#allocation7] ss:$0 sm:$0xff] }
 0x754   :  { %v3124_v12 = vrot.slane %v2778_v28, %v5314_v55 }
 0x756   :  { %v3125_v0 = vsel %vm6680_vm7, %v3124_v12, %v3120_v7  ;;  %vm6695_vm7 = vmmov %vm6683_vm2 }
 0x757   :  { %v3193_v11 = vsel %vm6681_vm3, %v3125_v0, %v3192_v52  ;;  %v2694_v27 = vpop.xlane.xlu0 %2693  ;;  %v3176_v52 = vrot.slane %v2811_v41, %v5309_v57  ;;  %v3158_v15 = vsel %vm6695_vm7, %v3157_v22, %v3153_v44  ;;  %vm6696_vm3 = vmmov %vm6683_vm2 }
 0x758   :  { %v2991_v38 = vrot.slane %v2694_v27, %v5314_v55  ;;  %vm6698_vm2 = vmmov %vm6676_vm1 }
 0x759   :  { %vm6702_vm14 = vmmov %vm6696_vm3 }
 0x75a   :  { %v2992_v32 = vsel %vm6684_vm15, %v2991_v38, %v2987_v31  ;;  %vm6699_vm15 = vmmov %vm6692_vm11  ;;  %v3560_v31 = vld [vmem:[#allocation11] ss:$0 sm:$0xff] }
 0x75b   :  { %v3187_v37 = vsel %vm6685_vm4, %v2992_v32, %v3186_v3  ;;  %v2790_v35 = vpop.xlane.xlu0 %2789  ;;  %v3177_v3 = vsel %vm6696_vm3, %v3176_v52, %v3172_v54  ;;  %vm6700_vm4 = vmmov %vm6686_vm6  ;;  %vm6701_vm6 = vcmask 1047559  }
 0x75c   :  { %v3143_v4 = vrot.slane %v2790_v35, %v5314_v55  ;;  %v3182_v45 = vsel %vm6698_vm2, %v3181_v49, %v3177_v3  ;;  %v3020_v24 = vsel %vm6700_vm4, %v3019_v62, %v3015_v39  ;;  %vm6705_vm9 = vmmov %vm6701_vm6 }
 0x75d   :  { %v3025_v57 = vsel %vm6702_vm14, %v3024_v5, %v3020_v24 }
 0x75e   :  { %v3144_v30 = vsel %vm6688_vm10, %v3143_v4, %v3139_v26  ;;  %vm6703_vm10 = vcmp.gt.f32.partialorder %v5471_v17, 0.0 }
 0x75f   :  { %v3194_v34 = vsel %vm6689_vm0, %v3144_v30, %v3193_v11  ;;  %v2706_v21 = vpop.xlane.xlu0 %2705  ;;  %vm6704_vm0 = vmmov %vm6676_vm1 }
 0x760   :  { %v3010_v16 = vrot.slane %v2706_v21, %v5314_v55 }
 0x762   :  { %v3011_v56 = vsel %vm6676_vm1, %v3010_v16, %v3006_v48  ;;  %vm6707_vm1 = vcmask 261120  }
 0x763   :  { %v3188_v42 = vsel %vm6692_vm11, %v3011_v56, %v3187_v37  ;;  %v2802_v23 = vpop.xlane.xlu0 %2801  ;;  %vm6708_vm11 = vmmov %vm6707_vm1 }
 0x764   :  { %v3162_v47 = vrot.slane %v2802_v23, %v5314_v55  ;;  %vm6709_vm13 = vmmov %vm6707_vm1 }
 0x766   :  { %v3163_v28 = vsel %vm6697_vm8, %v3162_v47, %v3158_v15 }
 0x767   :  { %v3195_v10 = vsel %vm6699_vm15, %v3163_v28, %v3194_v34  ;;  %v2718_v60 = vpop.xlane.xlu0 %2717 }
 0x768   :  { %v3196_v12 = vsel %vm6701_vm6, %v3182_v45, %v3195_v10  ;;  %v3029_v7 = vrot.slane %v2718_v60, %v5314_v55 }
 0x769   :  { %v3200_v59 = vsel %vm6703_vm10, %v3196_v12, 0.0 }
 0x76a   :  { %v3263_v33 = vadd.f32 %v5806_v8, %v3200_v59  ;;  %v3030_v25 = vsel %vm6704_vm0, %v3029_v7, %v3025_v57 }
 0x76b   :  { %v3189_v13 = vsel %vm6705_vm9, %v3030_v25, %v3188_v42 }
 0x76c   :  { %v3199_v0 = vsel %vm6706_vm5, %v3189_v13, 0.0  ;;  %v3272_v11 = vadd.f32 %v3550_v20, %v3263_v33 }
 0x76d   :  { %v3262_v27 = vadd.f32 %v5794_v18, %v3199_v0 }
 0x76e   :  { %v3274_v55 = vmax.f32 %v3272_v11, 0.0 }
 0x76f   :  { %v3271_v43 = vadd.f32 %v3550_v20, %v3262_v27 }
 0x771   :  { %v3273_v40 = vmax.f32 %v3271_v43, 0.0 }
 0x773   :  { %v3389_v38 = vpack.c.bf16 %v3274_v55, %v3273_v40 }
 0x775   :  { %3873 = vmatmul.mubr.msk.bf16.vlgmr.msra.gmra.mxu0 %vm6707_vm1, %v3389_v38 }
 0x835   :  { %v3443_v17 = vpop.f32.mrf.mxu0 }
 0x836   :  { %v3450_v8 = vadd.f32 %v3443_v17, %v5816_v1 }
 0x837   :  { %v3874_v51 = vpop.f32.mrf.mxu0 }
 0x838   :  { %v3459_v29 = vadd.f32 %v3560_v31, %v3450_v8 }
 0x839   :  { %v3446_v41 = vpop.f32.mrf.mxu0 }
 0x83a   :  { %3461 = vst.msk [vmem:[#allocation13] sm:$0xff] %vm6708_vm11, %v3459_v29  ;;  %v3451_v61 = vadd.f32 %v3446_v41, %v5831_v2 }
 0x83b   :  { %v3875_v18 = vpop.f32.mrf.mxu0 }
 0x83c   :  { %v3460_v32 = vadd.f32 %v3560_v31, %v3451_v61 }
 0x83e   :  { %3462 = vst.msk [vmem:[#allocation13 + $0x8] sm:$0xff] %vm6709_vm13, %v3460_v32 }
 0x83f   :  { %4077 = shalt.err (!%p4074_p6)
}
 0x840   :  { %s4111_s23 = smov 128   ;;  %s4112_s26 = smov 8  }
 0x841   :  { %3474 = dma.vmem_to_hbm [thread:$0]  %s3469_s25, 256, %s6252_s14, [#allocation4], %s4111_s23, %s4111_s23, %s4112_s26  }
 0x842   :  { %4094 = dma.done.wait [#allocation4], 256  }
 0x843   :  { %4095 = vsyncadd [#allocation4], 4294967040 }
 0x844   :  { %3478 = vsyncpa [#allocation3], 1 }
 0x845   :  { %3479 = vsyncpa [#allocation6], 1 }
 0x846   :  { %3480 = vsyncpa [#allocation9], 1 }
 0x847   :  { %3481 = vsyncpa [#allocation12], 1 }
 0x848   :  { %3482 = vsyncpa [#allocation4], 1 }

</bundles_post_ra>
